<compile_context>
chip_gen: v6e
topology: v6e:2x2x1
jax: 0.10.0
libtpu: 0.0.40
codegen_flags: <defaults>
</compile_context>

<pallas_src>
import functools

import numpy as np
import jax
import jax.numpy as jnp
from jax.experimental import pallas as pl
from jax.experimental.pallas import tpu as pltpu

# ----------------------------- model config (small, synthetic) ------------------------
MEL_DIM = 80          # n_mel_channels
MEL_PAD = 128         # lane-dense carry width for mel features (80 real + 48 zero lanes)
DIM = 128             # DiT model dim (1024 in checkpoint)
TEXT_DIM = 64         # codec/text embed dim (512 in checkpoint)
HEADS = 4             # (16 in checkpoint)
HEAD_DIM = DIM // HEADS
DEPTH = 2             # (22 in checkpoint)
FF_MULT = 2
VOCAB = 97            # codec_embed_size (8193 in checkpoint)
FACTOR = 2            # '50hz' -> repeats=2
HOP = 240             # audio samples per mel frame (24kHz vocoder hop)
HOP_PAD = 256         # lane-dense padded hop for the vocoder projection
STEPS = 4
CFG_STRENGTH = 0.5
SWAY_COEF = -1.0
LN_EPS = 1e-6         # TODO(synk): F5-style DiT uses eps=1e-6; nn.LayerNorm default is 1e-5 — verify vs checkpoint.
COMPUTE_DTYPE = jnp.bfloat16
VMEM_LIMIT_BYTES = 48 * 1024 * 1024   # explicit scoped-VMEM cap (v7x physical VMEM = 64 MiB)


# ----------------------------- tiling helpers ------------------------------------------
def _tile_m(m, cap=256):
    """M tile: largest multiple-of-8 divisor of m that is <= cap, preferring >= 2 blocks
    (DMA/compute pipelining + v7x 2-TensorCore sharding) once m is large enough to
    amortize the ~0.35us per-grid-step overhead.  Always returns an exact divisor of m,
    so callers use exact grids (m // tile) with no masked tails."""
    if m <= 64:
        return m
    start = min(cap, m // 2)
    start -= start % 8
    for t in range(start, 7, -8):
        if m % t == 0:
            return t
    # TODO(synk): pathological m with no multiple-of-8 divisor <= cap: pad rows up to a
    # tile multiple in the row-independent kernels instead of falling back to one block.
    return m if m <= cap else m


def _tile_dim(extent, cap, mult):
    """Largest divisor of `extent` <= cap that is a multiple of `mult` (else full extent)."""
    if extent <= cap:
        return extent
    start = cap - cap % mult
    for t in range(start, mult - 1, -mult):
        if extent % t == 0:
            return t
    return extent


# ----------------------------- single-buffered constant-weight specs --------------------
def _probe_kernel(x_ref, o_ref):
    o_ref[...] = x_ref[...] + 1.0


def _probe_buffered1():
    """Check whether this Pallas build supports single-buffered (pl.Buffered(1))
    constant-index input BlockSpecs; fall back to default double-buffering if not."""
    try:
        spec = pl.BlockSpec((8, 128), lambda i: (0, 0), pipeline_mode=pl.Buffered(1))
        out = pl.pallas_call(
            _probe_kernel,
            out_shape=jax.ShapeDtypeStruct((16, 128), jnp.float32),
            grid=(2,),
            in_specs=[spec],
            out_specs=pl.BlockSpec((8, 128), lambda i: (i, 0)),
        )(jnp.zeros((8, 128), jnp.float32))
        jax.block_until_ready(out)
        return True
    except Exception:  # any failure -> default buffering (correctness unaffected)
        return False


_HAS_BUFFERED1 = _probe_buffered1()
_HAS_EINSHAPE = hasattr(pltpu, "einshape")


def _const_spec(shape):
    """BlockSpec for weights/biases whose index_map is constant across the grid.
    Single-buffered when supported so resident weights are not duplicated by the
    double-buffering pipeline (matters at checkpoint scale on v7x's 64 MiB VMEM)."""
    index_map = lambda *_idx, _n=len(shape): (0,) * _n
    if _HAS_BUFFERED1:
        return pl.BlockSpec(shape, index_map, pipeline_mode=pl.Buffered(1))
    return pl.BlockSpec(shape, index_map)


def _row(a, n):
    return a.reshape(1, n).astype(jnp.float32)


def _modulated_layernorm(x, g, b, shift, scale):
    """f32 LayerNorm + elementwise affine + AdaLN shift/scale (all VPU work in f32)."""
    mu = jnp.mean(x, axis=-1, keepdims=True)
    var = jnp.mean(jnp.square(x - mu), axis=-1, keepdims=True)
    xn = (x - mu) * jax.lax.rsqrt(var + LN_EPS)
    xn = xn * g + b
    return xn * (1.0 + scale) + shift


def _to_head_major(x):
    """[N, H, hd] -> [H, N, hd] inside a kernel (lane-layout-aware when available)."""
    return pltpu.einshape("nhd->hnd", x) if _HAS_EINSHAPE else jnp.swapaxes(x, 0, 1)


def _from_head_major(x):
    """[H, N, hd] -> [N, H, hd]."""
    return pltpu.einshape("hnd->nhd", x) if _HAS_EINSHAPE else jnp.swapaxes(x, 0, 1)


# ----------------------------- generic (M,N,K)-tiled linear (off the hot loop) ---------
def _linear_tiled_kernel(x_ref, w_ref, b_ref, o_ref, acc_ref, *, act):
    @pl.when(pl.program_id(2) == 0)
    def _():
        acc_ref[...] = jnp.zeros_like(acc_ref)

    acc_ref[...] += jnp.dot(x_ref[...], w_ref[...], preferred_element_type=jnp.float32)

    @pl.when(pl.program_id(2) == pl.num_programs(2) - 1)
    def _():
        y = acc_ref[...] + b_ref[...]
        if act == "silu":
            y = y * jax.nn.sigmoid(y)
        elif act == "gelu":
            y = jax.nn.gelu(y, approximate=True)
        elif act == "tanh":
            y = jnp.tanh(y)
        o_ref[...] = y.astype(o_ref.dtype)


def pallas_linear(x, w, b, *, act=None, out_dtype=jnp.float32, tm=256, tn=512, tk=512):
    """x: [M, K] @ w: [K, N] + b: [N], (M, N, K)-tiled with an f32 VMEM accumulator.
    Used only off the euler hot loop (conditioning projection, vocoder stand-in)."""
    m, k = x.shape
    n = w.shape[1]
    tm = _tile_m(m, tm)
    tn = _tile_dim(n, tn, 128)
    tk = _tile_dim(k, tk, 128)
    kern = functools.partial(_linear_tiled_kernel, act=act)
    return pl.pallas_call(
        kern,
        out_shape=jax.ShapeDtypeStruct((m, n), out_dtype),
        grid=(m // tm, n // tn, k // tk),
        in_specs=[
            pl.BlockSpec((tm, tk), lambda i, j, kk: (i, kk)),
            pl.BlockSpec((tk, tn), lambda i, j, kk: (kk, j)),
            pl.BlockSpec((1, tn), lambda i, j, kk: (0, j)),
        ],
        out_specs=pl.BlockSpec((tm, tn), lambda i, j, kk: (i, j)),
        scratch_shapes=[pltpu.VMEM((tm, tn), jnp.float32)],
        compiler_params=pltpu.CompilerParams(
            dimension_semantics=("parallel", "parallel", "arbitrary"),
            vmem_limit_bytes=VMEM_LIMIT_BYTES),
    )(x, w, b.reshape(1, n).astype(jnp.float32))


# ----------------------------- fused DiT attention branch ------------------------------
def _attn_block_kernel(h_ref, g_ref, b_ref, sh_ref, sc_ref, gate_ref,
                       qkvw_ref, qkvb_ref, ow_ref, ob_ref, o_ref, *, heads, head_dim):
    """One DiT attention branch for one CFG half, fully fused:
         h <- h + gate * OProj(MHA(QKV(AdaLN(LN(h)))))
    qkv / att never leave VMEM.  The 1/sqrt(head_dim) scale is pre-folded into qkv_w.
    TODO(synk): at checkpoint N (thousands of frames) replace the full [H,N,N] score
    matrix with flash-style online-softmax over KV tiles (pltpu.emit_pipeline) and add
    q-tile / head grid axes so v7x gets >= 4 parallel blocks."""
    d = heads * head_dim
    x = h_ref[...]                                                        # [N, D] f32
    xn = _modulated_layernorm(x, g_ref[...], b_ref[...], sh_ref[...], sc_ref[...])
    qkv = jnp.dot(xn.astype(qkvw_ref.dtype), qkvw_ref[...],
                  preferred_element_type=jnp.float32) + qkvb_ref[...]     # [N, 3D] f32
    n = x.shape[0]
    # 128-lane-aligned q/k/v slices straight off the f32 accumulator; heads become the
    # dot_general batch dim (no per-head Python matmul loop).
    # TODO(synk): at checkpoint head_dim=64, pack 2 (v5e) / 4 (v6e, v7x) heads per
    # contraction group to fill the 128/256-wide MXU.
    q = qkv[:, 0 * d:1 * d].astype(COMPUTE_DTYPE).reshape(n, heads, head_dim)
    k = qkv[:, 1 * d:2 * d].astype(COMPUTE_DTYPE).reshape(n, heads, head_dim)
    v = qkv[:, 2 * d:3 * d].astype(COMPUTE_DTYPE).reshape(n, heads, head_dim)
    qh = _to_head_major(q)                                                # [H, N, hd]
    kh = _to_head_major(k)
    vh = _to_head_major(v)
    s = jnp.einsum("hqd,hkd->hqk", qh, kh, preferred_element_type=jnp.float32)
    s = s - jnp.max(s, axis=-1, keepdims=True)
    p = jnp.exp(s)
    p = p * pl.reciprocal(jnp.sum(p, axis=-1, keepdims=True), approx=True)
    ctx = jnp.einsum("hqk,hkd->hqd", p.astype(COMPUTE_DTYPE), vh,
                     preferred_element_type=jnp.float32)                  # [H, N, hd]
    att = _from_head_major(ctx.astype(COMPUTE_DTYPE)).reshape(n, d)       # [N, D] bf16
    proj = jnp.dot(att, ow_ref[...], preferred_element_type=jnp.float32) + ob_ref[...]
    o_ref[...] = x + gate_ref[...] * proj                                 # f32 residual


def attn_block(h, seq_len, ln_g, ln_b, shift, scale, gate, qkv_w, qkv_b, o_w, o_b):
    """h: [2N, D] f32 residual (CFG cond + null halves stacked).  One pallas_call per DiT
    block, grid over the two CFG halves (one per v7x TensorCore)."""
    m, d = h.shape
    b2 = m // seq_len
    d3 = qkv_w.shape[1]
    kern = functools.partial(_attn_block_kernel, heads=HEADS, head_dim=HEAD_DIM)
    return pl.pallas_call(
        kern,
        out_shape=jax.ShapeDtypeStruct((m, d), jnp.float32),
        grid=(b2,),
        in_specs=[
            pl.BlockSpec((seq_len, d), lambda i: (i, 0)),
            _const_spec((1, d)), _const_spec((1, d)), _const_spec((1, d)),
            _const_spec((1, d)), _const_spec((1, d)),
            _const_spec((d, d3)), _const_spec((1, d3)),
            _const_spec((d, d)), _const_spec((1, d)),
        ],
        out_specs=pl.BlockSpec((seq_len, d), lambda i: (i, 0)),
        compiler_params=pltpu.CompilerParams(
            dimension_semantics=("parallel",), vmem_limit_bytes=VMEM_LIMIT_BYTES),
    )(h, _row(ln_g, d), _row(ln_b, d), _row(shift, d), _row(scale, d), _row(gate, d),
      qkv_w, _row(qkv_b, d3), o_w, _row(o_b, d))


# ----------------------------- fused DiT FFN branch ------------------------------------
def _adaln_ffn_res_kernel(x_ref, g_ref, b_ref, sh_ref, sc_ref, gate_ref,
                          w1_ref, b1_ref, w2_ref, b2_ref, o_ref):
    """h <- h + gate * FFN(AdaLN(LN(h))) — whole FFN branch fused, f32 residual in/out.
    TODO(synk): at checkpoint DIM=1024/dff=4096 split dff into K-chunks with an f32 VMEM
    accumulator if h1 plus both weights push past the scoped-VMEM limit (v6e)."""
    x = x_ref[...].astype(jnp.float32)
    xn = _modulated_layernorm(x, g_ref[...], b_ref[...], sh_ref[...], sc_ref[...])
    h1 = jnp.dot(xn.astype(w1_ref.dtype), w1_ref[...], preferred_element_type=jnp.float32)
    # TODO(synk): approximate (tanh) GELU; the checkpoint may use exact erf GELU.
    h1 = jax.nn.gelu(h1 + b1_ref[...], approximate=True)
    h2 = jnp.dot(h1.astype(w2_ref.dtype), w2_ref[...], preferred_element_type=jnp.float32)
    o_ref[...] = (x + gate_ref[...] * (h2 + b2_ref[...])).astype(o_ref.dtype)


def adaln_ffn_residual(x, ln_g, ln_b, shift, scale, gate, w1, b1, w2, b2):
    m, d = x.shape
    dff = w1.shape[1]
    tm = _tile_m(m)
    return pl.pallas_call(
        _adaln_ffn_res_kernel,
        out_shape=jax.ShapeDtypeStruct((m, d), jnp.float32),
        grid=(m // tm,),
        in_specs=[
            pl.BlockSpec((tm, d), lambda i: (i, 0)),
            _const_spec((1, d)), _const_spec((1, d)), _const_spec((1, d)),
            _const_spec((1, d)), _const_spec((1, d)),
            _const_spec((d, dff)), _const_spec((1, dff)),
            _const_spec((dff, d)), _const_spec((1, d)),
        ],
        out_specs=pl.BlockSpec((tm, d), lambda i: (i, 0)),
        compiler_params=pltpu.CompilerParams(
            dimension_semantics=("parallel",), vmem_limit_bytes=VMEM_LIMIT_BYTES),
    )(x, _row(ln_g, d), _row(ln_b, d), _row(shift, d), _row(scale, d), _row(gate, d),
      w1, _row(b1, dff), w2, _row(b2, d))


# ----------------------------- input projection + hoisted conditioning add -------------
def _matmul_add_kernel(x_ref, w_ref, add_ref, o_ref):
    acc = jnp.dot(x_ref[...], w_ref[...], preferred_element_type=jnp.float32)
    o_ref[...] = (acc + add_ref[...].astype(jnp.float32)).astype(o_ref.dtype)


def matmul_add(x, w, add):
    """out = x @ w + add ; `add` is the step-invariant conditioning slab (bf16)."""
    m, k = x.shape
    n = w.shape[1]
    tm = _tile_m(m)
    return pl.pallas_call(
        _matmul_add_kernel,
        out_shape=jax.ShapeDtypeStruct((m, n), jnp.float32),
        grid=(m // tm,),
        in_specs=[
            pl.BlockSpec((tm, k), lambda i: (i, 0)),
            _const_spec((k, n)),
            pl.BlockSpec((tm, n), lambda i: (i, 0)),
        ],
        out_specs=pl.BlockSpec((tm, n), lambda i: (i, 0)),
        compiler_params=pltpu.CompilerParams(
            dimension_semantics=("parallel",), vmem_limit_bytes=VMEM_LIMIT_BYTES),
    )(x, w, add)


# ----------------------------- final proj + CFG combine + euler update (fused) ---------
def _final_cfg_euler_kernel(hc_ref, hn_ref, g_ref, b_ref, sh_ref, sc_ref,
                            w_ref, wb_ref, y_ref, o_ref, *, cfg, dt):
    """Final AdaLN-LN + output projection + CFG combine + euler update, fused.
    The projection is affine, so  v = ((1+cfg)*f(h_cond) - cfg*f(h_null)) @ W + b,
    letting the matmul run on N rows instead of 2N; y += dt*v lands in the same epilogue."""
    fc = _modulated_layernorm(hc_ref[...], g_ref[...], b_ref[...], sh_ref[...], sc_ref[...])
    fn = _modulated_layernorm(hn_ref[...], g_ref[...], b_ref[...], sh_ref[...], sc_ref[...])
    comb = (1.0 + cfg) * fc - cfg * fn
    v = jnp.dot(comb.astype(w_ref.dtype), w_ref[...],
                preferred_element_type=jnp.float32) + wb_ref[...]
    o_ref[...] = y_ref[...] + dt * v


def final_cfg_euler(h, f_ln_g, f_ln_b, shift, scale, w, wb, y, cfg, dt):
    """h: [2N, D] f32 (cond half then null half), y: [N, MEL_PAD] f32 euler state."""
    n, dmel = y.shape
    d = h.shape[1]
    tm = _tile_m(n)
    nb = n // tm                                   # block offset of the null half
    kern = functools.partial(_final_cfg_euler_kernel, cfg=float(cfg), dt=float(dt))
    return pl.pallas_call(
        kern,
        out_shape=jax.ShapeDtypeStruct((n, dmel), jnp.float32),
        grid=(nb,),
        in_specs=[
            pl.BlockSpec((tm, d), lambda i: (i, 0)),
            pl.BlockSpec((tm, d), lambda i, _nb=nb: (i + _nb, 0)),
            _const_spec((1, d)), _const_spec((1, d)), _const_spec((1, d)), _const_spec((1, d)),
            _const_spec((d, dmel)), _const_spec((1, dmel)),
            pl.BlockSpec((tm, dmel), lambda i: (i, 0)),
        ],
        out_specs=pl.BlockSpec((tm, dmel), lambda i: (i, 0)),
        compiler_params=pltpu.CompilerParams(
            dimension_semantics=("parallel",), vmem_limit_bytes=VMEM_LIMIT_BYTES),
    )(h, h, _row(f_ln_g, d), _row(f_ln_b, d), _row(shift, d), _row(scale, d),
      w, _row(wb, dmel), y)


# ----------------------------- step-invariant precompute -------------------------------
def _pad_feat(x, target):
    return jnp.pad(x, [(0, 0)] * (x.ndim - 1) + [(0, target - x.shape[-1])])


def _time_embedding(ts, dim=DIM):
    """ts: [S] -> [S, dim] sinusoidal embedding."""
    half = dim // 2
    freqs = jnp.exp(-jnp.log(10000.0) * jnp.arange(half, dtype=jnp.float32) / half)
    args = ts[:, None].astype(jnp.float32) * freqs[None, :]
    return jnp.concatenate([jnp.cos(args), jnp.sin(args)], axis=-1)


def _precompute_step_mods(params, t_values):
    """Time embeddings + ALL per-block AdaLN modulation vectors for every euler step.
    These are (steps-1)-row matmuls: plain jnp.dot under jit (XLA fuses them with the
    silu/split glue) — a pallas_call launch would cost far more than the compute."""
    ts = jnp.asarray(np.asarray(t_values, np.float32))
    temb = _time_embedding(ts)                                           # [S-1, DIM]
    temb = jax.nn.silu(jnp.dot(temb, params["t_w1"]) + params["t_b1"])
    temb = jnp.dot(temb, params["t_w2"]) + params["t_b2"]
    temb_silu = jax.nn.silu(temb)
    block_mods = [jnp.dot(temb_silu, p["mod_w"]) + p["mod_b"]            # [S-1, 6*DIM]
                  for p in params["blocks"]]
    f_mods = jnp.dot(temb_silu, params["f_mod_w"]) + params["f_mod_b"]   # [S-1, 2*DIM]
    return block_mods, f_mods


def _precompute_cond(params, cond, ref_mel, codec, n):
    """Step-invariant conditioning contribution to the input projection (both CFG halves),
    stored in bf16 (it feeds an f32 accumulator inside matmul_add anyway).
    TODO(synk): the real F5-style DiT uses conv_layers=4 text convs and full-length ref_mel
    cross-conditioning; here ref_mel is mean-pooled to a global conditioning vector."""
    txt = jnp.take(params["codec_embed"], codec[0], axis=0)              # [Nc, TEXT_DIM]
    txt = jnp.repeat(txt, FACTOR, axis=0)                                # [N, TEXT_DIM]
    ref_vec = _pad_feat(jnp.mean(ref_mel, axis=1), MEL_PAD)              # [1, MEL_PAD]
    ref_b = jnp.broadcast_to(ref_vec, (n, MEL_PAD))
    spk = jnp.broadcast_to(_pad_feat(cond, MEL_PAD), (n, MEL_PAD))       # cond.unsqueeze(1).repeat
    suffix_cond = jnp.concatenate([ref_b, spk, txt], axis=-1)            # [N, SFX]
    suffix_null = jnp.zeros_like(suffix_cond)                            # CFG null half
    suffix = jnp.concatenate([suffix_cond, suffix_null], axis=0).astype(COMPUTE_DTYPE)
    return pallas_linear(suffix, params["in_w_sfx"], params["in_b"],
                         out_dtype=COMPUTE_DTYPE)                        # [2N, DIM] bf16


# ----------------------------- synthetic DiT fast_forward + euler step ------------------
def _dit_step(params, y, suffix_h, block_mods_k, f_mods_k, cfg, dt):
    """y: [N, MEL_PAD] f32 euler state -> updated y (CFG combine + euler update fused in)."""
    n = y.shape[0]
    x2 = jnp.concatenate([y, y], axis=0).astype(COMPUTE_DTYPE)   # both CFG halves share x
    h = matmul_add(x2, params["in_w_x"], suffix_h)               # [2N, DIM] f32 residual
    for p, mods_k in zip(params["blocks"], block_mods_k):
        sh1, sc1, g1, sh2, sc2, g2 = jnp.split(mods_k, 6, axis=-1)
        h = attn_block(h, n, p["ln1_g"], p["ln1_b"], sh1, sc1, g1,
                       p["qkv_w"], p["qkv_b"], p["o_w"], p["o_b"])
        h = adaln_ffn_residual(h, p["ln2_g"], p["ln2_b"], sh2, sc2, g2,
                               p["ff_w1"], p["ff_b1"], p["ff_w2"], p["ff_b2"])
    f_sh, f_sc = jnp.split(f_mods_k, 2, axis=-1)
    return final_cfg_euler(h, params["f_ln_g"], params["f_ln_b"], f_sh, f_sc,
                           params["out_w"], params["out_b"], y, cfg, dt)


# ----------------------------- CFM sampling (BatchCodecCFM.fast_block_sample) -----------
def _cfm_sample(params, cond, ref_mel, codec, y0, steps, cfg_strength, sway_coef):
    n = y0.shape[1]
    suffix_h = _precompute_cond(params, cond, ref_mel, codec, n)

    # sway-sampled time grid is data-independent -> concrete (numpy) floats
    t = np.linspace(0.0, 1.0, steps)
    if sway_coef is not None:
        t = t + sway_coef * (np.cos(np.pi / 2.0 * t) - 1.0 + t)
    block_mods, f_mods = _precompute_step_mods(params, t[:-1])

    y = _pad_feat(y0[0].astype(jnp.float32), MEL_PAD)            # [N, MEL_PAD], pad lanes 0
    for k in range(steps - 1):                                   # euler odeint
        dt = float(t[k + 1] - t[k])
        y = _dit_step(params, y, suffix_h,
                      [bm[k:k + 1] for bm in block_mods], f_mods[k:k + 1],
                      cfg_strength, dt)
    return y                                                     # [N, MEL_PAD] (pad lanes 0)


# ----------------------------- BigVGAN stand-in -----------------------------------------
def _bigvgan(params, mel):
    """mel: [T, MEL_PAD] (80 real lanes) -> waveform [T * HOP].
    TODO(synk): full BigVGAN (transposed-conv upsample stack + AMP blocks + snake
    activations) replaced by a single per-frame projection to HOP samples + tanh."""
    t = mel.shape[0]
    samples = pallas_linear(mel.astype(COMPUTE_DTYPE), params["voc_w"], params["voc_b"],
                            act="tanh")                          # [T, HOP_PAD]
    return samples[:, :HOP].reshape(t * HOP)


# ----------------------------- Qwen2Code2wav.forward ------------------------------------
def qwen2_code2wav_forward(params, cond, ref_mel, codec, y0,
                           steps=STEPS, cfg_strength=CFG_STRENGTH,
                           sway_sampling_coef=SWAY_COEF):
    generated = _cfm_sample(params, cond, ref_mel, codec, y0, steps,
                            cfg_strength, sway_sampling_coef)    # [N, MEL_PAD] f32
    # Reference: sample() permutes (0,2,1) and forward() permutes back -> no-op pair, dropped.
    return _bigvgan(params, generated)


# ----------------------------- deterministic parameter init -----------------------------
def _init_params(key):
    def nrm(k, shape, scale=0.02):
        return scale * jax.random.normal(k, shape, dtype=jnp.float32)

    def pad_cols(w, n_pad):
        return jnp.pad(w, ((0, 0), (0, n_pad - w.shape[1])))

    def pad_rows(w, k_pad):
        return jnp.pad(w, ((0, k_pad - w.shape[0]), (0, 0)))

    keys = iter(jax.random.split(key, 256))
    qscale = 1.0 / (HEAD_DIM ** 0.5)

    # input projection split into x-part (padded 80->128 rows) and conditioning suffix part
    in_w_x = pad_rows(nrm(next(keys), (MEL_DIM, DIM)), MEL_PAD)
    in_w_ref = pad_rows(nrm(next(keys), (MEL_DIM, DIM)), MEL_PAD)
    in_w_spk = pad_rows(nrm(next(keys), (MEL_DIM, DIM)), MEL_PAD)
    in_w_txt = nrm(next(keys), (TEXT_DIM, DIM))
    in_w_sfx = jnp.concatenate([in_w_ref, in_w_spk, in_w_txt], axis=0)
    # lane-dense padded output / vocoder projections (zero pad -> semantics unchanged)
    out_w = pad_cols(nrm(next(keys), (DIM, MEL_DIM)), MEL_PAD)
    voc_w = pad_cols(pad_rows(nrm(next(keys), (MEL_DIM, HOP)), MEL_PAD), HOP_PAD)

    params = {
        "codec_embed": nrm(next(keys), (VOCAB, TEXT_DIM)),
        "in_w_x": in_w_x.astype(COMPUTE_DTYPE),
        "in_w_sfx": in_w_sfx.astype(COMPUTE_DTYPE),
        "in_b": jnp.zeros((DIM,), jnp.float32),
        "t_w1": nrm(next(keys), (DIM, DIM)), "t_b1": jnp.zeros((DIM,), jnp.float32),
        "t_w2": nrm(next(keys), (DIM, DIM)), "t_b2": jnp.zeros((DIM,), jnp.float32),
        "f_mod_w": nrm(next(keys), (DIM, 2 * DIM)),
        "f_mod_b": jnp.zeros((2 * DIM,), jnp.float32),
        "f_ln_g": jnp.ones((DIM,), jnp.float32), "f_ln_b": jnp.zeros((DIM,), jnp.float32),
        "out_w": out_w.astype(COMPUTE_DTYPE), "out_b": jnp.zeros((MEL_PAD,), jnp.float32),
        "voc_w": voc_w.astype(COMPUTE_DTYPE), "voc_b": jnp.zeros((HOP_PAD,), jnp.float32),
        "blocks": [],
    }
    for _ in range(DEPTH):
        qkv_w = nrm(next(keys), (DIM, 3 * DIM))
        qkv_b = jnp.zeros((3 * DIM,), jnp.float32)
        # fold the attention 1/sqrt(head_dim) scale into the q columns (and q bias) so the
        # kernel never multiplies the q slab at runtime
        qkv_w = qkv_w.at[:, :DIM].multiply(qscale)
        qkv_b = qkv_b.at[:DIM].multiply(qscale)
        params["blocks"].append({
            "mod_w": nrm(next(keys), (DIM, 6 * DIM)),
            "mod_b": jnp.zeros((6 * DIM,), jnp.float32),
            "ln1_g": jnp.ones((DIM,), jnp.float32), "ln1_b": jnp.zeros((DIM,), jnp.float32),
            "ln2_g": jnp.ones((DIM,), jnp.float32), "ln2_b": jnp.zeros((DIM,), jnp.float32),
            "qkv_w": qkv_w.astype(COMPUTE_DTYPE),
            "qkv_b": qkv_b,
            "o_w": nrm(next(keys), (DIM, DIM)).astype(COMPUTE_DTYPE),
            "o_b": jnp.zeros((DIM,), jnp.float32),
            "ff_w1": nrm(next(keys), (DIM, FF_MULT * DIM)).astype(COMPUTE_DTYPE),
            "ff_b1": jnp.zeros((FF_MULT * DIM,), jnp.float32),
            "ff_w2": nrm(next(keys), (FF_MULT * DIM, DIM)).astype(COMPUTE_DTYPE),
            "ff_b2": jnp.zeros((DIM,), jnp.float32),
        })
    return params


if __name__ == "__main__":
    root = jax.random.PRNGKey(0)
    kp, kc, kr, kcode = jax.random.split(root, 4)
    params = _init_params(kp)

    cond = jax.random.normal(kc, (1, MEL_DIM), jnp.float32)          # speaker embedding
    ref_mel = jax.random.normal(kr, (1, 16, MEL_DIM), jnp.float32)   # reference mel
    codec = jax.random.randint(kcode, (1, 8), 0, VOCAB, dtype=jnp.int32)

    # fixed noise bank precomputed OUTSIDE the jitted forward
    expect_y_len = codec.shape[1] * FACTOR
    y_all = jax.random.normal(jax.random.PRNGKey(1234), (1, 256, MEL_DIM), jnp.float32)
    y0 = y_all[:, :expect_y_len]

    fwd = jax.jit(qwen2_code2wav_forward)
    waveform = fwd(params, cond, ref_mel, codec, y0)
    jax.block_until_ready(waveform)
    assert waveform.shape == (expect_y_len * HOP,)
    print("KERNEL_OK")
</pallas_src>

<mosaic_0001>
module attributes {stable_mosaic.version = 11 : i64} {
  func.func @_probe_kernel(%arg0: i32, %arg1: memref<8x128xf32, #tpu.memory_space<vmem>>, %arg2: memref<8x128xf32, #tpu.memory_space<vmem>>) attributes {dimension_semantics = [#tpu.dimension_semantics<arbitrary>], iteration_bounds = array<i64: 2>, scalar_prefetch = 0 : i64, scratch_operands = 0 : i64, tpu.core_type = #tpu.core_type<tc>, window_params = [{pipeline_mode = #tpu.pipeline_mode<synchronous>, transform_indices = @transform_0, window_bounds = array<i64: 8, 128>}, {transform_indices = @transform_1, window_bounds = array<i64: 8, 128>}]} {
    %c0 = arith.constant 0 : index
    %c0_0 = arith.constant 0 : index
    %0 = vector.load %arg1[%c0, %c0_0] : memref<8x128xf32, #tpu.memory_space<vmem>>, vector<8x128xf32>
    %cst = arith.constant 1.000000e+00 : f32
    %1 = vector.broadcast %cst : f32 to vector<8x128xf32>
    %2 = arith.addf %0, %1 : vector<8x128xf32>
    %c0_1 = arith.constant 0 : index
    %c0_2 = arith.constant 0 : index
    %3 = vector.load %arg2[%c0_1, %c0_2] : memref<8x128xf32, #tpu.memory_space<vmem>>, vector<8x128xf32>
    tpu.vector_store %arg2[%c0_1, %c0_2], %2 {strides = array<i32>} : memref<8x128xf32, #tpu.memory_space<vmem>>, vector<8x128xf32>,
    return
  }
  func.func @transform_0(%arg0: i32) -> (i32, i32) {
    %c0_i32 = arith.constant 0 : i32
    %c0_i32_0 = arith.constant 0 : i32
    %c0_i32_1 = arith.constant 0 : i32
    return %c0_i32, %c0_i32_0 : i32, i32
  }
  func.func @transform_1(%arg0: i32) -> (i32, i32) {
    %c0_i32 = arith.constant 0 : i32
    %c0_i32_0 = arith.constant 0 : i32
    return %arg0, %c0_i32 : i32, i32
  }
}

module attributes {stable_mosaic.version = 11 : i64} {
  func.func @_linear_tiled_kernel(%arg0: i32, %arg1: i32, %arg2: i32, %arg3: memref<32x320xbf16, #tpu.memory_space<vmem>>, %arg4: memref<320x128xbf16, #tpu.memory_space<vmem>>, %arg5: memref<1x128xf32, #tpu.memory_space<vmem>>, %arg6: memref<32x128xbf16, #tpu.memory_space<vmem>>, %arg7: memref<32x128xf32, #tpu.memory_space<vmem>>) attributes {dimension_semantics = [#tpu.dimension_semantics<parallel>, #tpu.dimension_semantics<parallel>, #tpu.dimension_semantics<arbitrary>], iteration_bounds = array<i64: 1, 1, 1>, scalar_prefetch = 0 : i64, scratch_operands = 1 : i64, tpu.core_type = #tpu.core_type<tc>, window_params = [{transform_indices = @transform_0, window_bounds = array<i64: 32, 320>}, {transform_indices = @transform_1, window_bounds = array<i64: 320, 128>}, {transform_indices = @transform_2, window_bounds = array<i64: 1, 128>}, {transform_indices = @transform_3, window_bounds = array<i64: 32, 128>}]} {
    %c0_i32 = arith.constant 0 : i32
    %0 = arith.cmpi eq, %arg2, %c0_i32 : i32
    %1 = arith.extui %0 : i1 to i32
    %c0_i32_0 = arith.constant 0 : i32
    %2 = arith.cmpi ne, %1, %c0_i32_0 : i32
    scf.if %2 {
      %cst_10 = arith.constant 0.000000e+00 : f32
      %12 = vector.broadcast %cst_10 : f32 to vector<32x128xf32>
      %c0_11 = arith.constant 0 : index
      %c0_12 = arith.constant 0 : index
      %13 = vector.load %arg7[%c0_11, %c0_12] : memref<32x128xf32, #tpu.memory_space<vmem>>, vector<32x128xf32>
      tpu.vector_store %arg7[%c0_11, %c0_12], %12 {strides = array<i32>} : memref<32x128xf32, #tpu.memory_space<vmem>>, vector<32x128xf32>,
    } else {
    }
    %c0 = arith.constant 0 : index
    %c0_1 = arith.constant 0 : index
    %3 = vector.load %arg7[%c0, %c0_1] : memref<32x128xf32, #tpu.memory_space<vmem>>, vector<32x128xf32>
    %c0_2 = arith.constant 0 : index
    %c0_3 = arith.constant 0 : index
    %4 = vector.load %arg3[%c0_2, %c0_3] : memref<32x320xbf16, #tpu.memory_space<vmem>>, vector<32x320xbf16>
    %c0_4 = arith.constant 0 : index
    %c0_5 = arith.constant 0 : index
    %5 = vector.load %arg4[%c0_4, %c0_5] : memref<320x128xbf16, #tpu.memory_space<vmem>>, vector<320x128xbf16>
    %cst = arith.constant dense<0.000000e+00> : vector<32x128xf32>
    %6 = tpu.matmul %4, %5, %cst {dimension_numbers = #tpu.dot_dimension_numbers<[1], [0], [0], [1], [0, 0, 1, 1], [], []>} : vector<32x320xbf16>, vector<320x128xbf16>, vector<32x128xf32> -> vector<32x128xf32>
    %7 = arith.addf %3, %6 : vector<32x128xf32>
    %c0_6 = arith.constant 0 : index
    %c0_7 = arith.constant 0 : index
    %8 = vector.load %arg7[%c0_6, %c0_7] : memref<32x128xf32, #tpu.memory_space<vmem>>, vector<32x128xf32>
    tpu.vector_store %arg7[%c0_6, %c0_7], %7 {strides = array<i32>} : memref<32x128xf32, #tpu.memory_space<vmem>>, vector<32x128xf32>,
    %c0_i32_8 = arith.constant 0 : i32
    %9 = arith.cmpi eq, %arg2, %c0_i32_8 : i32
    %10 = arith.extui %9 : i1 to i32
    %c0_i32_9 = arith.constant 0 : i32
    %11 = arith.cmpi ne, %10, %c0_i32_9 : i32
    scf.if %11 {
      %c0_10 = arith.constant 0 : index
      %c0_11 = arith.constant 0 : index
      %12 = vector.load %arg7[%c0_10, %c0_11] : memref<32x128xf32, #tpu.memory_space<vmem>>, vector<32x128xf32>
      %c0_12 = arith.constant 0 : index
      %c0_13 = arith.constant 0 : index
      %13 = vector.load %arg5[%c0_12, %c0_13] : memref<1x128xf32, #tpu.memory_space<vmem>>, vector<1x128xf32>
      %14 = vector.broadcast %13 : vector<1x128xf32> to vector<32x128xf32>
      %15 = arith.addf %12, %14 : vector<32x128xf32>
      %16 = arith.truncf %15 : vector<32x128xf32> to vector<32x128xbf16>
      %c0_14 = arith.constant 0 : index
      %c0_15 = arith.constant 0 : index
      %17 = vector.load %arg6[%c0_14, %c0_15] : memref<32x128xbf16, #tpu.memory_space<vmem>>, vector<32x128xbf16>
      tpu.vector_store %arg6[%c0_14, %c0_15], %16 {strides = array<i32>} : memref<32x128xbf16, #tpu.memory_space<vmem>>, vector<32x128xbf16>,
    } else {
    }
    return
  }
  func.func @transform_0(%arg0: i32, %arg1: i32, %arg2: i32) -> (i32, i32) {
    %c0_i32 = arith.constant 0 : i32
    return %arg0, %arg2 : i32, i32
  }
  func.func @transform_1(%arg0: i32, %arg1: i32, %arg2: i32) -> (i32, i32) {
    %c0_i32 = arith.constant 0 : i32
    return %arg2, %arg1 : i32, i32
  }
  func.func @transform_2(%arg0: i32, %arg1: i32, %arg2: i32) -> (i32, i32) {
    %c0_i32 = arith.constant 0 : i32
    %c0_i32_0 = arith.constant 0 : i32
    return %c0_i32, %arg1 : i32, i32
  }
  func.func @transform_3(%arg0: i32, %arg1: i32, %arg2: i32) -> (i32, i32) {
    %c0_i32 = arith.constant 0 : i32
    return %arg0, %arg1 : i32, i32
  }
}

module attributes {stable_mosaic.version = 11 : i64} {
  func.func @_matmul_add_kernel(%arg0: i32, %arg1: memref<32x128xbf16, #tpu.memory_space<vmem>>, %arg2: memref<128x128xbf16, #tpu.memory_space<vmem>>, %arg3: memref<32x128xbf16, #tpu.memory_space<vmem>>, %arg4: memref<32x128xf32, #tpu.memory_space<vmem>>) attributes {dimension_semantics = [#tpu.dimension_semantics<parallel>], iteration_bounds = array<i64: 1>, scalar_prefetch = 0 : i64, scratch_operands = 0 : i64, tpu.core_type = #tpu.core_type<tc>, window_params = [{transform_indices = @transform_0, window_bounds = array<i64: 32, 128>}, {pipeline_mode = #tpu.pipeline_mode<synchronous>, transform_indices = @transform_1, window_bounds = array<i64: 128, 128>}, {transform_indices = @transform_2, window_bounds = array<i64: 32, 128>}, {transform_indices = @transform_3, window_bounds = array<i64: 32, 128>}]} {
    %c0 = arith.constant 0 : index
    %c0_0 = arith.constant 0 : index
    %0 = vector.load %arg1[%c0, %c0_0] : memref<32x128xbf16, #tpu.memory_space<vmem>>, vector<32x128xbf16>
    %c0_1 = arith.constant 0 : index
    %c0_2 = arith.constant 0 : index
    %1 = vector.load %arg2[%c0_1, %c0_2] : memref<128x128xbf16, #tpu.memory_space<vmem>>, vector<128x128xbf16>
    %cst = arith.constant dense<0.000000e+00> : vector<32x128xf32>
    %2 = tpu.matmul %0, %1, %cst {dimension_numbers = #tpu.dot_dimension_numbers<[1], [0], [0], [1], [0, 0, 1, 1], [], []>} : vector<32x128xbf16>, vector<128x128xbf16>, vector<32x128xf32> -> vector<32x128xf32>
    %c0_3 = arith.constant 0 : index
    %c0_4 = arith.constant 0 : index
    %3 = vector.load %arg3[%c0_3, %c0_4] : memref<32x128xbf16, #tpu.memory_space<vmem>>, vector<32x128xbf16>
    %4 = arith.extf %3 : vector<32x128xbf16> to vector<32x128xf32>
    %5 = arith.addf %2, %4 : vector<32x128xf32>
    %c0_5 = arith.constant 0 : index
    %c0_6 = arith.constant 0 : index
    %6 = vector.load %arg4[%c0_5, %c0_6] : memref<32x128xf32, #tpu.memory_space<vmem>>, vector<32x128xf32>
    tpu.vector_store %arg4[%c0_5, %c0_6], %5 {strides = array<i32>} : memref<32x128xf32, #tpu.memory_space<vmem>>, vector<32x128xf32>,
    return
  }
  func.func @transform_0(%arg0: i32) -> (i32, i32) {
    %c0_i32 = arith.constant 0 : i32
    %c0_i32_0 = arith.constant 0 : i32
    return %arg0, %c0_i32 : i32, i32
  }
  func.func @transform_1(%arg0: i32) -> (i32, i32) {
    %c0_i32 = arith.constant 0 : i32
    %c0_i32_0 = arith.constant 0 : i32
    %c0_i32_1 = arith.constant 0 : i32
    return %c0_i32, %c0_i32_0 : i32, i32
  }
  func.func @transform_2(%arg0: i32) -> (i32, i32) {
    %c0_i32 = arith.constant 0 : i32
    %c0_i32_0 = arith.constant 0 : i32
    return %arg0, %c0_i32 : i32, i32
  }
  func.func @transform_3(%arg0: i32) -> (i32, i32) {
    %c0_i32 = arith.constant 0 : i32
    %c0_i32_0 = arith.constant 0 : i32
    return %arg0, %c0_i32 : i32, i32
  }
}

module attributes {stable_mosaic.version = 11 : i64} {
  func.func @_attn_block_kernel(%arg0: i32, %arg1: memref<16x128xf32, #tpu.memory_space<vmem>>, %arg2: memref<1x128xf32, #tpu.memory_space<vmem>>, %arg3: memref<1x128xf32, #tpu.memory_space<vmem>>, %arg4: memref<1x128xf32, #tpu.memory_space<vmem>>, %arg5: memref<1x128xf32, #tpu.memory_space<vmem>>, %arg6: memref<1x128xf32, #tpu.memory_space<vmem>>, %arg7: memref<128x384xbf16, #tpu.memory_space<vmem>>, %arg8: memref<1x384xf32, #tpu.memory_space<vmem>>, %arg9: memref<128x128xbf16, #tpu.memory_space<vmem>>, %arg10: memref<1x128xf32, #tpu.memory_space<vmem>>, %arg11: memref<16x128xf32, #tpu.memory_space<vmem>>) attributes {dimension_semantics = [#tpu.dimension_semantics<parallel>], iteration_bounds = array<i64: 2>, scalar_prefetch = 0 : i64, scratch_operands = 0 : i64, tpu.core_type = #tpu.core_type<tc>, window_params = [{transform_indices = @transform_0, window_bounds = array<i64: 16, 128>}, {pipeline_mode = #tpu.pipeline_mode<synchronous>, transform_indices = @transform_1, window_bounds = array<i64: 1, 128>}, {pipeline_mode = #tpu.pipeline_mode<synchronous>, transform_indices = @transform_2, window_bounds = array<i64: 1, 128>}, {pipeline_mode = #tpu.pipeline_mode<synchronous>, transform_indices = @transform_3, window_bounds = array<i64: 1, 128>}, {pipeline_mode = #tpu.pipeline_mode<synchronous>, transform_indices = @transform_4, window_bounds = array<i64: 1, 128>}, {pipeline_mode = #tpu.pipeline_mode<synchronous>, transform_indices = @transform_5, window_bounds = array<i64: 1, 128>}, {pipeline_mode = #tpu.pipeline_mode<synchronous>, transform_indices = @transform_6, window_bounds = array<i64: 128, 384>}, {pipeline_mode = #tpu.pipeline_mode<synchronous>, transform_indices = @transform_7, window_bounds = array<i64: 1, 384>}, {pipeline_mode = #tpu.pipeline_mode<synchronous>, transform_indices = @transform_8, window_bounds = array<i64: 128, 128>}, {pipeline_mode = #tpu.pipeline_mode<synchronous>, transform_indices = @transform_9, window_bounds = array<i64: 1, 128>}, {transform_indices = @transform_10, window_bounds = array<i64: 16, 128>}]} {
    %c0 = arith.constant 0 : index
    %c0_0 = arith.constant 0 : index
    %0 = vector.load %arg1[%c0, %c0_0] : memref<16x128xf32, #tpu.memory_space<vmem>>, vector<16x128xf32>
    %c0_1 = arith.constant 0 : index
    %c0_2 = arith.constant 0 : index
    %1 = vector.load %arg2[%c0_1, %c0_2] : memref<1x128xf32, #tpu.memory_space<vmem>>, vector<1x128xf32>
    %c0_3 = arith.constant 0 : index
    %c0_4 = arith.constant 0 : index
    %2 = vector.load %arg3[%c0_3, %c0_4] : memref<1x128xf32, #tpu.memory_space<vmem>>, vector<1x128xf32>
    %c0_5 = arith.constant 0 : index
    %c0_6 = arith.constant 0 : index
    %3 = vector.load %arg4[%c0_5, %c0_6] : memref<1x128xf32, #tpu.memory_space<vmem>>, vector<1x128xf32>
    %c0_7 = arith.constant 0 : index
    %c0_8 = arith.constant 0 : index
    %4 = vector.load %arg5[%c0_7, %c0_8] : memref<1x128xf32, #tpu.memory_space<vmem>>, vector<1x128xf32>
    %cst = arith.constant dense<0.000000e+00> : vector<16xf32>
    %5 = vector.multi_reduction <add>, %0, %cst [1] : vector<16x128xf32> to vector<16xf32>
    %6 = vector.shape_cast %5 : vector<16xf32> to vector<16x1xf32>
    %cst_9 = arith.constant 1.280000e+02 : f32
    %7 = vector.broadcast %cst_9 : f32 to vector<16x1xf32>
    %8 = arith.divf %6, %7 : vector<16x1xf32>
    %9 = vector.broadcast %8 : vector<16x1xf32> to vector<16x128xf32>
    %10 = arith.subf %0, %9 : vector<16x128xf32>
    %11 = arith.mulf %10, %10 : vector<16x128xf32>
    %cst_10 = arith.constant dense<0.000000e+00> : vector<16xf32>
    %12 = vector.multi_reduction <add>, %11, %cst_10 [1] : vector<16x128xf32> to vector<16xf32>
    %13 = vector.shape_cast %12 : vector<16xf32> to vector<16x1xf32>
    %cst_11 = arith.constant 1.280000e+02 : f32
    %14 = vector.broadcast %cst_11 : f32 to vector<16x1xf32>
    %15 = arith.divf %13, %14 : vector<16x1xf32>
    %16 = vector.broadcast %8 : vector<16x1xf32> to vector<16x128xf32>
    %17 = arith.subf %0, %16 : vector<16x128xf32>
    %cst_12 = arith.constant 9.99999997E-7 : f32
    %18 = vector.broadcast %cst_12 : f32 to vector<16x1xf32>
    %19 = arith.addf %15, %18 : vector<16x1xf32>
    %20 = math.rsqrt %19 : vector<16x1xf32>
    %21 = vector.broadcast %20 : vector<16x1xf32> to vector<16x128xf32>
    %22 = arith.mulf %17, %21 : vector<16x128xf32>
    %23 = vector.broadcast %1 : vector<1x128xf32> to vector<16x128xf32>
    %24 = arith.mulf %22, %23 : vector<16x128xf32>
    %25 = vector.broadcast %2 : vector<1x128xf32> to vector<16x128xf32>
    %26 = arith.addf %24, %25 : vector<16x128xf32>
    %cst_13 = arith.constant 1.000000e+00 : f32
    %27 = vector.broadcast %cst_13 : f32 to vector<1x128xf32>
    %28 = arith.addf %27, %4 : vector<1x128xf32>
    %29 = vector.broadcast %28 : vector<1x128xf32> to vector<16x128xf32>
    %30 = arith.mulf %26, %29 : vector<16x128xf32>
    %31 = vector.broadcast %3 : vector<1x128xf32> to vector<16x128xf32>
    %32 = arith.addf %30, %31 : vector<16x128xf32>
    %33 = arith.truncf %32 : vector<16x128xf32> to vector<16x128xbf16>
    %c0_14 = arith.constant 0 : index
    %c0_15 = arith.constant 0 : index
    %34 = vector.load %arg7[%c0_14, %c0_15] : memref<128x384xbf16, #tpu.memory_space<vmem>>, vector<128x384xbf16>
    %cst_16 = arith.constant dense<0.000000e+00> : vector<16x384xf32>
    %35 = tpu.matmul %33, %34, %cst_16 {dimension_numbers = #tpu.dot_dimension_numbers<[1], [0], [0], [1], [0, 0, 1, 1], [], []>} : vector<16x128xbf16>, vector<128x384xbf16>, vector<16x384xf32> -> vector<16x384xf32>
    %c0_17 = arith.constant 0 : index
    %c0_18 = arith.constant 0 : index
    %36 = vector.load %arg8[%c0_17, %c0_18] : memref<1x384xf32, #tpu.memory_space<vmem>>, vector<1x384xf32>
    %37 = vector.broadcast %36 : vector<1x384xf32> to vector<16x384xf32>
    %38 = arith.addf %35, %37 : vector<16x384xf32>
    %39 = vector.extract_strided_slice %38 {offsets = [0, 0], sizes = [16, 128], strides = [1, 1]} : vector<16x384xf32> to vector<16x128xf32>
    %40 = arith.truncf %39 : vector<16x128xf32> to vector<16x128xbf16>
    %41 = vector.shape_cast %40 : vector<16x128xbf16> to vector<16x4x32xbf16>
    %42 = vector.extract_strided_slice %38 {offsets = [0, 128], sizes = [16, 128], strides = [1, 1]} : vector<16x384xf32> to vector<16x128xf32>
    %43 = arith.truncf %42 : vector<16x128xf32> to vector<16x128xbf16>
    %44 = vector.shape_cast %43 : vector<16x128xbf16> to vector<16x4x32xbf16>
    %45 = vector.extract_strided_slice %38 {offsets = [0, 256], sizes = [16, 128], strides = [1, 1]} : vector<16x384xf32> to vector<16x128xf32>
    %46 = arith.truncf %45 : vector<16x128xf32> to vector<16x128xbf16>
    %47 = vector.shape_cast %46 : vector<16x128xbf16> to vector<16x4x32xbf16>
    %48 = tpu.transpose %41, [1, 0, 2] : vector<16x4x32xbf16> -> vector<4x16x32xbf16>
    %49 = tpu.transpose %44, [1, 0, 2] : vector<16x4x32xbf16> -> vector<4x16x32xbf16>
    %50 = tpu.transpose %47, [1, 0, 2] : vector<16x4x32xbf16> -> vector<4x16x32xbf16>
    "tpu.trace_start"() <{level = 10 : i32, message = "hqd,hkd->hqk"}> : () -> ()
    %cst_19 = arith.constant dense<0.000000e+00> : vector<4x16x16xf32>
    %51 = tpu.matmul %48, %49, %cst_19 {dimension_numbers = #tpu.dot_dimension_numbers<[2], [2], [1], [1], [0, 0, 0, 1, 1, 1], [0], [0]>} : vector<4x16x32xbf16>, vector<4x16x32xbf16>, vector<4x16x16xf32> -> vector<4x16x16xf32>
    "tpu.trace_stop"() : () -> ()
    %cst_20 = arith.constant dense<0xFF800000> : vector<4x16xf32>
    %52 = vector.multi_reduction <maximumf>, %51, %cst_20 [2] : vector<4x16x16xf32> to vector<4x16xf32>
    %53 = vector.shape_cast %52 : vector<4x16xf32> to vector<4x16x1xf32>
    %54 = vector.broadcast %53 : vector<4x16x1xf32> to vector<4x16x16xf32>
    %55 = arith.subf %51, %54 : vector<4x16x16xf32>
    %56 = math.exp %55 : vector<4x16x16xf32>
    %cst_21 = arith.constant dense<0.000000e+00> : vector<4x16xf32>
    %57 = vector.multi_reduction <add>, %56, %cst_21 [2] : vector<4x16x16xf32> to vector<4x16xf32>
    %58 = vector.shape_cast %57 : vector<4x16xf32> to vector<4x16x1xf32>
    %59 = tpu.reciprocal %58 {approx = true} : vector<4x16x1xf32> -> vector<4x16x1xf32>
    %60 = vector.broadcast %59 : vector<4x16x1xf32> to vector<4x16x16xf32>
    %61 = arith.mulf %56, %60 : vector<4x16x16xf32>
    %62 = arith.truncf %61 : vector<4x16x16xf32> to vector<4x16x16xbf16>
    "tpu.trace_start"() <{level = 10 : i32, message = "hqk,hkd->hqd"}> : () -> ()
    %cst_22 = arith.constant dense<0.000000e+00> : vector<4x16x32xf32>
    %63 = tpu.matmul %62, %50, %cst_22 {dimension_numbers = #tpu.dot_dimension_numbers<[2], [1], [1], [2], [0, 0, 0, 1, 1, 2], [0], [0]>} : vector<4x16x16xbf16>, vector<4x16x32xbf16>, vector<4x16x32xf32> -> vector<4x16x32xf32>
    "tpu.trace_stop"() : () -> ()
    %64 = arith.truncf %63 : vector<4x16x32xf32> to vector<4x16x32xbf16>
    %65 = tpu.transpose %64, [1, 0, 2] : vector<4x16x32xbf16> -> vector<16x4x32xbf16>
    %66 = vector.shape_cast %65 : vector<16x4x32xbf16> to vector<16x128xbf16>
    %c0_23 = arith.constant 0 : index
    %c0_24 = arith.constant 0 : index
    %67 = vector.load %arg9[%c0_23, %c0_24] : memref<128x128xbf16, #tpu.memory_space<vmem>>, vector<128x128xbf16>
    %cst_25 = arith.constant dense<0.000000e+00> : vector<16x128xf32>
    %68 = tpu.matmul %66, %67, %cst_25 {dimension_numbers = #tpu.dot_dimension_numbers<[1], [0], [0], [1], [0, 0, 1, 1], [], []>} : vector<16x128xbf16>, vector<128x128xbf16>, vector<16x128xf32> -> vector<16x128xf32>
    %c0_26 = arith.constant 0 : index
    %c0_27 = arith.constant 0 : index
    %69 = vector.load %arg10[%c0_26, %c0_27] : memref<1x128xf32, #tpu.memory_space<vmem>>, vector<1x128xf32>
    %70 = vector.broadcast %69 : vector<1x128xf32> to vector<16x128xf32>
    %71 = arith.addf %68, %70 : vector<16x128xf32>
    %c0_28 = arith.constant 0 : index
    %c0_29 = arith.constant 0 : index
    %72 = vector.load %arg6[%c0_28, %c0_29] : memref<1x128xf32, #tpu.memory_space<vmem>>, vector<1x128xf32>
    %73 = vector.broadcast %72 : vector<1x128xf32> to vector<16x128xf32>
    %74 = arith.mulf %73, %71 : vector<16x128xf32>
    %75 = arith.addf %0, %74 : vector<16x128xf32>
    %c0_30 = arith.constant 0 : index
    %c0_31 = arith.constant 0 : index
    %76 = vector.load %arg11[%c0_30, %c0_31] : memref<16x128xf32, #tpu.memory_space<vmem>>, vector<16x128xf32>
    tpu.vector_store %arg11[%c0_30, %c0_31], %75 {strides = array<i32>} : memref<16x128xf32, #tpu.memory_space<vmem>>, vector<16x128xf32>,
    return
  }
  func.func @transform_0(%arg0: i32) -> (i32, i32) {
    %c0_i32 = arith.constant 0 : i32
    %c0_i32_0 = arith.constant 0 : i32
    return %arg0, %c0_i32 : i32, i32
  }
  func.func @transform_1(%arg0: i32) -> (i32, i32) {
    %c0_i32 = arith.constant 0 : i32
    %c0_i32_0 = arith.constant 0 : i32
    %c0_i32_1 = arith.constant 0 : i32
    return %c0_i32, %c0_i32_0 : i32, i32
  }
  func.func @transform_2(%arg0: i32) -> (i32, i32) {
    %c0_i32 = arith.constant 0 : i32
    %c0_i32_0 = arith.constant 0 : i32
    %c0_i32_1 = arith.constant 0 : i32
    return %c0_i32, %c0_i32_0 : i32, i32
  }
  func.func @transform_3(%arg0: i32) -> (i32, i32) {
    %c0_i32 = arith.constant 0 : i32
    %c0_i32_0 = arith.constant 0 : i32
    %c0_i32_1 = arith.constant 0 : i32
    return %c0_i32, %c0_i32_0 : i32, i32
  }
  func.func @transform_4(%arg0: i32) -> (i32, i32) {
    %c0_i32 = arith.constant 0 : i32
    %c0_i32_0 = arith.constant 0 : i32
    %c0_i32_1 = arith.constant 0 : i32
    return %c0_i32, %c0_i32_0 : i32, i32
  }
  func.func @transform_5(%arg0: i32) -> (i32, i32) {
    %c0_i32 = arith.constant 0 : i32
    %c0_i32_0 = arith.constant 0 : i32
    %c0_i32_1 = arith.constant 0 : i32
    return %c0_i32, %c0_i32_0 : i32, i32
  }
  func.func @transform_6(%arg0: i32) -> (i32, i32) {
    %c0_i32 = arith.constant 0 : i32
    %c0_i32_0 = arith.constant 0 : i32
    %c0_i32_1 = arith.constant 0 : i32
    return %c0_i32, %c0_i32_0 : i32, i32
  }
  func.func @transform_7(%arg0: i32) -> (i32, i32) {
    %c0_i32 = arith.constant 0 : i32
    %c0_i32_0 = arith.constant 0 : i32
    %c0_i32_1 = arith.constant 0 : i32
    return %c0_i32, %c0_i32_0 : i32, i32
  }
  func.func @transform_8(%arg0: i32) -> (i32, i32) {
    %c0_i32 = arith.constant 0 : i32
    %c0_i32_0 = arith.constant 0 : i32
    %c0_i32_1 = arith.constant 0 : i32
    return %c0_i32, %c0_i32_0 : i32, i32
  }
  func.func @transform_9(%arg0: i32) -> (i32, i32) {
    %c0_i32 = arith.constant 0 : i32
    %c0_i32_0 = arith.constant 0 : i32
    %c0_i32_1 = arith.constant 0 : i32
    return %c0_i32, %c0_i32_0 : i32, i32
  }
  func.func @transform_10(%arg0: i32) -> (i32, i32) {
    %c0_i32 = arith.constant 0 : i32
    %c0_i32_0 = arith.constant 0 : i32
    return %arg0, %c0_i32 : i32, i32
  }
}

module attributes {stable_mosaic.version = 11 : i64} {
  func.func @_adaln_ffn_res_kernel(%arg0: i32, %arg1: memref<32x128xf32, #tpu.memory_space<vmem>>, %arg2: memref<1x128xf32, #tpu.memory_space<vmem>>, %arg3: memref<1x128xf32, #tpu.memory_space<vmem>>, %arg4: memref<1x128xf32, #tpu.memory_space<vmem>>, %arg5: memref<1x128xf32, #tpu.memory_space<vmem>>, %arg6: memref<1x128xf32, #tpu.memory_space<vmem>>, %arg7: memref<128x256xbf16, #tpu.memory_space<vmem>>, %arg8: memref<1x256xf32, #tpu.memory_space<vmem>>, %arg9: memref<256x128xbf16, #tpu.memory_space<vmem>>, %arg10: memref<1x128xf32, #tpu.memory_space<vmem>>, %arg11: memref<32x128xf32, #tpu.memory_space<vmem>>) attributes {dimension_semantics = [#tpu.dimension_semantics<parallel>], iteration_bounds = array<i64: 1>, scalar_prefetch = 0 : i64, scratch_operands = 0 : i64, tpu.core_type = #tpu.core_type<tc>, window_params = [{transform_indices = @transform_0, window_bounds = array<i64: 32, 128>}, {pipeline_mode = #tpu.pipeline_mode<synchronous>, transform_indices = @transform_1, window_bounds = array<i64: 1, 128>}, {pipeline_mode = #tpu.pipeline_mode<synchronous>, transform_indices = @transform_2, window_bounds = array<i64: 1, 128>}, {pipeline_mode = #tpu.pipeline_mode<synchronous>, transform_indices = @transform_3, window_bounds = array<i64: 1, 128>}, {pipeline_mode = #tpu.pipeline_mode<synchronous>, transform_indices = @transform_4, window_bounds = array<i64: 1, 128>}, {pipeline_mode = #tpu.pipeline_mode<synchronous>, transform_indices = @transform_5, window_bounds = array<i64: 1, 128>}, {pipeline_mode = #tpu.pipeline_mode<synchronous>, transform_indices = @transform_6, window_bounds = array<i64: 128, 256>}, {pipeline_mode = #tpu.pipeline_mode<synchronous>, transform_indices = @transform_7, window_bounds = array<i64: 1, 256>}, {pipeline_mode = #tpu.pipeline_mode<synchronous>, transform_indices = @transform_8, window_bounds = array<i64: 256, 128>}, {pipeline_mode = #tpu.pipeline_mode<synchronous>, transform_indices = @transform_9, window_bounds = array<i64: 1, 128>}, {transform_indices = @transform_10, window_bounds = array<i64: 32, 128>}]} {
    %c0 = arith.constant 0 : index
    %c0_0 = arith.constant 0 : index
    %0 = vector.load %arg1[%c0, %c0_0] : memref<32x128xf32, #tpu.memory_space<vmem>>, vector<32x128xf32>
    %c0_1 = arith.constant 0 : index
    %c0_2 = arith.constant 0 : index
    %1 = vector.load %arg2[%c0_1, %c0_2] : memref<1x128xf32, #tpu.memory_space<vmem>>, vector<1x128xf32>
    %c0_3 = arith.constant 0 : index
    %c0_4 = arith.constant 0 : index
    %2 = vector.load %arg3[%c0_3, %c0_4] : memref<1x128xf32, #tpu.memory_space<vmem>>, vector<1x128xf32>
    %c0_5 = arith.constant 0 : index
    %c0_6 = arith.constant 0 : index
    %3 = vector.load %arg4[%c0_5, %c0_6] : memref<1x128xf32, #tpu.memory_space<vmem>>, vector<1x128xf32>
    %c0_7 = arith.constant 0 : index
    %c0_8 = arith.constant 0 : index
    %4 = vector.load %arg5[%c0_7, %c0_8] : memref<1x128xf32, #tpu.memory_space<vmem>>, vector<1x128xf32>
    %cst = arith.constant dense<0.000000e+00> : vector<32xf32>
    %5 = vector.multi_reduction <add>, %0, %cst [1] : vector<32x128xf32> to vector<32xf32>
    %6 = vector.shape_cast %5 : vector<32xf32> to vector<32x1xf32>
    %cst_9 = arith.constant 1.280000e+02 : f32
    %7 = vector.broadcast %cst_9 : f32 to vector<32x1xf32>
    %8 = arith.divf %6, %7 : vector<32x1xf32>
    %9 = vector.broadcast %8 : vector<32x1xf32> to vector<32x128xf32>
    %10 = arith.subf %0, %9 : vector<32x128xf32>
    %11 = arith.mulf %10, %10 : vector<32x128xf32>
    %cst_10 = arith.constant dense<0.000000e+00> : vector<32xf32>
    %12 = vector.multi_reduction <add>, %11, %cst_10 [1] : vector<32x128xf32> to vector<32xf32>
    %13 = vector.shape_cast %12 : vector<32xf32> to vector<32x1xf32>
    %cst_11 = arith.constant 1.280000e+02 : f32
    %14 = vector.broadcast %cst_11 : f32 to vector<32x1xf32>
    %15 = arith.divf %13, %14 : vector<32x1xf32>
    %16 = vector.broadcast %8 : vector<32x1xf32> to vector<32x128xf32>
    %17 = arith.subf %0, %16 : vector<32x128xf32>
    %cst_12 = arith.constant 9.99999997E-7 : f32
    %18 = vector.broadcast %cst_12 : f32 to vector<32x1xf32>
    %19 = arith.addf %15, %18 : vector<32x1xf32>
    %20 = math.rsqrt %19 : vector<32x1xf32>
    %21 = vector.broadcast %20 : vector<32x1xf32> to vector<32x128xf32>
    %22 = arith.mulf %17, %21 : vector<32x128xf32>
    %23 = vector.broadcast %1 : vector<1x128xf32> to vector<32x128xf32>
    %24 = arith.mulf %22, %23 : vector<32x128xf32>
    %25 = vector.broadcast %2 : vector<1x128xf32> to vector<32x128xf32>
    %26 = arith.addf %24, %25 : vector<32x128xf32>
    %cst_13 = arith.constant 1.000000e+00 : f32
    %27 = vector.broadcast %cst_13 : f32 to vector<1x128xf32>
    %28 = arith.addf %27, %4 : vector<1x128xf32>
    %29 = vector.broadcast %28 : vector<1x128xf32> to vector<32x128xf32>
    %30 = arith.mulf %26, %29 : vector<32x128xf32>
    %31 = vector.broadcast %3 : vector<1x128xf32> to vector<32x128xf32>
    %32 = arith.addf %30, %31 : vector<32x128xf32>
    %33 = arith.truncf %32 : vector<32x128xf32> to vector<32x128xbf16>
    %c0_14 = arith.constant 0 : index
    %c0_15 = arith.constant 0 : index
    %34 = vector.load %arg7[%c0_14, %c0_15] : memref<128x256xbf16, #tpu.memory_space<vmem>>, vector<128x256xbf16>
    %cst_16 = arith.constant dense<0.000000e+00> : vector<32x256xf32>
    %35 = tpu.matmul %33, %34, %cst_16 {dimension_numbers = #tpu.dot_dimension_numbers<[1], [0], [0], [1], [0, 0, 1, 1], [], []>} : vector<32x128xbf16>, vector<128x256xbf16>, vector<32x256xf32> -> vector<32x256xf32>
    %c0_17 = arith.constant 0 : index
    %c0_18 = arith.constant 0 : index
    %36 = vector.load %arg8[%c0_17, %c0_18] : memref<1x256xf32, #tpu.memory_space<vmem>>, vector<1x256xf32>
    %37 = vector.broadcast %36 : vector<1x256xf32> to vector<32x256xf32>
    %38 = arith.addf %35, %37 : vector<32x256xf32>
    %39 = arith.mulf %38, %38 : vector<32x256xf32>
    %40 = arith.mulf %38, %39 : vector<32x256xf32>
    %cst_19 = arith.constant 4.471500e-02 : f32
    %41 = vector.broadcast %cst_19 : f32 to vector<32x256xf32>
    %42 = arith.mulf %41, %40 : vector<32x256xf32>
    %43 = arith.addf %38, %42 : vector<32x256xf32>
    %cst_20 = arith.constant 0.797884583 : f32
    %44 = vector.broadcast %cst_20 : f32 to vector<32x256xf32>
    %45 = arith.mulf %44, %43 : vector<32x256xf32>
    %46 = math.tanh %45 : vector<32x256xf32>
    %cst_21 = arith.constant 1.000000e+00 : f32
    %47 = vector.broadcast %cst_21 : f32 to vector<32x256xf32>
    %48 = arith.addf %47, %46 : vector<32x256xf32>
    %cst_22 = arith.constant 5.000000e-01 : f32
    %49 = vector.broadcast %cst_22 : f32 to vector<32x256xf32>
    %50 = arith.mulf %49, %48 : vector<32x256xf32>
    %51 = arith.mulf %38, %50 : vector<32x256xf32>
    %52 = arith.truncf %51 : vector<32x256xf32> to vector<32x256xbf16>
    %c0_23 = arith.constant 0 : index
    %c0_24 = arith.constant 0 : index
    %53 = vector.load %arg9[%c0_23, %c0_24] : memref<256x128xbf16, #tpu.memory_space<vmem>>, vector<256x128xbf16>
    %cst_25 = arith.constant dense<0.000000e+00> : vector<32x128xf32>
    %54 = tpu.matmul %52, %53, %cst_25 {dimension_numbers = #tpu.dot_dimension_numbers<[1], [0], [0], [1], [0, 0, 1, 1], [], []>} : vector<32x256xbf16>, vector<256x128xbf16>, vector<32x128xf32> -> vector<32x128xf32>
    %c0_26 = arith.constant 0 : index
    %c0_27 = arith.constant 0 : index
    %55 = vector.load %arg6[%c0_26, %c0_27] : memref<1x128xf32, #tpu.memory_space<vmem>>, vector<1x128xf32>
    %c0_28 = arith.constant 0 : index
    %c0_29 = arith.constant 0 : index
    %56 = vector.load %arg10[%c0_28, %c0_29] : memref<1x128xf32, #tpu.memory_space<vmem>>, vector<1x128xf32>
    %57 = vector.broadcast %56 : vector<1x128xf32> to vector<32x128xf32>
    %58 = arith.addf %54, %57 : vector<32x128xf32>
    %59 = vector.broadcast %55 : vector<1x128xf32> to vector<32x128xf32>
    %60 = arith.mulf %59, %58 : vector<32x128xf32>
    %61 = arith.addf %0, %60 : vector<32x128xf32>
    %c0_30 = arith.constant 0 : index
    %c0_31 = arith.constant 0 : index
    %62 = vector.load %arg11[%c0_30, %c0_31] : memref<32x128xf32, #tpu.memory_space<vmem>>, vector<32x128xf32>
    tpu.vector_store %arg11[%c0_30, %c0_31], %61 {strides = array<i32>} : memref<32x128xf32, #tpu.memory_space<vmem>>, vector<32x128xf32>,
    return
  }
  func.func @transform_0(%arg0: i32) -> (i32, i32) {
    %c0_i32 = arith.constant 0 : i32
    %c0_i32_0 = arith.constant 0 : i32
    return %arg0, %c0_i32 : i32, i32
  }
  func.func @transform_1(%arg0: i32) -> (i32, i32) {
    %c0_i32 = arith.constant 0 : i32
    %c0_i32_0 = arith.constant 0 : i32
    %c0_i32_1 = arith.constant 0 : i32
    return %c0_i32, %c0_i32_0 : i32, i32
  }
  func.func @transform_2(%arg0: i32) -> (i32, i32) {
    %c0_i32 = arith.constant 0 : i32
    %c0_i32_0 = arith.constant 0 : i32
    %c0_i32_1 = arith.constant 0 : i32
    return %c0_i32, %c0_i32_0 : i32, i32
  }
  func.func @transform_3(%arg0: i32) -> (i32, i32) {
    %c0_i32 = arith.constant 0 : i32
    %c0_i32_0 = arith.constant 0 : i32
    %c0_i32_1 = arith.constant 0 : i32
    return %c0_i32, %c0_i32_0 : i32, i32
  }
  func.func @transform_4(%arg0: i32) -> (i32, i32) {
    %c0_i32 = arith.constant 0 : i32
    %c0_i32_0 = arith.constant 0 : i32
    %c0_i32_1 = arith.constant 0 : i32
    return %c0_i32, %c0_i32_0 : i32, i32
  }
  func.func @transform_5(%arg0: i32) -> (i32, i32) {
    %c0_i32 = arith.constant 0 : i32
    %c0_i32_0 = arith.constant 0 : i32
    %c0_i32_1 = arith.constant 0 : i32
    return %c0_i32, %c0_i32_0 : i32, i32
  }
  func.func @transform_6(%arg0: i32) -> (i32, i32) {
    %c0_i32 = arith.constant 0 : i32
    %c0_i32_0 = arith.constant 0 : i32
    %c0_i32_1 = arith.constant 0 : i32
    return %c0_i32, %c0_i32_0 : i32, i32
  }
  func.func @transform_7(%arg0: i32) -> (i32, i32) {
    %c0_i32 = arith.constant 0 : i32
    %c0_i32_0 = arith.constant 0 : i32
    %c0_i32_1 = arith.constant 0 : i32
    return %c0_i32, %c0_i32_0 : i32, i32
  }
  func.func @transform_8(%arg0: i32) -> (i32, i32) {
    %c0_i32 = arith.constant 0 : i32
    %c0_i32_0 = arith.constant 0 : i32
    %c0_i32_1 = arith.constant 0 : i32
    return %c0_i32, %c0_i32_0 : i32, i32
  }
  func.func @transform_9(%arg0: i32) -> (i32, i32) {
    %c0_i32 = arith.constant 0 : i32
    %c0_i32_0 = arith.constant 0 : i32
    %c0_i32_1 = arith.constant 0 : i32
    return %c0_i32, %c0_i32_0 : i32, i32
  }
  func.func @transform_10(%arg0: i32) -> (i32, i32) {
    %c0_i32 = arith.constant 0 : i32
    %c0_i32_0 = arith.constant 0 : i32
    return %arg0, %c0_i32 : i32, i32
  }
}

module attributes {stable_mosaic.version = 11 : i64} {
  func.func @_final_cfg_euler_kernel(%arg0: i32, %arg1: memref<16x128xf32, #tpu.memory_space<vmem>>, %arg2: memref<16x128xf32, #tpu.memory_space<vmem>>, %arg3: memref<1x128xf32, #tpu.memory_space<vmem>>, %arg4: memref<1x128xf32, #tpu.memory_space<vmem>>, %arg5: memref<1x128xf32, #tpu.memory_space<vmem>>, %arg6: memref<1x128xf32, #tpu.memory_space<vmem>>, %arg7: memref<128x128xbf16, #tpu.memory_space<vmem>>, %arg8: memref<1x128xf32, #tpu.memory_space<vmem>>, %arg9: memref<16x128xf32, #tpu.memory_space<vmem>>, %arg10: memref<16x128xf32, #tpu.memory_space<vmem>>) attributes {dimension_semantics = [#tpu.dimension_semantics<parallel>], iteration_bounds = array<i64: 1>, scalar_prefetch = 0 : i64, scratch_operands = 0 : i64, tpu.core_type = #tpu.core_type<tc>, window_params = [{transform_indices = @transform_0, window_bounds = array<i64: 16, 128>}, {transform_indices = @transform_1, window_bounds = array<i64: 16, 128>}, {pipeline_mode = #tpu.pipeline_mode<synchronous>, transform_indices = @transform_2, window_bounds = array<i64: 1, 128>}, {pipeline_mode = #tpu.pipeline_mode<synchronous>, transform_indices = @transform_3, window_bounds = array<i64: 1, 128>}, {pipeline_mode = #tpu.pipeline_mode<synchronous>, transform_indices = @transform_4, window_bounds = array<i64: 1, 128>}, {pipeline_mode = #tpu.pipeline_mode<synchronous>, transform_indices = @transform_5, window_bounds = array<i64: 1, 128>}, {pipeline_mode = #tpu.pipeline_mode<synchronous>, transform_indices = @transform_6, window_bounds = array<i64: 128, 128>}, {pipeline_mode = #tpu.pipeline_mode<synchronous>, transform_indices = @transform_7, window_bounds = array<i64: 1, 128>}, {transform_indices = @transform_8, window_bounds = array<i64: 16, 128>}, {transform_indices = @transform_9, window_bounds = array<i64: 16, 128>}]} {
    %c0 = arith.constant 0 : index
    %c0_0 = arith.constant 0 : index
    %0 = vector.load %arg1[%c0, %c0_0] : memref<16x128xf32, #tpu.memory_space<vmem>>, vector<16x128xf32>
    %c0_1 = arith.constant 0 : index
    %c0_2 = arith.constant 0 : index
    %1 = vector.load %arg3[%c0_1, %c0_2] : memref<1x128xf32, #tpu.memory_space<vmem>>, vector<1x128xf32>
    %c0_3 = arith.constant 0 : index
    %c0_4 = arith.constant 0 : index
    %2 = vector.load %arg4[%c0_3, %c0_4] : memref<1x128xf32, #tpu.memory_space<vmem>>, vector<1x128xf32>
    %c0_5 = arith.constant 0 : index
    %c0_6 = arith.constant 0 : index
    %3 = vector.load %arg5[%c0_5, %c0_6] : memref<1x128xf32, #tpu.memory_space<vmem>>, vector<1x128xf32>
    %c0_7 = arith.constant 0 : index
    %c0_8 = arith.constant 0 : index
    %4 = vector.load %arg6[%c0_7, %c0_8] : memref<1x128xf32, #tpu.memory_space<vmem>>, vector<1x128xf32>
    %cst = arith.constant dense<0.000000e+00> : vector<16xf32>
    %5 = vector.multi_reduction <add>, %0, %cst [1] : vector<16x128xf32> to vector<16xf32>
    %6 = vector.shape_cast %5 : vector<16xf32> to vector<16x1xf32>
    %cst_9 = arith.constant 1.280000e+02 : f32
    %7 = vector.broadcast %cst_9 : f32 to vector<16x1xf32>
    %8 = arith.divf %6, %7 : vector<16x1xf32>
    %9 = vector.broadcast %8 : vector<16x1xf32> to vector<16x128xf32>
    %10 = arith.subf %0, %9 : vector<16x128xf32>
    %11 = arith.mulf %10, %10 : vector<16x128xf32>
    %cst_10 = arith.constant dense<0.000000e+00> : vector<16xf32>
    %12 = vector.multi_reduction <add>, %11, %cst_10 [1] : vector<16x128xf32> to vector<16xf32>
    %13 = vector.shape_cast %12 : vector<16xf32> to vector<16x1xf32>
    %cst_11 = arith.constant 1.280000e+02 : f32
    %14 = vector.broadcast %cst_11 : f32 to vector<16x1xf32>
    %15 = arith.divf %13, %14 : vector<16x1xf32>
    %16 = vector.broadcast %8 : vector<16x1xf32> to vector<16x128xf32>
    %17 = arith.subf %0, %16 : vector<16x128xf32>
    %cst_12 = arith.constant 9.99999997E-7 : f32
    %18 = vector.broadcast %cst_12 : f32 to vector<16x1xf32>
    %19 = arith.addf %15, %18 : vector<16x1xf32>
    %20 = math.rsqrt %19 : vector<16x1xf32>
    %21 = vector.broadcast %20 : vector<16x1xf32> to vector<16x128xf32>
    %22 = arith.mulf %17, %21 : vector<16x128xf32>
    %23 = vector.broadcast %1 : vector<1x128xf32> to vector<16x128xf32>
    %24 = arith.mulf %22, %23 : vector<16x128xf32>
    %25 = vector.broadcast %2 : vector<1x128xf32> to vector<16x128xf32>
    %26 = arith.addf %24, %25 : vector<16x128xf32>
    %cst_13 = arith.constant 1.000000e+00 : f32
    %27 = vector.broadcast %cst_13 : f32 to vector<1x128xf32>
    %28 = arith.addf %27, %4 : vector<1x128xf32>
    %29 = vector.broadcast %28 : vector<1x128xf32> to vector<16x128xf32>
    %30 = arith.mulf %26, %29 : vector<16x128xf32>
    %31 = vector.broadcast %3 : vector<1x128xf32> to vector<16x128xf32>
    %32 = arith.addf %30, %31 : vector<16x128xf32>
    %c0_14 = arith.constant 0 : index
    %c0_15 = arith.constant 0 : index
    %33 = vector.load %arg2[%c0_14, %c0_15] : memref<16x128xf32, #tpu.memory_space<vmem>>, vector<16x128xf32>
    %c0_16 = arith.constant 0 : index
    %c0_17 = arith.constant 0 : index
    %34 = vector.load %arg3[%c0_16, %c0_17] : memref<1x128xf32, #tpu.memory_space<vmem>>, vector<1x128xf32>
    %c0_18 = arith.constant 0 : index
    %c0_19 = arith.constant 0 : index
    %35 = vector.load %arg4[%c0_18, %c0_19] : memref<1x128xf32, #tpu.memory_space<vmem>>, vector<1x128xf32>
    %c0_20 = arith.constant 0 : index
    %c0_21 = arith.constant 0 : index
    %36 = vector.load %arg5[%c0_20, %c0_21] : memref<1x128xf32, #tpu.memory_space<vmem>>, vector<1x128xf32>
    %c0_22 = arith.constant 0 : index
    %c0_23 = arith.constant 0 : index
    %37 = vector.load %arg6[%c0_22, %c0_23] : memref<1x128xf32, #tpu.memory_space<vmem>>, vector<1x128xf32>
    %cst_24 = arith.constant dense<0.000000e+00> : vector<16xf32>
    %38 = vector.multi_reduction <add>, %33, %cst_24 [1] : vector<16x128xf32> to vector<16xf32>
    %39 = vector.shape_cast %38 : vector<16xf32> to vector<16x1xf32>
    %cst_25 = arith.constant 1.280000e+02 : f32
    %40 = vector.broadcast %cst_25 : f32 to vector<16x1xf32>
    %41 = arith.divf %39, %40 : vector<16x1xf32>
    %42 = vector.broadcast %41 : vector<16x1xf32> to vector<16x128xf32>
    %43 = arith.subf %33, %42 : vector<16x128xf32>
    %44 = arith.mulf %43, %43 : vector<16x128xf32>
    %cst_26 = arith.constant dense<0.000000e+00> : vector<16xf32>
    %45 = vector.multi_reduction <add>, %44, %cst_26 [1] : vector<16x128xf32> to vector<16xf32>
    %46 = vector.shape_cast %45 : vector<16xf32> to vector<16x1xf32>
    %cst_27 = arith.constant 1.280000e+02 : f32
    %47 = vector.broadcast %cst_27 : f32 to vector<16x1xf32>
    %48 = arith.divf %46, %47 : vector<16x1xf32>
    %49 = vector.broadcast %41 : vector<16x1xf32> to vector<16x128xf32>
    %50 = arith.subf %33, %49 : vector<16x128xf32>
    %cst_28 = arith.constant 9.99999997E-7 : f32
    %51 = vector.broadcast %cst_28 : f32 to vector<16x1xf32>
    %52 = arith.addf %48, %51 : vector<16x1xf32>
    %53 = math.rsqrt %52 : vector<16x1xf32>
    %54 = vector.broadcast %53 : vector<16x1xf32> to vector<16x128xf32>
    %55 = arith.mulf %50, %54 : vector<16x128xf32>
    %56 = vector.broadcast %34 : vector<1x128xf32> to vector<16x128xf32>
    %57 = arith.mulf %55, %56 : vector<16x128xf32>
    %58 = vector.broadcast %35 : vector<1x128xf32> to vector<16x128xf32>
    %59 = arith.addf %57, %58 : vector<16x128xf32>
    %cst_29 = arith.constant 1.000000e+00 : f32
    %60 = vector.broadcast %cst_29 : f32 to vector<1x128xf32>
    %61 = arith.addf %60, %37 : vector<1x128xf32>
    %62 = vector.broadcast %61 : vector<1x128xf32> to vector<16x128xf32>
    %63 = arith.mulf %59, %62 : vector<16x128xf32>
    %64 = vector.broadcast %36 : vector<1x128xf32> to vector<16x128xf32>
    %65 = arith.addf %63, %64 : vector<16x128xf32>
    %cst_30 = arith.constant 1.500000e+00 : f32
    %66 = vector.broadcast %cst_30 : f32 to vector<16x128xf32>
    %67 = arith.mulf %66, %32 : vector<16x128xf32>
    %cst_31 = arith.constant 5.000000e-01 : f32
    %68 = vector.broadcast %cst_31 : f32 to vector<16x128xf32>
    %69 = arith.mulf %68, %65 : vector<16x128xf32>
    %70 = arith.subf %67, %69 : vector<16x128xf32>
    %71 = arith.truncf %70 : vector<16x128xf32> to vector<16x128xbf16>
    %c0_32 = arith.constant 0 : index
    %c0_33 = arith.constant 0 : index
    %72 = vector.load %arg7[%c0_32, %c0_33] : memref<128x128xbf16, #tpu.memory_space<vmem>>, vector<128x128xbf16>
    %cst_34 = arith.constant dense<0.000000e+00> : vector<16x128xf32>
    %73 = tpu.matmul %71, %72, %cst_34 {dimension_numbers = #tpu.dot_dimension_numbers<[1], [0], [0], [1], [0, 0, 1, 1], [], []>} : vector<16x128xbf16>, vector<128x128xbf16>, vector<16x128xf32> -> vector<16x128xf32>
    %c0_35 = arith.constant 0 : index
    %c0_36 = arith.constant 0 : index
    %74 = vector.load %arg8[%c0_35, %c0_36] : memref<1x128xf32, #tpu.memory_space<vmem>>, vector<1x128xf32>
    %75 = vector.broadcast %74 : vector<1x128xf32> to vector<16x128xf32>
    %76 = arith.addf %73, %75 : vector<16x128xf32>
    %c0_37 = arith.constant 0 : index
    %c0_38 = arith.constant 0 : index
    %77 = vector.load %arg9[%c0_37, %c0_38] : memref<16x128xf32, #tpu.memory_space<vmem>>, vector<16x128xf32>
    %cst_39 = arith.constant 0.133974597 : f32
    %78 = vector.broadcast %cst_39 : f32 to vector<16x128xf32>
    %79 = arith.mulf %78, %76 : vector<16x128xf32>
    %80 = arith.addf %77, %79 : vector<16x128xf32>
    %c0_40 = arith.constant 0 : index
    %c0_41 = arith.constant 0 : index
    %81 = vector.load %arg10[%c0_40, %c0_41] : memref<16x128xf32, #tpu.memory_space<vmem>>, vector<16x128xf32>
    tpu.vector_store %arg10[%c0_40, %c0_41], %80 {strides = array<i32>} : memref<16x128xf32, #tpu.memory_space<vmem>>, vector<16x128xf32>,
    return
  }
  func.func @transform_0(%arg0: i32) -> (i32, i32) {
    %c0_i32 = arith.constant 0 : i32
    %c0_i32_0 = arith.constant 0 : i32
    return %arg0, %c0_i32 : i32, i32
  }
  func.func @transform_1(%arg0: i32) -> (i32, i32) {
    %c1_i32 = arith.constant 1 : i32
    %0 = arith.addi %arg0, %c1_i32 : i32
    %c0_i32 = arith.constant 0 : i32
    %c0_i32_0 = arith.constant 0 : i32
    return %0, %c0_i32 : i32, i32
  }
  func.func @transform_2(%arg0: i32) -> (i32, i32) {
    %c0_i32 = arith.constant 0 : i32
    %c0_i32_0 = arith.constant 0 : i32
    %c0_i32_1 = arith.constant 0 : i32
    return %c0_i32, %c0_i32_0 : i32, i32
  }
  func.func @transform_3(%arg0: i32) -> (i32, i32) {
    %c0_i32 = arith.constant 0 : i32
    %c0_i32_0 = arith.constant 0 : i32
    %c0_i32_1 = arith.constant 0 : i32
    return %c0_i32, %c0_i32_0 : i32, i32
  }
  func.func @transform_4(%arg0: i32) -> (i32, i32) {
    %c0_i32 = arith.constant 0 : i32
    %c0_i32_0 = arith.constant 0 : i32
    %c0_i32_1 = arith.constant 0 : i32
    return %c0_i32, %c0_i32_0 : i32, i32
  }
  func.func @transform_5(%arg0: i32) -> (i32, i32) {
    %c0_i32 = arith.constant 0 : i32
    %c0_i32_0 = arith.constant 0 : i32
    %c0_i32_1 = arith.constant 0 : i32
    return %c0_i32, %c0_i32_0 : i32, i32
  }
  func.func @transform_6(%arg0: i32) -> (i32, i32) {
    %c0_i32 = arith.constant 0 : i32
    %c0_i32_0 = arith.constant 0 : i32
    %c0_i32_1 = arith.constant 0 : i32
    return %c0_i32, %c0_i32_0 : i32, i32
  }
  func.func @transform_7(%arg0: i32) -> (i32, i32) {
    %c0_i32 = arith.constant 0 : i32
    %c0_i32_0 = arith.constant 0 : i32
    %c0_i32_1 = arith.constant 0 : i32
    return %c0_i32, %c0_i32_0 : i32, i32
  }
  func.func @transform_8(%arg0: i32) -> (i32, i32) {
    %c0_i32 = arith.constant 0 : i32
    %c0_i32_0 = arith.constant 0 : i32
    return %arg0, %c0_i32 : i32, i32
  }
  func.func @transform_9(%arg0: i32) -> (i32, i32) {
    %c0_i32 = arith.constant 0 : i32
    %c0_i32_0 = arith.constant 0 : i32
    return %arg0, %c0_i32 : i32, i32
  }
}

module attributes {stable_mosaic.version = 11 : i64} {
  func.func @_final_cfg_euler_kernel(%arg0: i32, %arg1: memref<16x128xf32, #tpu.memory_space<vmem>>, %arg2: memref<16x128xf32, #tpu.memory_space<vmem>>, %arg3: memref<1x128xf32, #tpu.memory_space<vmem>>, %arg4: memref<1x128xf32, #tpu.memory_space<vmem>>, %arg5: memref<1x128xf32, #tpu.memory_space<vmem>>, %arg6: memref<1x128xf32, #tpu.memory_space<vmem>>, %arg7: memref<128x128xbf16, #tpu.memory_space<vmem>>, %arg8: memref<1x128xf32, #tpu.memory_space<vmem>>, %arg9: memref<16x128xf32, #tpu.memory_space<vmem>>, %arg10: memref<16x128xf32, #tpu.memory_space<vmem>>) attributes {dimension_semantics = [#tpu.dimension_semantics<parallel>], iteration_bounds = array<i64: 1>, scalar_prefetch = 0 : i64, scratch_operands = 0 : i64, tpu.core_type = #tpu.core_type<tc>, window_params = [{transform_indices = @transform_0, window_bounds = array<i64: 16, 128>}, {transform_indices = @transform_1, window_bounds = array<i64: 16, 128>}, {pipeline_mode = #tpu.pipeline_mode<synchronous>, transform_indices = @transform_2, window_bounds = array<i64: 1, 128>}, {pipeline_mode = #tpu.pipeline_mode<synchronous>, transform_indices = @transform_3, window_bounds = array<i64: 1, 128>}, {pipeline_mode = #tpu.pipeline_mode<synchronous>, transform_indices = @transform_4, window_bounds = array<i64: 1, 128>}, {pipeline_mode = #tpu.pipeline_mode<synchronous>, transform_indices = @transform_5, window_bounds = array<i64: 1, 128>}, {pipeline_mode = #tpu.pipeline_mode<synchronous>, transform_indices = @transform_6, window_bounds = array<i64: 128, 128>}, {pipeline_mode = #tpu.pipeline_mode<synchronous>, transform_indices = @transform_7, window_bounds = array<i64: 1, 128>}, {transform_indices = @transform_8, window_bounds = array<i64: 16, 128>}, {transform_indices = @transform_9, window_bounds = array<i64: 16, 128>}]} {
    %c0 = arith.constant 0 : index
    %c0_0 = arith.constant 0 : index
    %0 = vector.load %arg1[%c0, %c0_0] : memref<16x128xf32, #tpu.memory_space<vmem>>, vector<16x128xf32>
    %c0_1 = arith.constant 0 : index
    %c0_2 = arith.constant 0 : index
    %1 = vector.load %arg3[%c0_1, %c0_2] : memref<1x128xf32, #tpu.memory_space<vmem>>, vector<1x128xf32>
    %c0_3 = arith.constant 0 : index
    %c0_4 = arith.constant 0 : index
    %2 = vector.load %arg4[%c0_3, %c0_4] : memref<1x128xf32, #tpu.memory_space<vmem>>, vector<1x128xf32>
    %c0_5 = arith.constant 0 : index
    %c0_6 = arith.constant 0 : index
    %3 = vector.load %arg5[%c0_5, %c0_6] : memref<1x128xf32, #tpu.memory_space<vmem>>, vector<1x128xf32>
    %c0_7 = arith.constant 0 : index
    %c0_8 = arith.constant 0 : index
    %4 = vector.load %arg6[%c0_7, %c0_8] : memref<1x128xf32, #tpu.memory_space<vmem>>, vector<1x128xf32>
    %cst = arith.constant dense<0.000000e+00> : vector<16xf32>
    %5 = vector.multi_reduction <add>, %0, %cst [1] : vector<16x128xf32> to vector<16xf32>
    %6 = vector.shape_cast %5 : vector<16xf32> to vector<16x1xf32>
    %cst_9 = arith.constant 1.280000e+02 : f32
    %7 = vector.broadcast %cst_9 : f32 to vector<16x1xf32>
    %8 = arith.divf %6, %7 : vector<16x1xf32>
    %9 = vector.broadcast %8 : vector<16x1xf32> to vector<16x128xf32>
    %10 = arith.subf %0, %9 : vector<16x128xf32>
    %11 = arith.mulf %10, %10 : vector<16x128xf32>
    %cst_10 = arith.constant dense<0.000000e+00> : vector<16xf32>
    %12 = vector.multi_reduction <add>, %11, %cst_10 [1] : vector<16x128xf32> to vector<16xf32>
    %13 = vector.shape_cast %12 : vector<16xf32> to vector<16x1xf32>
    %cst_11 = arith.constant 1.280000e+02 : f32
    %14 = vector.broadcast %cst_11 : f32 to vector<16x1xf32>
    %15 = arith.divf %13, %14 : vector<16x1xf32>
    %16 = vector.broadcast %8 : vector<16x1xf32> to vector<16x128xf32>
    %17 = arith.subf %0, %16 : vector<16x128xf32>
    %cst_12 = arith.constant 9.99999997E-7 : f32
    %18 = vector.broadcast %cst_12 : f32 to vector<16x1xf32>
    %19 = arith.addf %15, %18 : vector<16x1xf32>
    %20 = math.rsqrt %19 : vector<16x1xf32>
    %21 = vector.broadcast %20 : vector<16x1xf32> to vector<16x128xf32>
    %22 = arith.mulf %17, %21 : vector<16x128xf32>
    %23 = vector.broadcast %1 : vector<1x128xf32> to vector<16x128xf32>
    %24 = arith.mulf %22, %23 : vector<16x128xf32>
    %25 = vector.broadcast %2 : vector<1x128xf32> to vector<16x128xf32>
    %26 = arith.addf %24, %25 : vector<16x128xf32>
    %cst_13 = arith.constant 1.000000e+00 : f32
    %27 = vector.broadcast %cst_13 : f32 to vector<1x128xf32>
    %28 = arith.addf %27, %4 : vector<1x128xf32>
    %29 = vector.broadcast %28 : vector<1x128xf32> to vector<16x128xf32>
    %30 = arith.mulf %26, %29 : vector<16x128xf32>
    %31 = vector.broadcast %3 : vector<1x128xf32> to vector<16x128xf32>
    %32 = arith.addf %30, %31 : vector<16x128xf32>
    %c0_14 = arith.constant 0 : index
    %c0_15 = arith.constant 0 : index
    %33 = vector.load %arg2[%c0_14, %c0_15] : memref<16x128xf32, #tpu.memory_space<vmem>>, vector<16x128xf32>
    %c0_16 = arith.constant 0 : index
    %c0_17 = arith.constant 0 : index
    %34 = vector.load %arg3[%c0_16, %c0_17] : memref<1x128xf32, #tpu.memory_space<vmem>>, vector<1x128xf32>
    %c0_18 = arith.constant 0 : index
    %c0_19 = arith.constant 0 : index
    %35 = vector.load %arg4[%c0_18, %c0_19] : memref<1x128xf32, #tpu.memory_space<vmem>>, vector<1x128xf32>
    %c0_20 = arith.constant 0 : index
    %c0_21 = arith.constant 0 : index
    %36 = vector.load %arg5[%c0_20, %c0_21] : memref<1x128xf32, #tpu.memory_space<vmem>>, vector<1x128xf32>
    %c0_22 = arith.constant 0 : index
    %c0_23 = arith.constant 0 : index
    %37 = vector.load %arg6[%c0_22, %c0_23] : memref<1x128xf32, #tpu.memory_space<vmem>>, vector<1x128xf32>
    %cst_24 = arith.constant dense<0.000000e+00> : vector<16xf32>
    %38 = vector.multi_reduction <add>, %33, %cst_24 [1] : vector<16x128xf32> to vector<16xf32>
    %39 = vector.shape_cast %38 : vector<16xf32> to vector<16x1xf32>
    %cst_25 = arith.constant 1.280000e+02 : f32
    %40 = vector.broadcast %cst_25 : f32 to vector<16x1xf32>
    %41 = arith.divf %39, %40 : vector<16x1xf32>
    %42 = vector.broadcast %41 : vector<16x1xf32> to vector<16x128xf32>
    %43 = arith.subf %33, %42 : vector<16x128xf32>
    %44 = arith.mulf %43, %43 : vector<16x128xf32>
    %cst_26 = arith.constant dense<0.000000e+00> : vector<16xf32>
    %45 = vector.multi_reduction <add>, %44, %cst_26 [1] : vector<16x128xf32> to vector<16xf32>
    %46 = vector.shape_cast %45 : vector<16xf32> to vector<16x1xf32>
    %cst_27 = arith.constant 1.280000e+02 : f32
    %47 = vector.broadcast %cst_27 : f32 to vector<16x1xf32>
    %48 = arith.divf %46, %47 : vector<16x1xf32>
    %49 = vector.broadcast %41 : vector<16x1xf32> to vector<16x128xf32>
    %50 = arith.subf %33, %49 : vector<16x128xf32>
    %cst_28 = arith.constant 9.99999997E-7 : f32
    %51 = vector.broadcast %cst_28 : f32 to vector<16x1xf32>
    %52 = arith.addf %48, %51 : vector<16x1xf32>
    %53 = math.rsqrt %52 : vector<16x1xf32>
    %54 = vector.broadcast %53 : vector<16x1xf32> to vector<16x128xf32>
    %55 = arith.mulf %50, %54 : vector<16x128xf32>
    %56 = vector.broadcast %34 : vector<1x128xf32> to vector<16x128xf32>
    %57 = arith.mulf %55, %56 : vector<16x128xf32>
    %58 = vector.broadcast %35 : vector<1x128xf32> to vector<16x128xf32>
    %59 = arith.addf %57, %58 : vector<16x128xf32>
    %cst_29 = arith.constant 1.000000e+00 : f32
    %60 = vector.broadcast %cst_29 : f32 to vector<1x128xf32>
    %61 = arith.addf %60, %37 : vector<1x128xf32>
    %62 = vector.broadcast %61 : vector<1x128xf32> to vector<16x128xf32>
    %63 = arith.mulf %59, %62 : vector<16x128xf32>
    %64 = vector.broadcast %36 : vector<1x128xf32> to vector<16x128xf32>
    %65 = arith.addf %63, %64 : vector<16x128xf32>
    %cst_30 = arith.constant 1.500000e+00 : f32
    %66 = vector.broadcast %cst_30 : f32 to vector<16x128xf32>
    %67 = arith.mulf %66, %32 : vector<16x128xf32>
    %cst_31 = arith.constant 5.000000e-01 : f32
    %68 = vector.broadcast %cst_31 : f32 to vector<16x128xf32>
    %69 = arith.mulf %68, %65 : vector<16x128xf32>
    %70 = arith.subf %67, %69 : vector<16x128xf32>
    %71 = arith.truncf %70 : vector<16x128xf32> to vector<16x128xbf16>
    %c0_32 = arith.constant 0 : index
    %c0_33 = arith.constant 0 : index
    %72 = vector.load %arg7[%c0_32, %c0_33] : memref<128x128xbf16, #tpu.memory_space<vmem>>, vector<128x128xbf16>
    %cst_34 = arith.constant dense<0.000000e+00> : vector<16x128xf32>
    %73 = tpu.matmul %71, %72, %cst_34 {dimension_numbers = #tpu.dot_dimension_numbers<[1], [0], [0], [1], [0, 0, 1, 1], [], []>} : vector<16x128xbf16>, vector<128x128xbf16>, vector<16x128xf32> -> vector<16x128xf32>
    %c0_35 = arith.constant 0 : index
    %c0_36 = arith.constant 0 : index
    %74 = vector.load %arg8[%c0_35, %c0_36] : memref<1x128xf32, #tpu.memory_space<vmem>>, vector<1x128xf32>
    %75 = vector.broadcast %74 : vector<1x128xf32> to vector<16x128xf32>
    %76 = arith.addf %73, %75 : vector<16x128xf32>
    %c0_37 = arith.constant 0 : index
    %c0_38 = arith.constant 0 : index
    %77 = vector.load %arg9[%c0_37, %c0_38] : memref<16x128xf32, #tpu.memory_space<vmem>>, vector<16x128xf32>
    %cst_39 = arith.constant 0.366025418 : f32
    %78 = vector.broadcast %cst_39 : f32 to vector<16x128xf32>
    %79 = arith.mulf %78, %76 : vector<16x128xf32>
    %80 = arith.addf %77, %79 : vector<16x128xf32>
    %c0_40 = arith.constant 0 : index
    %c0_41 = arith.constant 0 : index
    %81 = vector.load %arg10[%c0_40, %c0_41] : memref<16x128xf32, #tpu.memory_space<vmem>>, vector<16x128xf32>
    tpu.vector_store %arg10[%c0_40, %c0_41], %80 {strides = array<i32>} : memref<16x128xf32, #tpu.memory_space<vmem>>, vector<16x128xf32>,
    return
  }
  func.func @transform_0(%arg0: i32) -> (i32, i32) {
    %c0_i32 = arith.constant 0 : i32
    %c0_i32_0 = arith.constant 0 : i32
    return %arg0, %c0_i32 : i32, i32
  }
  func.func @transform_1(%arg0: i32) -> (i32, i32) {
    %c1_i32 = arith.constant 1 : i32
    %0 = arith.addi %arg0, %c1_i32 : i32
    %c0_i32 = arith.constant 0 : i32
    %c0_i32_0 = arith.constant 0 : i32
    return %0, %c0_i32 : i32, i32
  }
  func.func @transform_2(%arg0: i32) -> (i32, i32) {
    %c0_i32 = arith.constant 0 : i32
    %c0_i32_0 = arith.constant 0 : i32
    %c0_i32_1 = arith.constant 0 : i32
    return %c0_i32, %c0_i32_0 : i32, i32
  }
  func.func @transform_3(%arg0: i32) -> (i32, i32) {
    %c0_i32 = arith.constant 0 : i32
    %c0_i32_0 = arith.constant 0 : i32
    %c0_i32_1 = arith.constant 0 : i32
    return %c0_i32, %c0_i32_0 : i32, i32
  }
  func.func @transform_4(%arg0: i32) -> (i32, i32) {
    %c0_i32 = arith.constant 0 : i32
    %c0_i32_0 = arith.constant 0 : i32
    %c0_i32_1 = arith.constant 0 : i32
    return %c0_i32, %c0_i32_0 : i32, i32
  }
  func.func @transform_5(%arg0: i32) -> (i32, i32) {
    %c0_i32 = arith.constant 0 : i32
    %c0_i32_0 = arith.constant 0 : i32
    %c0_i32_1 = arith.constant 0 : i32
    return %c0_i32, %c0_i32_0 : i32, i32
  }
  func.func @transform_6(%arg0: i32) -> (i32, i32) {
    %c0_i32 = arith.constant 0 : i32
    %c0_i32_0 = arith.constant 0 : i32
    %c0_i32_1 = arith.constant 0 : i32
    return %c0_i32, %c0_i32_0 : i32, i32
  }
  func.func @transform_7(%arg0: i32) -> (i32, i32) {
    %c0_i32 = arith.constant 0 : i32
    %c0_i32_0 = arith.constant 0 : i32
    %c0_i32_1 = arith.constant 0 : i32
    return %c0_i32, %c0_i32_0 : i32, i32
  }
  func.func @transform_8(%arg0: i32) -> (i32, i32) {
    %c0_i32 = arith.constant 0 : i32
    %c0_i32_0 = arith.constant 0 : i32
    return %arg0, %c0_i32 : i32, i32
  }
  func.func @transform_9(%arg0: i32) -> (i32, i32) {
    %c0_i32 = arith.constant 0 : i32
    %c0_i32_0 = arith.constant 0 : i32
    return %arg0, %c0_i32 : i32, i32
  }
}

module attributes {stable_mosaic.version = 11 : i64} {
  func.func @_final_cfg_euler_kernel(%arg0: i32, %arg1: memref<16x128xf32, #tpu.memory_space<vmem>>, %arg2: memref<16x128xf32, #tpu.memory_space<vmem>>, %arg3: memref<1x128xf32, #tpu.memory_space<vmem>>, %arg4: memref<1x128xf32, #tpu.memory_space<vmem>>, %arg5: memref<1x128xf32, #tpu.memory_space<vmem>>, %arg6: memref<1x128xf32, #tpu.memory_space<vmem>>, %arg7: memref<128x128xbf16, #tpu.memory_space<vmem>>, %arg8: memref<1x128xf32, #tpu.memory_space<vmem>>, %arg9: memref<16x128xf32, #tpu.memory_space<vmem>>, %arg10: memref<16x128xf32, #tpu.memory_space<vmem>>) attributes {dimension_semantics = [#tpu.dimension_semantics<parallel>], iteration_bounds = array<i64: 1>, scalar_prefetch = 0 : i64, scratch_operands = 0 : i64, tpu.core_type = #tpu.core_type<tc>, window_params = [{transform_indices = @transform_0, window_bounds = array<i64: 16, 128>}, {transform_indices = @transform_1, window_bounds = array<i64: 16, 128>}, {pipeline_mode = #tpu.pipeline_mode<synchronous>, transform_indices = @transform_2, window_bounds = array<i64: 1, 128>}, {pipeline_mode = #tpu.pipeline_mode<synchronous>, transform_indices = @transform_3, window_bounds = array<i64: 1, 128>}, {pipeline_mode = #tpu.pipeline_mode<synchronous>, transform_indices = @transform_4, window_bounds = array<i64: 1, 128>}, {pipeline_mode = #tpu.pipeline_mode<synchronous>, transform_indices = @transform_5, window_bounds = array<i64: 1, 128>}, {pipeline_mode = #tpu.pipeline_mode<synchronous>, transform_indices = @transform_6, window_bounds = array<i64: 128, 128>}, {pipeline_mode = #tpu.pipeline_mode<synchronous>, transform_indices = @transform_7, window_bounds = array<i64: 1, 128>}, {transform_indices = @transform_8, window_bounds = array<i64: 16, 128>}, {transform_indices = @transform_9, window_bounds = array<i64: 16, 128>}]} {
    %c0 = arith.constant 0 : index
    %c0_0 = arith.constant 0 : index
    %0 = vector.load %arg1[%c0, %c0_0] : memref<16x128xf32, #tpu.memory_space<vmem>>, vector<16x128xf32>
    %c0_1 = arith.constant 0 : index
    %c0_2 = arith.constant 0 : index
    %1 = vector.load %arg3[%c0_1, %c0_2] : memref<1x128xf32, #tpu.memory_space<vmem>>, vector<1x128xf32>
    %c0_3 = arith.constant 0 : index
    %c0_4 = arith.constant 0 : index
    %2 = vector.load %arg4[%c0_3, %c0_4] : memref<1x128xf32, #tpu.memory_space<vmem>>, vector<1x128xf32>
    %c0_5 = arith.constant 0 : index
    %c0_6 = arith.constant 0 : index
    %3 = vector.load %arg5[%c0_5, %c0_6] : memref<1x128xf32, #tpu.memory_space<vmem>>, vector<1x128xf32>
    %c0_7 = arith.constant 0 : index
    %c0_8 = arith.constant 0 : index
    %4 = vector.load %arg6[%c0_7, %c0_8] : memref<1x128xf32, #tpu.memory_space<vmem>>, vector<1x128xf32>
    %cst = arith.constant dense<0.000000e+00> : vector<16xf32>
    %5 = vector.multi_reduction <add>, %0, %cst [1] : vector<16x128xf32> to vector<16xf32>
    %6 = vector.shape_cast %5 : vector<16xf32> to vector<16x1xf32>
    %cst_9 = arith.constant 1.280000e+02 : f32
    %7 = vector.broadcast %cst_9 : f32 to vector<16x1xf32>
    %8 = arith.divf %6, %7 : vector<16x1xf32>
    %9 = vector.broadcast %8 : vector<16x1xf32> to vector<16x128xf32>
    %10 = arith.subf %0, %9 : vector<16x128xf32>
    %11 = arith.mulf %10, %10 : vector<16x128xf32>
    %cst_10 = arith.constant dense<0.000000e+00> : vector<16xf32>
    %12 = vector.multi_reduction <add>, %11, %cst_10 [1] : vector<16x128xf32> to vector<16xf32>
    %13 = vector.shape_cast %12 : vector<16xf32> to vector<16x1xf32>
    %cst_11 = arith.constant 1.280000e+02 : f32
    %14 = vector.broadcast %cst_11 : f32 to vector<16x1xf32>
    %15 = arith.divf %13, %14 : vector<16x1xf32>
    %16 = vector.broadcast %8 : vector<16x1xf32> to vector<16x128xf32>
    %17 = arith.subf %0, %16 : vector<16x128xf32>
    %cst_12 = arith.constant 9.99999997E-7 : f32
    %18 = vector.broadcast %cst_12 : f32 to vector<16x1xf32>
    %19 = arith.addf %15, %18 : vector<16x1xf32>
    %20 = math.rsqrt %19 : vector<16x1xf32>
    %21 = vector.broadcast %20 : vector<16x1xf32> to vector<16x128xf32>
    %22 = arith.mulf %17, %21 : vector<16x128xf32>
    %23 = vector.broadcast %1 : vector<1x128xf32> to vector<16x128xf32>
    %24 = arith.mulf %22, %23 : vector<16x128xf32>
    %25 = vector.broadcast %2 : vector<1x128xf32> to vector<16x128xf32>
    %26 = arith.addf %24, %25 : vector<16x128xf32>
    %cst_13 = arith.constant 1.000000e+00 : f32
    %27 = vector.broadcast %cst_13 : f32 to vector<1x128xf32>
    %28 = arith.addf %27, %4 : vector<1x128xf32>
    %29 = vector.broadcast %28 : vector<1x128xf32> to vector<16x128xf32>
    %30 = arith.mulf %26, %29 : vector<16x128xf32>
    %31 = vector.broadcast %3 : vector<1x128xf32> to vector<16x128xf32>
    %32 = arith.addf %30, %31 : vector<16x128xf32>
    %c0_14 = arith.constant 0 : index
    %c0_15 = arith.constant 0 : index
    %33 = vector.load %arg2[%c0_14, %c0_15] : memref<16x128xf32, #tpu.memory_space<vmem>>, vector<16x128xf32>
    %c0_16 = arith.constant 0 : index
    %c0_17 = arith.constant 0 : index
    %34 = vector.load %arg3[%c0_16, %c0_17] : memref<1x128xf32, #tpu.memory_space<vmem>>, vector<1x128xf32>
    %c0_18 = arith.constant 0 : index
    %c0_19 = arith.constant 0 : index
    %35 = vector.load %arg4[%c0_18, %c0_19] : memref<1x128xf32, #tpu.memory_space<vmem>>, vector<1x128xf32>
    %c0_20 = arith.constant 0 : index
    %c0_21 = arith.constant 0 : index
    %36 = vector.load %arg5[%c0_20, %c0_21] : memref<1x128xf32, #tpu.memory_space<vmem>>, vector<1x128xf32>
    %c0_22 = arith.constant 0 : index
    %c0_23 = arith.constant 0 : index
    %37 = vector.load %arg6[%c0_22, %c0_23] : memref<1x128xf32, #tpu.memory_space<vmem>>, vector<1x128xf32>
    %cst_24 = arith.constant dense<0.000000e+00> : vector<16xf32>
    %38 = vector.multi_reduction <add>, %33, %cst_24 [1] : vector<16x128xf32> to vector<16xf32>
    %39 = vector.shape_cast %38 : vector<16xf32> to vector<16x1xf32>
    %cst_25 = arith.constant 1.280000e+02 : f32
    %40 = vector.broadcast %cst_25 : f32 to vector<16x1xf32>
    %41 = arith.divf %39, %40 : vector<16x1xf32>
    %42 = vector.broadcast %41 : vector<16x1xf32> to vector<16x128xf32>
    %43 = arith.subf %33, %42 : vector<16x128xf32>
    %44 = arith.mulf %43, %43 : vector<16x128xf32>
    %cst_26 = arith.constant dense<0.000000e+00> : vector<16xf32>
    %45 = vector.multi_reduction <add>, %44, %cst_26 [1] : vector<16x128xf32> to vector<16xf32>
    %46 = vector.shape_cast %45 : vector<16xf32> to vector<16x1xf32>
    %cst_27 = arith.constant 1.280000e+02 : f32
    %47 = vector.broadcast %cst_27 : f32 to vector<16x1xf32>
    %48 = arith.divf %46, %47 : vector<16x1xf32>
    %49 = vector.broadcast %41 : vector<16x1xf32> to vector<16x128xf32>
    %50 = arith.subf %33, %49 : vector<16x128xf32>
    %cst_28 = arith.constant 9.99999997E-7 : f32
    %51 = vector.broadcast %cst_28 : f32 to vector<16x1xf32>
    %52 = arith.addf %48, %51 : vector<16x1xf32>
    %53 = math.rsqrt %52 : vector<16x1xf32>
    %54 = vector.broadcast %53 : vector<16x1xf32> to vector<16x128xf32>
    %55 = arith.mulf %50, %54 : vector<16x128xf32>
    %56 = vector.broadcast %34 : vector<1x128xf32> to vector<16x128xf32>
    %57 = arith.mulf %55, %56 : vector<16x128xf32>
    %58 = vector.broadcast %35 : vector<1x128xf32> to vector<16x128xf32>
    %59 = arith.addf %57, %58 : vector<16x128xf32>
    %cst_29 = arith.constant 1.000000e+00 : f32
    %60 = vector.broadcast %cst_29 : f32 to vector<1x128xf32>
    %61 = arith.addf %60, %37 : vector<1x128xf32>
    %62 = vector.broadcast %61 : vector<1x128xf32> to vector<16x128xf32>
    %63 = arith.mulf %59, %62 : vector<16x128xf32>
    %64 = vector.broadcast %36 : vector<1x128xf32> to vector<16x128xf32>
    %65 = arith.addf %63, %64 : vector<16x128xf32>
    %cst_30 = arith.constant 1.500000e+00 : f32
    %66 = vector.broadcast %cst_30 : f32 to vector<16x128xf32>
    %67 = arith.mulf %66, %32 : vector<16x128xf32>
    %cst_31 = arith.constant 5.000000e-01 : f32
    %68 = vector.broadcast %cst_31 : f32 to vector<16x128xf32>
    %69 = arith.mulf %68, %65 : vector<16x128xf32>
    %70 = arith.subf %67, %69 : vector<16x128xf32>
    %71 = arith.truncf %70 : vector<16x128xf32> to vector<16x128xbf16>
    %c0_32 = arith.constant 0 : index
    %c0_33 = arith.constant 0 : index
    %72 = vector.load %arg7[%c0_32, %c0_33] : memref<128x128xbf16, #tpu.memory_space<vmem>>, vector<128x128xbf16>
    %cst_34 = arith.constant dense<0.000000e+00> : vector<16x128xf32>
    %73 = tpu.matmul %71, %72, %cst_34 {dimension_numbers = #tpu.dot_dimension_numbers<[1], [0], [0], [1], [0, 0, 1, 1], [], []>} : vector<16x128xbf16>, vector<128x128xbf16>, vector<16x128xf32> -> vector<16x128xf32>
    %c0_35 = arith.constant 0 : index
    %c0_36 = arith.constant 0 : index
    %74 = vector.load %arg8[%c0_35, %c0_36] : memref<1x128xf32, #tpu.memory_space<vmem>>, vector<1x128xf32>
    %75 = vector.broadcast %74 : vector<1x128xf32> to vector<16x128xf32>
    %76 = arith.addf %73, %75 : vector<16x128xf32>
    %c0_37 = arith.constant 0 : index
    %c0_38 = arith.constant 0 : index
    %77 = vector.load %arg9[%c0_37, %c0_38] : memref<16x128xf32, #tpu.memory_space<vmem>>, vector<16x128xf32>
    %cst_39 = arith.constant 5.000000e-01 : f32
    %78 = vector.broadcast %cst_39 : f32 to vector<16x128xf32>
    %79 = arith.mulf %78, %76 : vector<16x128xf32>
    %80 = arith.addf %77, %79 : vector<16x128xf32>
    %c0_40 = arith.constant 0 : index
    %c0_41 = arith.constant 0 : index
    %81 = vector.load %arg10[%c0_40, %c0_41] : memref<16x128xf32, #tpu.memory_space<vmem>>, vector<16x128xf32>
    tpu.vector_store %arg10[%c0_40, %c0_41], %80 {strides = array<i32>} : memref<16x128xf32, #tpu.memory_space<vmem>>, vector<16x128xf32>,
    return
  }
  func.func @transform_0(%arg0: i32) -> (i32, i32) {
    %c0_i32 = arith.constant 0 : i32
    %c0_i32_0 = arith.constant 0 : i32
    return %arg0, %c0_i32 : i32, i32
  }
  func.func @transform_1(%arg0: i32) -> (i32, i32) {
    %c1_i32 = arith.constant 1 : i32
    %0 = arith.addi %arg0, %c1_i32 : i32
    %c0_i32 = arith.constant 0 : i32
    %c0_i32_0 = arith.constant 0 : i32
    return %0, %c0_i32 : i32, i32
  }
  func.func @transform_2(%arg0: i32) -> (i32, i32) {
    %c0_i32 = arith.constant 0 : i32
    %c0_i32_0 = arith.constant 0 : i32
    %c0_i32_1 = arith.constant 0 : i32
    return %c0_i32, %c0_i32_0 : i32, i32
  }
  func.func @transform_3(%arg0: i32) -> (i32, i32) {
    %c0_i32 = arith.constant 0 : i32
    %c0_i32_0 = arith.constant 0 : i32
    %c0_i32_1 = arith.constant 0 : i32
    return %c0_i32, %c0_i32_0 : i32, i32
  }
  func.func @transform_4(%arg0: i32) -> (i32, i32) {
    %c0_i32 = arith.constant 0 : i32
    %c0_i32_0 = arith.constant 0 : i32
    %c0_i32_1 = arith.constant 0 : i32
    return %c0_i32, %c0_i32_0 : i32, i32
  }
  func.func @transform_5(%arg0: i32) -> (i32, i32) {
    %c0_i32 = arith.constant 0 : i32
    %c0_i32_0 = arith.constant 0 : i32
    %c0_i32_1 = arith.constant 0 : i32
    return %c0_i32, %c0_i32_0 : i32, i32
  }
  func.func @transform_6(%arg0: i32) -> (i32, i32) {
    %c0_i32 = arith.constant 0 : i32
    %c0_i32_0 = arith.constant 0 : i32
    %c0_i32_1 = arith.constant 0 : i32
    return %c0_i32, %c0_i32_0 : i32, i32
  }
  func.func @transform_7(%arg0: i32) -> (i32, i32) {
    %c0_i32 = arith.constant 0 : i32
    %c0_i32_0 = arith.constant 0 : i32
    %c0_i32_1 = arith.constant 0 : i32
    return %c0_i32, %c0_i32_0 : i32, i32
  }
  func.func @transform_8(%arg0: i32) -> (i32, i32) {
    %c0_i32 = arith.constant 0 : i32
    %c0_i32_0 = arith.constant 0 : i32
    return %arg0, %c0_i32 : i32, i32
  }
  func.func @transform_9(%arg0: i32) -> (i32, i32) {
    %c0_i32 = arith.constant 0 : i32
    %c0_i32_0 = arith.constant 0 : i32
    return %arg0, %c0_i32 : i32, i32
  }
}

module attributes {stable_mosaic.version = 11 : i64} {
  func.func @_linear_tiled_kernel(%arg0: i32, %arg1: i32, %arg2: i32, %arg3: memref<16x128xbf16, #tpu.memory_space<vmem>>, %arg4: memref<128x256xbf16, #tpu.memory_space<vmem>>, %arg5: memref<1x256xf32, #tpu.memory_space<vmem>>, %arg6: memref<16x256xf32, #tpu.memory_space<vmem>>, %arg7: memref<16x256xf32, #tpu.memory_space<vmem>>) attributes {dimension_semantics = [#tpu.dimension_semantics<parallel>, #tpu.dimension_semantics<parallel>, #tpu.dimension_semantics<arbitrary>], iteration_bounds = array<i64: 1, 1, 1>, scalar_prefetch = 0 : i64, scratch_operands = 1 : i64, tpu.core_type = #tpu.core_type<tc>, window_params = [{transform_indices = @transform_0, window_bounds = array<i64: 16, 128>}, {transform_indices = @transform_1, window_bounds = array<i64: 128, 256>}, {transform_indices = @transform_2, window_bounds = array<i64: 1, 256>}, {transform_indices = @transform_3, window_bounds = array<i64: 16, 256>}]} {
    %c0_i32 = arith.constant 0 : i32
    %0 = arith.cmpi eq, %arg2, %c0_i32 : i32
    %1 = arith.extui %0 : i1 to i32
    %c0_i32_0 = arith.constant 0 : i32
    %2 = arith.cmpi ne, %1, %c0_i32_0 : i32
    scf.if %2 {
      %cst_10 = arith.constant 0.000000e+00 : f32
      %12 = vector.broadcast %cst_10 : f32 to vector<16x256xf32>
      %c0_11 = arith.constant 0 : index
      %c0_12 = arith.constant 0 : index
      %13 = vector.load %arg7[%c0_11, %c0_12] : memref<16x256xf32, #tpu.memory_space<vmem>>, vector<16x256xf32>
      tpu.vector_store %arg7[%c0_11, %c0_12], %12 {strides = array<i32>} : memref<16x256xf32, #tpu.memory_space<vmem>>, vector<16x256xf32>,
    } else {
    }
    %c0 = arith.constant 0 : index
    %c0_1 = arith.constant 0 : index
    %3 = vector.load %arg7[%c0, %c0_1] : memref<16x256xf32, #tpu.memory_space<vmem>>, vector<16x256xf32>
    %c0_2 = arith.constant 0 : index
    %c0_3 = arith.constant 0 : index
    %4 = vector.load %arg3[%c0_2, %c0_3] : memref<16x128xbf16, #tpu.memory_space<vmem>>, vector<16x128xbf16>
    %c0_4 = arith.constant 0 : index
    %c0_5 = arith.constant 0 : index
    %5 = vector.load %arg4[%c0_4, %c0_5] : memref<128x256xbf16, #tpu.memory_space<vmem>>, vector<128x256xbf16>
    %cst = arith.constant dense<0.000000e+00> : vector<16x256xf32>
    %6 = tpu.matmul %4, %5, %cst {dimension_numbers = #tpu.dot_dimension_numbers<[1], [0], [0], [1], [0, 0, 1, 1], [], []>} : vector<16x128xbf16>, vector<128x256xbf16>, vector<16x256xf32> -> vector<16x256xf32>
    %7 = arith.addf %3, %6 : vector<16x256xf32>
    %c0_6 = arith.constant 0 : index
    %c0_7 = arith.constant 0 : index
    %8 = vector.load %arg7[%c0_6, %c0_7] : memref<16x256xf32, #tpu.memory_space<vmem>>, vector<16x256xf32>
    tpu.vector_store %arg7[%c0_6, %c0_7], %7 {strides = array<i32>} : memref<16x256xf32, #tpu.memory_space<vmem>>, vector<16x256xf32>,
    %c0_i32_8 = arith.constant 0 : i32
    %9 = arith.cmpi eq, %arg2, %c0_i32_8 : i32
    %10 = arith.extui %9 : i1 to i32
    %c0_i32_9 = arith.constant 0 : i32
    %11 = arith.cmpi ne, %10, %c0_i32_9 : i32
    scf.if %11 {
      %c0_10 = arith.constant 0 : index
      %c0_11 = arith.constant 0 : index
      %12 = vector.load %arg7[%c0_10, %c0_11] : memref<16x256xf32, #tpu.memory_space<vmem>>, vector<16x256xf32>
      %c0_12 = arith.constant 0 : index
      %c0_13 = arith.constant 0 : index
      %13 = vector.load %arg5[%c0_12, %c0_13] : memref<1x256xf32, #tpu.memory_space<vmem>>, vector<1x256xf32>
      %14 = vector.broadcast %13 : vector<1x256xf32> to vector<16x256xf32>
      %15 = arith.addf %12, %14 : vector<16x256xf32>
      %16 = math.tanh %15 : vector<16x256xf32>
      %c0_14 = arith.constant 0 : index
      %c0_15 = arith.constant 0 : index
      %17 = vector.load %arg6[%c0_14, %c0_15] : memref<16x256xf32, #tpu.memory_space<vmem>>, vector<16x256xf32>
      tpu.vector_store %arg6[%c0_14, %c0_15], %16 {strides = array<i32>} : memref<16x256xf32, #tpu.memory_space<vmem>>, vector<16x256xf32>,
    } else {
    }
    return
  }
  func.func @transform_0(%arg0: i32, %arg1: i32, %arg2: i32) -> (i32, i32) {
    %c0_i32 = arith.constant 0 : i32
    return %arg0, %arg2 : i32, i32
  }
  func.func @transform_1(%arg0: i32, %arg1: i32, %arg2: i32) -> (i32, i32) {
    %c0_i32 = arith.constant 0 : i32
    return %arg2, %arg1 : i32, i32
  }
  func.func @transform_2(%arg0: i32, %arg1: i32, %arg2: i32) -> (i32, i32) {
    %c0_i32 = arith.constant 0 : i32
    %c0_i32_0 = arith.constant 0 : i32
    return %c0_i32, %arg1 : i32, i32
  }
  func.func @transform_3(%arg0: i32, %arg1: i32, %arg2: i32) -> (i32, i32) {
    %c0_i32 = arith.constant 0 : i32
    return %arg0, %arg1 : i32, i32
  }
}

</mosaic_0001>

<bundles_post_ra>
// kernel: tpu_custom_call.1
= control target key start
LH: loop header
LB: loop body
LE: loop exit
PB: predicated region body
PF: predicated region fallthrough
CT: control target
= control target key end

     0   :  { %6 = vsyncpa [#allocation3], 0  ;;  %s448_s0 = inlined_call_operand.hbm [shape: f32[8,128], index: 0, kind: input, shape index: {}]   ;;  %s449_s1 = inlined_call_operand.hbm [shape: f32[16,128], index: 1, kind: output, shape index: {}]  }
   0x1   :  { %7 = vsyncpa [#allocation4], 0 }
   0x2   :  { %9 = vsyncpa [#allocation4 + $0x1], 0  ;;  %s348_s6 = smov 0   ;;  %s350_s7 = smov 0  }
   0x3   :  { %s352_s8 = smov 0   ;;  %s354_s9 = smov 0  }
   0x4 LB: > { %s369_s10 = sadd.s32 4294967295, %s334_s9   ;;  %s184_s11 = sadd.s32 4294967294, %s334_s9   ;;  %s334_s9 = sphi %s354_s9, %s457_s9   ;;  %s330_s8 = sphi %s352_s8, %s456_s8   ;;  %s326_s7 = sphi %s350_s7, %s455_s7   ;;  %s322_s6 = sphi %s348_s6, %s454_s6  }
   0x5   : > { %s373_s12 = sadd.s32 1, %s334_s9   ;;  %s43_s13 = sadd.s32 1, %s330_s8 }
   0x6   : > { %s40_s14 = ssub.s32 %s334_s9, %s373_s12  ;;  %p53_p0 = scmp.ne.s32.totalorder %s330_s8, %s326_s7 }
   0x7   : > { %p41_p1 = scmp.eq.s32.totalorder %s40_s14, 0  ;;  %p54_p2 = scmp.eq.s32.totalorder %s369_s10, 1 }
   0x8   : > { %p59_p3 = scmp.ne.s32.totalorder %s326_s7, %s322_s6  ;;  %p60_p4 = scmp.eq.s32.totalorder %s184_s11, 1 }
   0x9   : > { %s384_s15 = scalar_select %p41_p1, %s330_s8, %s43_s13  }
   0xa   : > { %p386_p5 = por %p54_p2, %p53_p0  ;;  %p390_p6 = por %p60_p4, %p59_p3 }
   0xb   : > { %p185_p7 = scmp.ge.s32.totalorder %s334_s9, 1  ;;  %p67_p8 = scmp.lt.s32.totalorder %s334_s9, 3 }
   0xc   : > { %s451_s17 = scalar_select %p390_p6, 1, 0 }
   0xd   : > { %p208_p9 = scmp.eq.s32.totalorder %s369_s10, 0  ;;  %p397_p10 = pnand %p185_p7, %p67_p8 }
   0xe   : > { %s336_s19 = smov [#allocation2]  }
   0xf   : > { %s80_s20 = sshll.u32 %s336_s19, 4  ;;  %p200_p11 = pneg %p397_p10  ;;  %s81_s20 = int_to_ptr.vmem [resolvable:$true] %s80_s20 }
  0x10   : > { %s255_s21 = scalar_lea.vmem %s81_s20, 128  ;;  %p263_p3 = scmp.lt.s32.totalorder %s81_s20, %s81_s20 }
  0x11   : > { %p201_p12 = pnand %p208_p9, %p200_p11  ;;  %p256_p0 = scmp.ne.s32.totalorder %s81_s20, %s255_s21 }
  0x12   : > { %p264_p4 = scmp.lt.s32.totalorder %s255_s21, %s255_s21 }
  0x13   : > { %p246_p13 = pneg %p201_p12 }
  0x14   : > { %p265_p6 = por %p264_p4, %p263_p3 }
  0x15   : > { %p258_p1 = pnand %p256_p0, %p246_p13 }
  0x17   : > { %p259_p2 = pneg %p258_p1 }
  0x19   : > { %p266_p7 = pnand %p265_p6, %p259_p2 }
  0x1b   : > { %269 = shalt.err (!%p266_p7)
}
  0x1c   : > { %203 = dma.hbm_to_vmem [thread:$0]  (!%p201_p12), %s448_s0, 128, %s81_s20, [#allocation3]  }
  0x1d   : > { %93 = sbr.rel (%p397_p10) target bundleno = 60 (0x3c), region = 24 }
  0x22   : > { %313 = dma.done.wait (%p208_p9), [#allocation3], 128  }
  0x23   : > { %315 = vsyncadd (%p208_p9), [#allocation3], 4294967168  ;;  %s105_s24 = sand.u32 1, %s326_s7   ;;  %s191_s28 = sshll.u32 %s369_s10, 7  ;;  %v108_v0 = vld [vmem:[#allocation2] sm:$0xff] }
  0x24   : > { %s189_s25 = sshll.u32 %s105_s24, 3  ;;  %v109_v1 = vadd.f32 1.0, %v108_v0  ;;  %s123_s2 = scalar_lea.hbm %s449_s1, %s191_s28 }
  0x25   : > { %s107_s26 = scalar_lea.vmem [#allocation5], %s189_s25  ;;  %s112_s3 = scalar_lea.sflag [#allocation4], %s105_s24 }
  0x26   : > { %s125_s27 = sshll.u32 %s107_s26, 4  ;;  %110 = vst [vmem:[%s107_s26] sm:$0xff] %v109_v1  ;;  %s337_s5 = smov [#allocation5]   ;;  %s126_s27 = int_to_ptr.vmem [resolvable:$true] %s125_s27 }
  0x27   : > { %s270_s4 = scalar_lea.vmem %s126_s27, 128  ;;  %s274_s11 = sshll.u32 %s337_s5, 4  ;;  %s275_s11 = int_to_ptr.vmem [resolvable:$false] %s274_s11 }
  0x28   : > { %p271_p6 = scmp.ne.s32.totalorder %s126_s27, %s270_s4  ;;  %s276_s13 = scalar_lea.vmem %s275_s11, 256 }
  0x29   : > { %p277_p10 = scmp.lt.s32.totalorder %s126_s27, %s275_s11  ;;  %p278_p11 = scmp.lt.s32.totalorder %s276_s13, %s270_s4 }
  0x2a   : > { %p272_p8 = pnand %p271_p6, %p386_p5 }
  0x2b   : > { %p279_p12 = por %p278_p11, %p277_p10 }
  0x2c   : > { %p273_p9 = pneg %p272_p8 }
  0x2e   : > { %p280_p13 = pnand %p279_p12, %p273_p9 }
  0x30   : > { %283 = shalt.err (!%p280_p13)
}
  0x31   : > { %s284_s10 = scalar_lea.hbm %s123_s2, 128  ;;  %s288_s19 = scalar_lea.hbm %s449_s1, 256 }
  0x32   : > { %p285_p0 = scmp.ne.s32.totalorder %s123_s2, %s284_s10  ;;  %p289_p3 = scmp.lt.s32.totalorder %s123_s2, %s449_s1 }
  0x33   : > { %p290_p4 = scmp.lt.s32.totalorder %s288_s19, %s284_s10 }
  0x34   : > { %p286_p1 = pnand %p285_p0, %p386_p5 }
  0x35   : > { %p291_p7 = por %p290_p4, %p289_p3 }
  0x36   : > { %p287_p2 = pneg %p286_p1 }
  0x38   : > { %p292_p6 = pnand %p291_p7, %p287_p2 }
  0x3a   : > { %295 = shalt.err (!%p292_p6)
}
  0x3b   : > { %198 = dma.vmem_to_hbm [thread:$0]  (%p386_p5), %s126_s27, 128, %s123_s2, %s112_s3  }
  0x3c PF: > { %p210_p8 = scmp.ge.s32.totalorder %s334_s9, 2  ;;  %s137_s22 = sand.u32 1, %s322_s6  }
  0x3d   : > { %p453_p9 = scmp.ne.s32.totalorder %s451_s17, 0  ;;  %s138_s23 = scalar_lea.sflag [#allocation4], %s137_s22 }
  0x3f   : > { %p205_p10 = pnand %p210_p8, %p453_p9 }
  0x41   : > { %p206_p11 = pneg %p205_p10 }
  0x43   : > { %317 = dma.done.wait (%p206_p11), %s138_s23, 128  }
  0x44   : > { %319 = vsyncadd (%p206_p11), %s138_s23, 4294967168  ;;  %p12_p12 = scmp.ge.s32.totalorder %s373_s12, 4   ;;  %s454_s6 = smov %s326_s7 }
  0x45   : > { %s455_s7 = smov %s330_s8  ;;  %s456_s8 = smov %s384_s15 }
  0x46   : > { %s457_s9 = smov %s373_s12  ;;  %14 = sbr.rel (!%p12_p12) target bundleno = 4 (0x4), region = 61 }
  0x4b   :  { %143 = vsyncpa [#allocation3], 1 }
  0x4c   :  { %145 = vsyncpa [#allocation3 + $0x1], 1 }
  0x4d   :  { %146 = vsyncpa [#allocation4], 1 }
  0x4e   :  { %148 = vsyncpa [#allocation4 + $0x1], 1 }

// kernel: qwen2_code2wav_forward.21
= control target key start
LH: loop header
LB: loop body
LE: loop exit
PB: predicated region body
PF: predicated region fallthrough
CT: control target
= control target key end

     0   :  { %s287_s1 = inlined_call_operand.vmem [shape: bf16[128,128], index: 1, kind: input, shape index: {}]   ;;  %s288_s0 = inlined_call_operand.vmem [shape: bf16[32,128], index: 0, kind: input, shape index: {}]   ;;  %s289_s2 = inlined_call_operand.vmem [shape: bf16[32,128], index: 2, kind: input, shape index: {}]   ;;  %s290_s3 = inlined_call_operand.vmem [shape: f32[32,128], index: 3, kind: output, shape index: {}]  }
   0x1   :  { %v209_v0 = vld [vmem:[%s287_s1 + $0x38] sm:$0xff]   ;;  %v210_v1 = vld [vmem:[%s287_s1 + $0x30] sm:$0xff]   ;;  %v211_v2 = vld [vmem:[%s287_s1 + $0x28] sm:$0xff]  }
   0x2   :  { %189 = vmatprep.subr.bf16.mxu0 %v209_v0  ;;  %v212_v3 = vld [vmem:[%s287_s1 + $0x20] sm:$0xff]   ;;  %v213_v5 = vld [vmem:[%s287_s1 + $0x18] sm:$0xff]   ;;  %v214_v6 = vld [vmem:[%s287_s1 + $0x10] sm:$0xff]  }
   0x3   :  { %190 = vmatpush3.bf16.msra.mxu0 %v209_v0  ;;  %v217_v4 = vld [vmem:[%s288_s0] sm:$0xff]   ;;  %v215_v7 = vld [vmem:[%s287_s1 + $0x8] sm:$0xff]  }
   0x4   :  { %191 = vmatprep.subr.bf16.mxu0 %v210_v1  ;;  %205 = vmatprep.mubr.bf16.mxu0 %v217_v4  ;;  %v216_v8 = vld [vmem:[%s287_s1] sm:$0xff]   ;;  %v218_v9 = vld [vmem:[%s288_s0 + $0x8] sm:$0xff]  }
   0x5   :  { %v178_v10 = vld [vmem:[%s289_s2 + $0x8] sm:$0xff]   ;;  %v171_v11 = vld [vmem:[%s289_s2] sm:$0xff]  }
   0x6   :  { %v176_v12 = vunpack.c.l.bf16 %v178_v10  ;;  %v172_v13 = vunpack.c.l.bf16 %v171_v11  ;;  %v177_v16 = vunpack.c.h.bf16 %v178_v10  ;;  %v173_v19 = vunpack.c.h.bf16 %v171_v11 }
   0x7   :  { %192 = vmatpush3.bf16.msra.mxu0 %v210_v1 }
   0x8   :  { %193 = vmatprep.subr.bf16.mxu0 %v211_v2 }
   0xb   :  { %194 = vmatpush3.bf16.msra.mxu0 %v211_v2 }
   0xc   :  { %195 = vmatprep.subr.bf16.mxu0 %v212_v3 }
   0xf   :  { %196 = vmatpush3.bf16.msra.mxu0 %v212_v3 }
  0x10   :  { %197 = vmatprep.subr.bf16.mxu0 %v213_v5 }
  0x13   :  { %198 = vmatpush3.bf16.msra.mxu0 %v213_v5 }
  0x14   :  { %199 = vmatprep.subr.bf16.mxu0 %v214_v6 }
  0x17   :  { %200 = vmatpush3.bf16.msra.mxu0 %v214_v6 }
  0x18   :  { %201 = vmatprep.subr.bf16.mxu0 %v215_v7 }
  0x1b   :  { %202 = vmatpush3.bf16.msra.mxu0 %v215_v7 }
  0x1c   :  { %203 = vmatprep.subr.bf16.mxu0 %v216_v8 }
  0x1f   :  { %204 = vmatpush3.bf16.msra.mxu0 %v216_v8 }
  0x22   :  { %206 = vmatmul.mubr.bf16.vlgmr.msra.gmra.mxu0 %v218_v9 }
  0xe2   :  { %v207_v14 = vpop.f32.mrf.mxu0 }
  0xe3   :  { %v146_v15 = vadd.f32 %v207_v14, %v176_v12 }
  0xe4   :  { %v137_v17 = vpop.f32.mrf.mxu0 }
  0xe5   :  { %154 = vst [vmem:[%s290_s3 + $0x10] sm:$0xff] %v146_v15  ;;  %v138_v18 = vadd.f32 %v172_v13, %v137_v17 }
  0xe6   :  { %v208_v20 = vpop.f32.mrf.mxu0 }
  0xe7   :  { %152 = vst [vmem:[%s290_s3] sm:$0xff] %v138_v18  ;;  %v149_v21 = vadd.f32 %v208_v20, %v177_v16 }
  0xe8   :  { %v140_v22 = vpop.f32.mrf.mxu0 }
  0xe9   :  { %155 = vst [vmem:[%s290_s3 + $0x18] sm:$0xff] %v149_v21  ;;  %v141_v23 = vadd.f32 %v173_v19, %v140_v22 }
  0xeb   :  { %153 = vst [vmem:[%s290_s3 + $0x8] sm:$0xff] %v141_v23 }

// kernel: qwen2_code2wav_forward.20
= control target key start
LH: loop header
LB: loop body
LE: loop exit
PB: predicated region body
PF: predicated region fallthrough
CT: control target
= control target key end

     0   :  { %vm225_vm0 = vcmask 523264   ;;  %s611_s1 = inlined_call_operand.vmem [shape: bf16[320,128], index: 1, kind: input, shape index: {}]   ;;  %s612_s0 = inlined_call_operand.vmem [shape: bf16[32,320], index: 0, kind: input, shape index: {}]   ;;  %s613_s2 = inlined_call_operand.vmem [shape: f32[1,128], index: 2, kind: input, shape index: {}]   ;;  %s614_s3 = inlined_call_operand.vmem [shape: bf16[32,128], index: 3, kind: output, shape index: {}]  }
   0x1   :  { %v474_v0 = vld [vmem:[%s611_s1 + $0x78] sm:$0xff]   ;;  %v476_v2 = vld [vmem:[%s611_s1 + $0x70] sm:$0xff]   ;;  %v478_v4 = vld [vmem:[%s611_s1 + $0x68] sm:$0xff]  }
   0x2   :  { %v475_v1 = vld [vmem:[%s611_s1 + $0x38] sm:$0xff]   ;;  %428 = vmatprep.subr.bf16.mxu0 %v474_v0  ;;  %v477_v3 = vld [vmem:[%s611_s1 + $0x30] sm:$0xff]   ;;  %v479_v5 = vld [vmem:[%s611_s1 + $0x28] sm:$0xff]  }
   0x3   :  { %429 = vmatpush3.bf16.msra.mxu0 %v475_v1  ;;  %v480_v6 = vld [vmem:[%s611_s1 + $0x60] sm:$0xff]   ;;  %v484_v7 = vld [vmem:[%s611_s1 + $0x98] sm:$0xff]   ;;  %v487_v10 = vld [vmem:[%s611_s1 + $0x90] sm:$0xff]  }
   0x4   :  { %430 = vmatprep.subr.bf16.mxu0 %v476_v2  ;;  %v481_v8 = vld [vmem:[%s611_s1 + $0x20] sm:$0xff]   ;;  %v482_v9 = vld [vmem:[%s611_s1 + $0x58] sm:$0xff]   ;;  %462 = vmatprep.subr.bf16.mxu1 %v484_v7  ;;  %v485_v12 = vld [vmem:[%s611_s1 + $0x50] sm:$0xff]  }
   0x5   :  { %463 = vmatpush3.bf16.msra.mxu1 %v484_v7  ;;  %v483_v11 = vld [vmem:[%s611_s1 + $0x18] sm:$0xff]   ;;  %v490_v13 = vld [vmem:[%s611_s1 + $0x88] sm:$0xff]   ;;  %v486_v14 = vld [vmem:[%s611_s1 + $0x10] sm:$0xff]  }
   0x6   :  { %464 = vmatprep.subr.bf16.mxu1 %v487_v10  ;;  %v493_v15 = vld [vmem:[%s611_s1 + $0x80] sm:$0xff]   ;;  %v488_v16 = vld [vmem:[%s611_s1 + $0x48] sm:$0xff]  }
   0x7   :  { %431 = vmatpush3.bf16.msra.mxu0 %v477_v3  ;;  %v496_v17 = vld [vmem:[%s612_s0 + $0x4] ss:$12 sps:$4 sm:$0xff]   ;;  %v497_v18 = vld [vmem:[%s612_s0 + $0x8] ss:$12 sps:$4 sm:$0xff]   ;;  %v498_v21 = vld [vmem:[%s612_s0 + $0x20] ss:$12 sps:$4 sm:$0xff]  }
   0x8   :  { %432 = vmatprep.subr.bf16.mxu0 %v478_v4  ;;  %v489_v19 = vld [vmem:[%s611_s1 + $0x8] sm:$0xff]   ;;  %264 = vmatprep.mubr.bf16.mxu0 %v496_v17  ;;  %v491_v20 = vld [vmem:[%s611_s1 + $0x40] sm:$0xff]  }
   0x9   :  { %465 = vmatpush3.bf16.msra.mxu1 %v487_v10  ;;  %470 = vmatprep.mubr.msk.bf16.mxu1 %vm225_vm0, %v497_v18  ;;  %v492_v22 = vld [vmem:[%s611_s1] sm:$0xff]   ;;  %v499_v24 = vld [vmem:[%s612_s0 + $0x1c] ss:$12 sps:$4 sm:$0xff]  }
   0xa   :  { %466 = vmatprep.subr.bf16.mxu1 %v490_v13  ;;  %v494_v23 = vld [vmem:[%s612_s0] ss:$12 sps:$4 sm:$0xff]   ;;  %v501_v25 = vld [vmem:[%s612_s0 + $0x18] ss:$12 sps:$4 sm:$0xff]  }
   0xb   :  { %433 = vmatpush3.bf16.msra.mxu0 %v479_v5  ;;  %v408_v37 = vld [vmem:[%s613_s2] ss:$0 sm:$0xff] }
   0xc   :  { %434 = vmatprep.subr.bf16.mxu0 %v480_v6 }
   0xd   :  { %467 = vmatpush3.bf16.msra.mxu1 %v490_v13 }
   0xe   :  { %468 = vmatprep.subr.bf16.mxu1 %v493_v15 }
   0xf   :  { %435 = vmatpush3.bf16.msra.mxu0 %v481_v8 }
  0x10   :  { %436 = vmatprep.subr.bf16.mxu0 %v482_v9 }
  0x11   :  { %469 = vmatpush3.bf16.msra.mxu1 %v493_v15 }
  0x13   :  { %437 = vmatpush3.bf16.msra.mxu0 %v483_v11 }
  0x14   :  { %438 = vmatprep.subr.bf16.mxu0 %v485_v12  ;;  %471 = vmatmul.mubr.msk.bf16.vlgmr.msra.gmra.mxu1 %vm225_vm0, %v498_v21 }
  0x17   :  { %439 = vmatpush3.bf16.msra.mxu0 %v486_v14 }
  0x18   :  { %440 = vmatprep.subr.bf16.mxu0 %v488_v16 }
  0x1b   :  { %441 = vmatpush3.bf16.msra.mxu0 %v489_v19 }
  0x1c   :  { %442 = vmatprep.subr.bf16.mxu0 %v491_v20 }
  0x1f   :  { %443 = vmatpush3.bf16.msra.mxu0 %v492_v22 }
  0x22   :  { %265 = vmatmul.mubr.bf16.vlgmr.msra.gmra.mxu0 %v494_v23 }
  0x23   :  { %272 = vmatprep.mubr.bf16.mxu0 %v499_v24 }
  0x2a   :  { %273 = vmatmul.mubr.bf16.gmra.mxu0 %v501_v25 }
  0xd4   :  { %v472_v26 = vpop.f32.mrf.mxu1 }
  0xd6   :  { %v315_v27 = vpop.f32.mrf.mxu1 }
  0xd8   :  { %v473_v30 = vpop.f32.mrf.mxu1 }
  0xda   :  { %v318_v34 = vpop.f32.mrf.mxu1 }
  0xe2   :  { %v444_v28 = vpop.f32.mrf.mxu0 }
  0xe4   :  { %v445_v29 = vpop.f32.mrf.mxu0 }
  0xe5   :  { %v446_v31 = vadd.f32 %v445_v29, %v444_v28 }
  0xe6   :  { %v447_v32 = vpop.f32.mrf.mxu0 }
  0xe7   :  { %v316_v35 = vadd.f32 %v446_v31, %v315_v27 }
  0xe8   :  { %v448_v33 = vpop.f32.mrf.mxu0 }
  0xe9   :  { %v449_v36 = vadd.f32 %v448_v33, %v447_v32  ;;  %v352_v41 = vadd.f32 %v408_v37, %v316_v35 }
  0xea   :  { %v450_v38 = vpop.f32.mrf.mxu0 }
  0xeb   :  { %v319_v39 = vadd.f32 %v449_v36, %v318_v34 }
  0xec   :  { %v451_v40 = vpop.f32.mrf.mxu0 }
  0xed   :  { %v353_v42 = vadd.f32 %v408_v37, %v319_v39  ;;  %v452_v43 = vadd.f32 %v451_v40, %v450_v38 }
  0xee   :  { %v453_v44 = vpop.f32.mrf.mxu0 }
  0xef   :  { %v420_v45 = vpack.c.bf16 %v353_v42, %v352_v41  ;;  %v324_v47 = vadd.f32 %v472_v26, %v452_v43 }
  0xf0   :  { %v454_v46 = vpop.f32.mrf.mxu0 }
  0xf1   :  { %421 = vst [vmem:[%s614_s3] sm:$0xff] %v420_v45   ;;  %v455_v48 = vadd.f32 %v454_v46, %v453_v44  ;;  %v354_v50 = vadd.f32 %v408_v37, %v324_v47 }
  0xf3   :  { %v327_v49 = vadd.f32 %v473_v30, %v455_v48 }
  0xf5   :  { %v355_v51 = vadd.f32 %v408_v37, %v327_v49 }
  0xf7   :  { %v425_v52 = vpack.c.bf16 %v355_v51, %v354_v50 }
  0xf9   :  { %427 = vst [vmem:[%s614_s3 + $0x8] sm:$0xff] %v425_v52  }

// kernel: qwen2_code2wav_forward.23
= control target key start
LH: loop header
LB: loop body
LE: loop exit
PB: predicated region body
PF: predicated region fallthrough
CT: control target
= control target key end

     0   :  { %v706_v30 = vmov 0   ;;  %v111_v49 = vlaneseq  ;;  %s1002_s0 = inlined_call_operand.vmem [shape: f32[32,128], index: 0, kind: input, shape index: {}]   ;;  %s1003_s6 = inlined_call_operand.vmem [shape: bf16[128,256], index: 6, kind: input, shape index: {}]   ;;  %s1004_s4 = inlined_call_operand.vmem [shape: f32[1,128], index: 4, kind: input, shape index: {}]   ;;  %s1005_s1 = inlined_call_operand.vmem [shape: f32[1,128], index: 1, kind: input, shape index: {}]   ;;  %s1006_s2 = inlined_call_operand.vmem [shape: f32[1,128], index: 2, kind: input, shape index: {}]   ;;  %s1007_s3 = inlined_call_operand.vmem [shape: f32[1,128], index: 3, kind: input, shape index: {}]   ;;  %s1008_s8 = inlined_call_operand.vmem [shape: bf16[256,128], index: 8, kind: input, shape index: {}]   ;;  %s1009_s7 = inlined_call_operand.vmem [shape: f32[1,256], index: 7, kind: input, shape index: {}]   ;;  %s1010_s9 = inlined_call_operand.vmem [shape: f32[1,128], index: 9, kind: input, shape index: {}]   ;;  %s1011_s5 = inlined_call_operand.vmem [shape: f32[1,128], index: 5, kind: input, shape index: {}]   ;;  %s1012_s10 = inlined_call_operand.vmem [shape: f32[32,128], index: 10, kind: output, shape index: {}]  }
   0x1   :  { %v765_v0 = vld [vmem:[%s1002_s0] sm:$0xff]  ;;  %v770_v1 = vld [vmem:[%s1002_s0 + $0x10] sm:$0xff]  ;;  %v777_v2 = vld [vmem:[%s1002_s0 + $0x8] sm:$0xff]  ;;  %272 = vmatprep.mubr.bf16.mxu0 %v706_v30 }
   0x2   :  { %44 = vadd.xlane.f32.xlu0 %v765_v0  ;;  %48 = vadd.xlane.f32.xlu1 %v770_v1  ;;  %v782_v3 = vld [vmem:[%s1002_s0 + $0x18] sm:$0xff]  ;;  %v645_v22 = vld [vmem:[%s1003_s6 + $0x64] ss:$8 sps:$4 sm:$0xff]   ;;  %v647_v23 = vld [vmem:[%s1003_s6 + $0x60] ss:$8 sps:$4 sm:$0xff]   ;;  %v855_v50 = vshrl.u32 %v111_v49, 7 }
   0x3   :  { %v642_v20 = vld [vmem:[%s1003_s6 + $0x74] ss:$8 sps:$4 sm:$0xff]   ;;  %v644_v21 = vld [vmem:[%s1003_s6 + $0x70] ss:$8 sps:$4 sm:$0xff]   ;;  %v651_v26 = vld [vmem:[%s1003_s6 + $0x44] ss:$8 sps:$4 sm:$0xff]  }
   0x4   :  { %240 = vmatprep.subr.bf16.mxu0 %v642_v20  ;;  %v648_v24 = vld [vmem:[%s1003_s6 + $0x54] ss:$8 sps:$4 sm:$0xff]   ;;  %v650_v25 = vld [vmem:[%s1003_s6 + $0x50] ss:$8 sps:$4 sm:$0xff]   ;;  %v653_v27 = vld [vmem:[%s1003_s6 + $0x40] ss:$8 sps:$4 sm:$0xff]  }
   0x5   :  { %241 = vmatpush1.bf16.msra.mxu0 %v644_v21  ;;  %v654_v28 = vld [vmem:[%s1003_s6 + $0x34] ss:$8 sps:$4 sm:$0xff]   ;;  %v656_v29 = vld [vmem:[%s1003_s6 + $0x30] ss:$8 sps:$4 sm:$0xff]   ;;  %v657_v31 = vld [vmem:[%s1003_s6 + $0x24] ss:$8 sps:$4 sm:$0xff]  }
   0x6   :  { %46 = vadd.xlane.f32.xlu0 %v777_v2  ;;  %50 = vadd.xlane.f32.xlu1 %v782_v3  ;;  %v659_v32 = vld [vmem:[%s1003_s6 + $0x20] ss:$8 sps:$4 sm:$0xff]   ;;  %v660_v33 = vld [vmem:[%s1003_s6 + $0x14] ss:$8 sps:$4 sm:$0xff]   ;;  %v662_v34 = vld [vmem:[%s1003_s6 + $0x10] ss:$8 sps:$4 sm:$0xff]  }
   0x7   :  { %242 = vmatprep.subr.bf16.mxu0 %v645_v22  ;;  %v663_v35 = vld [vmem:[%s1003_s6 + $0x4] ss:$8 sps:$4 sm:$0xff]   ;;  %v665_v36 = vld [vmem:[%s1003_s6] ss:$8 sps:$4 sm:$0xff]   ;;  %v113_v56 = vsub.s32 0, %v855_v50 }
   0x8   :  { %v43_v51 = vld [vmem:[%s1004_s4] sm:$0x1] }
   0x9   :  { %243 = vmatpush1.bf16.msra.mxu0 %v647_v23  ;;  %v576_v53 = vld [vmem:[%s1005_s1] ss:$0 sm:$0xff]  ;;  %v109_v55 = vadd.f32 1.0, %v43_v51 }
   0xa   :  { %244 = vmatprep.subr.bf16.mxu0 %v648_v24  ;;  %v577_v57 = vld [vmem:[%s1006_s2] ss:$0 sm:$0xff]  ;;  %v666_v24 = vld [vmem:[%s1008_s8 + $0x78] sm:$0xff]  }
   0xb   :  { %v114_v63 = vrot.slane %v109_v55, %v113_v56  ;;  %613 = vmatprep.subr.bf16.mxu1 %v666_v24 }
   0xd   :  { %245 = vmatpush1.bf16.msra.mxu0 %v650_v25  ;;  %v667_v25 = vld [vmem:[%s1008_s8 + $0x38] sm:$0xff]  }
   0xe   :  { %246 = vmatprep.subr.bf16.mxu0 %v651_v26  ;;  %614 = vmatpush3.bf16.msra.mxu1 %v667_v25  ;;  %v668_v26 = vld [vmem:[%s1008_s8 + $0x70] sm:$0xff]  }
   0xf   :  { %615 = vmatprep.subr.bf16.mxu1 %v668_v26 }
  0x11   :  { %247 = vmatpush1.bf16.msra.mxu0 %v653_v27  ;;  %v669_v27 = vld [vmem:[%s1008_s8 + $0x30] sm:$0xff]  }
  0x12   :  { %248 = vmatprep.subr.bf16.mxu0 %v654_v28  ;;  %616 = vmatpush3.bf16.msra.mxu1 %v669_v27  ;;  %v670_v28 = vld [vmem:[%s1008_s8 + $0x68] sm:$0xff]  }
  0x13   :  { %617 = vmatprep.subr.bf16.mxu1 %v670_v28 }
  0x15   :  { %249 = vmatpush1.bf16.msra.mxu0 %v656_v29  ;;  %v671_v29 = vld [vmem:[%s1008_s8 + $0x28] sm:$0xff]  }
  0x16   :  { %250 = vmatprep.subr.bf16.mxu0 %v657_v31  ;;  %618 = vmatpush3.bf16.msra.mxu1 %v671_v29  ;;  %v673_v31 = vld [vmem:[%s1008_s8 + $0x20] sm:$0xff]  }
  0x19   :  { %251 = vmatpush1.bf16.msra.mxu0 %v659_v32  ;;  %v674_v32 = vld [vmem:[%s1008_s8 + $0x58] sm:$0xff]  }
  0x1a   :  { %252 = vmatprep.subr.bf16.mxu0 %v660_v33  ;;  %v675_v33 = vld [vmem:[%s1008_s8 + $0x18] sm:$0xff]  }
  0x1d   :  { %253 = vmatpush1.bf16.msra.mxu0 %v662_v34  ;;  %v676_v34 = vld [vmem:[%s1008_s8 + $0x50] sm:$0xff]  }
  0x1e   :  { %254 = vmatprep.subr.bf16.mxu0 %v663_v35  ;;  %v677_v35 = vld [vmem:[%s1008_s8 + $0x10] sm:$0xff]  }
  0x21   :  { %255 = vmatpush1.bf16.msra.mxu0 %v665_v36  ;;  %v678_v36 = vld [vmem:[%s1008_s8 + $0x48] sm:$0xff]  }
  0x8b   :  { %v45_v4 = vpop.xlane.xlu0 %44  ;;  %v49_v5 = vpop.xlane.xlu1 %48 }
  0x8c   :  { %v53_v6 = vmul.f32 0.0078125, %v45_v4  ;;  %v55_v7 = vmul.f32 0.0078125, %v49_v5 }
  0x8e   :  { %v787_v8 = vsub.f32 %v765_v0, %v53_v6  ;;  %v790_v9 = vsub.f32 %v770_v1, %v55_v7 }
  0x8f   :  { %v47_v10 = vpop.xlane.xlu0 %46  ;;  %v51_v11 = vpop.xlane.xlu1 %50 }
  0x90   :  { %v54_v12 = vmul.f32 0.0078125, %v47_v10  ;;  %v61_v13 = vmul.f32 %v787_v8, %v787_v8  ;;  %v56_v14 = vmul.f32 0.0078125, %v51_v11  ;;  %v63_v17 = vmul.f32 %v790_v9, %v790_v9 }
  0x92   :  { %v795_v15 = vsub.f32 %v777_v2, %v54_v12  ;;  %65 = vadd.xlane.f32.xlu0 %v61_v13  ;;  %v798_v16 = vsub.f32 %v782_v3, %v56_v14  ;;  %v578_v12 = vld [vmem:[%s1007_s3] ss:$0 sm:$0xff] }
  0x94   :  { %v62_v18 = vmul.f32 %v795_v15, %v795_v15  ;;  %v64_v19 = vmul.f32 %v798_v16, %v798_v16 }
  0x96   :  { %69 = vadd.xlane.f32.xlu0 %v63_v17  ;;  %67 = vadd.xlane.f32.xlu1 %v62_v18 }
  0x9a   :  { %71 = vadd.xlane.f32.xlu1 %v64_v19 }
 0x11b   :  { %v66_v37 = vpop.xlane.xlu0 %65 }
 0x11c   :  { %v73_v38 = vmul.f32 0.0078125, %v66_v37  ;;  %v679_v37 = vld [vmem:[%s1008_s8 + $0x8] sm:$0xff]  }
 0x11e   :  { %v77_v39 = vadd.f32 1e-06, %v73_v38  ;;  %v680_v38 = vld [vmem:[%s1008_s8 + $0x40] sm:$0xff]  }
 0x11f   :  { %v68_v40 = vpop.xlane.xlu1 %67  ;;  %v70_v41 = vpop.xlane.xlu0 %69 }
 0x120   :  { %682 = vrsqrt.f32 %v77_v39  ;;  %v74_v42 = vmul.f32 0.0078125, %v68_v40  ;;  %v75_v43 = vmul.f32 0.0078125, %v70_v41  ;;  %v681_v39 = vld [vmem:[%s1008_s8] sm:$0xff]   ;;  %v156_v41 = vsub.s32 1, %v855_v50 }
 0x121   :  { %v148_v40 = vld [vmem:[%s1009_s7] sm:$0x3] }
 0x122   :  { %v78_v44 = vadd.f32 1e-06, %v74_v42  ;;  %v79_v45 = vadd.f32 1e-06, %v75_v43  ;;  %v153_v42 = vrot.slane %v148_v40, %v113_v56  ;;  %v157_v43 = vrot.slane %v148_v40, %v156_v41 }
 0x123   :  { %v72_v46 = vpop.xlane.xlu1 %71 }
 0x124   :  { %684 = vrsqrt.f32 %v78_v44  ;;  %v76_v47 = vmul.f32 0.0078125, %v72_v46 }
 0x125   :  { %686 = vrsqrt.f32 %v79_v45 }
 0x126   :  { %v80_v48 = vadd.f32 1e-06, %v76_v47 }
 0x128   :  { %688 = vrsqrt.f32 %v80_v48 }
 0x12d   :  { %v683_v52 = vpop.eup %682 }
 0x12e   :  { %v85_v54 = vmul.f32 %v683_v52, %v787_v8 }
 0x130   :  { %v95_v58 = vmul.f32 %v576_v53, %v85_v54 }
 0x131   :  { %v685_v59 = vpop.eup %684 }
 0x132   :  { %v687_v60 = vpop.eup %686  ;;  %v86_v61 = vmul.f32 %v685_v59, %v795_v15  ;;  %v105_v62 = vadd.f32 %v577_v57, %v95_v58 }
 0x133   :  { %v87_v4 = vmul.f32 %v687_v60, %v790_v9 }
 0x134   :  { %v96_v5 = vmul.f32 %v576_v53, %v86_v61  ;;  %v116_v8 = vmul.f32 %v114_v63, %v105_v62 }
 0x135   :  { %v689_v6 = vpop.eup %688  ;;  %v97_v11 = vmul.f32 %v576_v53, %v87_v4 }
 0x136   :  { %v106_v7 = vadd.f32 %v577_v57, %v96_v5  ;;  %v88_v10 = vmul.f32 %v689_v6, %v798_v16  ;;  %v126_v15 = vadd.f32 %v578_v12, %v116_v8 }
 0x137   :  { %v107_v18 = vadd.f32 %v577_v57, %v97_v11 }
 0x138   :  { %v117_v13 = vmul.f32 %v114_v63, %v106_v7  ;;  %v98_v14 = vmul.f32 %v576_v53, %v88_v10 }
 0x139   :  { %v118_v9 = vmul.f32 %v114_v63, %v107_v18 }
 0x13a   :  { %v127_v17 = vadd.f32 %v578_v12, %v117_v13  ;;  %v108_v19 = vadd.f32 %v577_v57, %v98_v14 }
 0x13b   :  { %v128_v23 = vadd.f32 %v578_v12, %v118_v9 }
 0x13c   :  { %v130_v20 = vpack.c.bf16 %v127_v17, %v126_v15  ;;  %v119_v21 = vmul.f32 %v114_v63, %v108_v19 }
 0x13e   :  { %273 = vmatmul.mubr.bf16.vlgmr.msra.gmra.mxu0 %v130_v20  ;;  %v129_v22 = vadd.f32 %v578_v12, %v119_v21 }
 0x13f   :  { %282 = vmatprep.mubr.bf16.mxu0 %v706_v30  ;;  %v672_v30 = vld [vmem:[%s1008_s8 + $0x60] sm:$0xff]  }
 0x140   :  { %v131_v16 = vpack.c.bf16 %v129_v22, %v128_v23  ;;  %619 = vmatprep.subr.bf16.mxu1 %v672_v30 }
 0x141   :  { %620 = vmatpush3.bf16.msra.mxu1 %v673_v31 }
 0x142   :  { %621 = vmatprep.subr.bf16.mxu1 %v674_v32 }
 0x145   :  { %622 = vmatpush3.bf16.msra.mxu1 %v675_v33 }
 0x146   :  { %283 = vmatmul.mubr.bf16.gmra.mxu0 %v131_v16  ;;  %623 = vmatprep.subr.bf16.mxu1 %v676_v34 }
 0x149   :  { %624 = vmatpush3.bf16.msra.mxu1 %v677_v35 }
 0x14a   :  { %625 = vmatprep.subr.bf16.mxu1 %v678_v36 }
 0x14d   :  { %626 = vmatpush3.bf16.msra.mxu1 %v679_v37 }
 0x14e   :  { %627 = vmatprep.subr.bf16.mxu1 %v680_v38 }
 0x151   :  { %628 = vmatpush3.bf16.msra.mxu1 %v681_v39 }
 0x1fe   :  { %v274_v44 = vpop.f32.mrf.mxu0 }
 0x1ff   :  { %v931_v45 = vadd.f32 %v274_v44, %v153_v42 }
 0x200   :  { %v276_v46 = vpop.f32.mrf.mxu0 }
 0x201   :  { %v293_v47 = vmul.f32 %v931_v45, %v931_v45  ;;  %v935_v48 = vadd.f32 %v276_v46, %v157_v43 }
 0x202   :  { %v278_v49 = vpop.f32.mrf.mxu0 }
 0x203   :  { %v301_v51 = vmul.f32 %v293_v47, %v931_v45  ;;  %v294_v52 = vmul.f32 %v935_v48, %v935_v48  ;;  %v940_v53 = vadd.f32 %v278_v49, %v153_v42 }
 0x204   :  { %v280_v50 = vpop.f32.mrf.mxu0 }
 0x205   :  { %v309_v54 = vmul.f32 0.044715, %v301_v51  ;;  %v302_v55 = vmul.f32 %v294_v52, %v935_v48  ;;  %v295_v56 = vmul.f32 %v940_v53, %v940_v53  ;;  %v945_v57 = vadd.f32 %v280_v50, %v157_v43 }
 0x206   :  { %v284_v58 = vpop.f32.mrf.mxu0 }
 0x207   :  { %v317_v59 = vadd.f32 %v309_v54, %v931_v45  ;;  %v310_v60 = vmul.f32 0.044715, %v302_v55  ;;  %v303_v61 = vmul.f32 %v295_v56, %v940_v53  ;;  %v296_v62 = vmul.f32 %v945_v57, %v945_v57 }
 0x208   :  { %v951_v63 = vadd.f32 %v284_v58, %v153_v42  ;;  %v286_v4 = vpop.f32.mrf.mxu0 }
 0x209   :  { %v325_v5 = vmul.f32 0.7978846, %v317_v59  ;;  %v318_v6 = vadd.f32 %v310_v60, %v935_v48  ;;  %v311_v7 = vmul.f32 0.044715, %v303_v61  ;;  %v304_v8 = vmul.f32 %v296_v62, %v945_v57 }
 0x20a   :  { %v297_v10 = vmul.f32 %v951_v63, %v951_v63  ;;  %v957_v11 = vadd.f32 %v286_v4, %v157_v43  ;;  %v288_v12 = vpop.f32.mrf.mxu0 }
 0x20b   :  { %v319_v13 = vadd.f32 %v311_v7, %v940_v53  ;;  %v312_v14 = vmul.f32 0.044715, %v304_v8  ;;  %v960_v15 = vadd.f32 %v288_v12, %v153_v42  ;;  %690 = vtanh.f32 %v325_v5 }
 0x20c   :  { %v305_v17 = vmul.f32 %v297_v10, %v951_v63  ;;  %v298_v18 = vmul.f32 %v957_v11, %v957_v11  ;;  %v290_v19 = vpop.f32.mrf.mxu0  ;;  %v326_v20 = vmul.f32 0.7978846, %v318_v6 }
 0x20d   :  { %v327_v21 = vmul.f32 0.7978846, %v319_v13  ;;  %v320_v9 = vadd.f32 %v312_v14, %v945_v57  ;;  %v299_v22 = vmul.f32 %v960_v15, %v960_v15  ;;  %v291_v23 = vadd.f32 %v290_v19, %v157_v43 }
 0x20e   :  { %v313_v16 = vmul.f32 0.044715, %v305_v17  ;;  %v306_v24 = vmul.f32 %v298_v18, %v957_v11  ;;  %692 = vtanh.f32 %v326_v20 }
 0x20f   :  { %694 = vtanh.f32 %v327_v21  ;;  %v307_v25 = vmul.f32 %v299_v22, %v960_v15  ;;  %v300_v26 = vmul.f32 %v291_v23, %v291_v23  ;;  %v328_v27 = vmul.f32 0.7978846, %v320_v9  ;;  %v595_v9 = vld [vmem:[%s1010_s9] ss:$0 sm:$0xff] }
 0x210   :  { %v321_v28 = vadd.f32 %v313_v16, %v951_v63  ;;  %v314_v29 = vmul.f32 0.044715, %v306_v24 }
 0x211   :  { %v315_v30 = vmul.f32 0.044715, %v307_v25  ;;  %v308_v31 = vmul.f32 %v300_v26, %v291_v23  ;;  %696 = vtanh.f32 %v328_v27 }
 0x212   :  { %v329_v32 = vmul.f32 0.7978846, %v321_v28  ;;  %v322_v33 = vadd.f32 %v314_v29, %v957_v11 }
 0x213   :  { %v323_v34 = vadd.f32 %v315_v30, %v960_v15  ;;  %v316_v35 = vmul.f32 0.044715, %v308_v31 }
 0x214   :  { %698 = vtanh.f32 %v329_v32  ;;  %v330_v36 = vmul.f32 0.7978846, %v322_v33 }
 0x215   :  { %v331_v37 = vmul.f32 0.7978846, %v323_v34  ;;  %v324_v38 = vadd.f32 %v316_v35, %v291_v23 }
 0x216   :  { %700 = vtanh.f32 %v330_v36 }
 0x217   :  { %702 = vtanh.f32 %v331_v37  ;;  %v332_v39 = vmul.f32 0.7978846, %v324_v38 }
 0x218   :  { %v691_v40 = vpop.eup %690 }
 0x219   :  { %704 = vtanh.f32 %v332_v39  ;;  %v341_v44 = vadd.f32 1.0, %v691_v40 }
 0x21b   :  { %v693_v41 = vpop.eup %692  ;;  %v349_v50 = vmul.f32 0.5, %v341_v44 }
 0x21c   :  { %v695_v42 = vpop.eup %694  ;;  %v342_v43 = vadd.f32 1.0, %v693_v41 }
 0x21d   :  { %v343_v46 = vadd.f32 1.0, %v695_v42  ;;  %v357_v62 = vmul.f32 %v349_v50, %v931_v45 }
 0x21e   :  { %v697_v47 = vpop.eup %696  ;;  %v350_v51 = vmul.f32 0.5, %v342_v43 }
 0x21f   :  { %v344_v49 = vadd.f32 1.0, %v697_v47  ;;  %v351_v52 = vmul.f32 0.5, %v343_v46 }
 0x220   :  { %v358_v59 = vmul.f32 %v350_v51, %v935_v48 }
 0x221   :  { %v699_v54 = vpop.eup %698  ;;  %v352_v55 = vmul.f32 0.5, %v344_v49  ;;  %v359_v56 = vmul.f32 %v351_v52, %v940_v53 }
 0x222   :  { %v345_v5 = vadd.f32 1.0, %v699_v54 }
 0x223   :  { %v701_v58 = vpop.eup %700  ;;  %v360_v60 = vmul.f32 %v352_v55, %v945_v57  ;;  %v365_v10 = vpack.c.bf16 %v359_v56, %v357_v62 }
 0x224   :  { %v703_v61 = vpop.eup %702  ;;  %v346_v4 = vadd.f32 1.0, %v701_v58  ;;  %v353_v53 = vmul.f32 0.5, %v345_v5 }
 0x225   :  { %v366_v6 = vpack.c.bf16 %v360_v60, %v358_v59  ;;  %v347_v7 = vadd.f32 1.0, %v703_v61 }
 0x226   :  { %v705_v8 = vpop.eup %704  ;;  %v354_v13 = vmul.f32 0.5, %v346_v4  ;;  %v361_v45 = vmul.f32 %v353_v53, %v951_v63 }
 0x227   :  { %537 = vmatprep.mubr.bf16.mxu1 %v366_v6  ;;  %v348_v12 = vadd.f32 1.0, %v705_v8  ;;  %v355_v14 = vmul.f32 0.5, %v347_v7 }
 0x228   :  { %538 = vmatmul.mubr.bf16.vlgmr.msra.gmra.mxu1 %v365_v10  ;;  %v362_v57 = vmul.f32 %v354_v13, %v957_v11 }
 0x229   :  { %v356_v17 = vmul.f32 0.5, %v348_v12  ;;  %v363_v48 = vmul.f32 %v355_v14, %v960_v15  ;;  %v612_v15 = vld [vmem:[%s1011_s5] ss:$0 sm:$0xff] }
 0x22b   :  { %v364_v18 = vmul.f32 %v356_v17, %v291_v23  ;;  %v367_v20 = vpack.c.bf16 %v363_v48, %v361_v45 }
 0x22d   :  { %v368_v19 = vpack.c.bf16 %v364_v18, %v362_v57 }
 0x22f   :  { %545 = vmatprep.mubr.bf16.mxu1 %v368_v19 }
 0x230   :  { %546 = vmatmul.mubr.bf16.gmra.mxu1 %v367_v20 }
 0x2e8   :  { %v629_v21 = vpop.f32.mrf.mxu1 }
 0x2ea   :  { %v630_v22 = vpop.f32.mrf.mxu1 }
 0x2eb   :  { %v631_v16 = vadd.f32 %v630_v22, %v629_v21 }
 0x2ec   :  { %v632_v24 = vpop.f32.mrf.mxu1 }
 0x2ed   :  { %v540_v11 = vadd.f32 %v631_v16, %v595_v9 }
 0x2ee   :  { %v633_v23 = vpop.f32.mrf.mxu1 }
 0x2ef   :  { %v560_v25 = vmul.f32 %v612_v15, %v540_v11  ;;  %v634_v63 = vadd.f32 %v633_v23, %v632_v24 }
 0x2f0   :  { %v635_v26 = vpop.f32.mrf.mxu1 }
 0x2f1   :  { %v564_v27 = vadd.f32 %v560_v25, %v765_v0  ;;  %v543_v28 = vadd.f32 %v634_v63, %v595_v9 }
 0x2f2   :  { %v636_v29 = vpop.f32.mrf.mxu1 }
 0x2f3   :  { %568 = vst [vmem:[%s1012_s10] sm:$0xff] %v564_v27  ;;  %v561_v30 = vmul.f32 %v612_v15, %v543_v28  ;;  %v637_v31 = vadd.f32 %v636_v29, %v635_v26 }
 0x2f4   :  { %v638_v32 = vpop.f32.mrf.mxu1 }
 0x2f5   :  { %v565_v33 = vadd.f32 %v561_v30, %v777_v2  ;;  %v548_v34 = vadd.f32 %v637_v31, %v595_v9 }
 0x2f6   :  { %v639_v35 = vpop.f32.mrf.mxu1 }
 0x2f7   :  { %569 = vst [vmem:[%s1012_s10 + $0x8] sm:$0xff] %v565_v33  ;;  %v562_v36 = vmul.f32 %v612_v15, %v548_v34  ;;  %v640_v37 = vadd.f32 %v639_v35, %v638_v32 }
 0x2f9   :  { %v566_v0 = vadd.f32 %v562_v36, %v770_v1  ;;  %v551_v38 = vadd.f32 %v640_v37, %v595_v9 }
 0x2fb   :  { %570 = vst [vmem:[%s1012_s10 + $0x10] sm:$0xff] %v566_v0  ;;  %v563_v39 = vmul.f32 %v612_v15, %v551_v38 }
 0x2fd   :  { %v567_v40 = vadd.f32 %v563_v39, %v782_v3 }
 0x2ff   :  { %571 = vst [vmem:[%s1012_s10 + $0x18] sm:$0xff] %v567_v40 }

// kernel: qwen2_code2wav_forward.26
= control target key start
LH: loop header
LB: loop body
LE: loop exit
PB: predicated region body
PF: predicated region fallthrough
CT: control target
= control target key end

     0   :  { %v347_v21 = vmov 0.0   ;;  %vm348_vm0 = vmmov 0   ;;  %v102_v41 = vlaneseq  ;;  %s482_s0 = inlined_call_operand.vmem [shape: f32[32,128], index: 0, kind: input, shape index: {}, may-alias: {0,1}]   ;;  %s483_s1 = inlined_call_operand.vmem [shape: f32[32,128], index: 1, kind: input, shape index: {}, may-alias: {0,1}]   ;;  %s484_s6 = inlined_call_operand.vmem [shape: bf16[128,128], index: 6, kind: input, shape index: {}]   ;;  %s485_s2 = inlined_call_operand.vmem [shape: f32[1,128], index: 2, kind: input, shape index: {}]   ;;  %s486_s5 = inlined_call_operand.vmem [shape: f32[1,128], index: 5, kind: input, shape index: {}]   ;;  %s487_s3 = inlined_call_operand.vmem [shape: f32[1,128], index: 3, kind: input, shape index: {}]   ;;  %s488_s4 = inlined_call_operand.vmem [shape: f32[1,128], index: 4, kind: input, shape index: {}]   ;;  %s489_s7 = inlined_call_operand.vmem [shape: f32[1,128], index: 7, kind: input, shape index: {}]   ;;  %s490_s8 = inlined_call_operand.vmem [shape: f32[16,128], index: 8, kind: input, shape index: {}]   ;;  %s491_s9 = inlined_call_operand.vmem [shape: f32[16,128], index: 9, kind: output, shape index: {}]  }
   0x1   :  { %v55_v0 = vld [vmem:[%s482_s0] sm:$0xff]  ;;  %v289_v1 = vld [vmem:[%s483_s1 + $0x10] sm:$0xff]  ;;  %v56_v2 = vld [vmem:[%s482_s0 + $0x8] sm:$0xff]  ;;  %309 = vmatprep.subr.bf16.mxu0 %v347_v21  ;;  %325 = vmatprep.mubr.msk.bf16.mxu0 %vm348_vm0, %v347_v21 }
   0x2   :  { %61 = vadd.xlane.f32.xlu0 %v55_v0  ;;  %119 = vadd.xlane.f32.xlu1 %v289_v1  ;;  %v290_v3 = vld [vmem:[%s483_s1 + $0x18] sm:$0xff]  ;;  %v332_v22 = vld [vmem:[%s484_s6 + $0x30] sm:$0xff]   ;;  %v333_v23 = vld [vmem:[%s484_s6 + $0x28] sm:$0xff]   ;;  %v103_v42 = vshrl.u32 %v102_v41, 7 }
   0x3   :  { %v331_v20 = vld [vmem:[%s484_s6 + $0x38] sm:$0xff]   ;;  %v334_v24 = vld [vmem:[%s484_s6 + $0x20] sm:$0xff]   ;;  %v336_v26 = vld [vmem:[%s484_s6 + $0x10] sm:$0xff]  }
   0x4   :  { %310 = vmatpush3.bf16.msra.mxu0 %v331_v20  ;;  %v335_v25 = vld [vmem:[%s484_s6 + $0x18] sm:$0xff]   ;;  %v337_v27 = vld [vmem:[%s484_s6 + $0x8] sm:$0xff]   ;;  %v338_v28 = vld [vmem:[%s484_s6] sm:$0xff]   ;;  %v104_v49 = vsub.s32 0, %v103_v42 }
   0x5   :  { %311 = vmatprep.subr.bf16.mxu0 %v347_v21  ;;  %v286_v44 = vld [vmem:[%s485_s2] ss:$0 sm:$0xff] }
   0x6   :  { %63 = vadd.xlane.f32.xlu0 %v56_v2  ;;  %121 = vadd.xlane.f32.xlu1 %v290_v3  ;;  %v60_v45 = vld [vmem:[%s486_s5] sm:$0x1] }
   0x7   :  { %v100_v48 = vadd.f32 1.0, %v60_v45  ;;  %v287_v51 = vld [vmem:[%s487_s3] ss:$0 sm:$0xff] }
   0x8   :  { %312 = vmatpush3.bf16.msra.mxu0 %v332_v22  ;;  %v268_v20 = vld [vmem:[%s490_s8] sm:$0xff] }
   0x9   :  { %313 = vmatprep.subr.bf16.mxu0 %v347_v21  ;;  %v105_v57 = vrot.slane %v100_v48, %v104_v49 }
   0xc   :  { %314 = vmatpush3.bf16.msra.mxu0 %v333_v23 }
   0xd   :  { %315 = vmatprep.subr.bf16.mxu0 %v347_v21 }
  0x10   :  { %316 = vmatpush3.bf16.msra.mxu0 %v334_v24 }
  0x11   :  { %317 = vmatprep.subr.bf16.mxu0 %v347_v21 }
  0x14   :  { %318 = vmatpush3.bf16.msra.mxu0 %v335_v25 }
  0x15   :  { %319 = vmatprep.subr.bf16.mxu0 %v347_v21 }
  0x18   :  { %320 = vmatpush3.bf16.msra.mxu0 %v336_v26  ;;  %v269_v26 = vld [vmem:[%s490_s8 + $0x8] sm:$0xff] }
  0x19   :  { %321 = vmatprep.subr.bf16.mxu0 %v347_v21 }
  0x1c   :  { %322 = vmatpush3.bf16.msra.mxu0 %v337_v27 }
  0x1d   :  { %323 = vmatprep.subr.bf16.mxu0 %v347_v21 }
  0x20   :  { %324 = vmatpush3.bf16.msra.mxu0 %v338_v28 }
  0x8b   :  { %v62_v4 = vpop.xlane.xlu0 %61  ;;  %v120_v5 = vpop.xlane.xlu1 %119 }
  0x8c   :  { %v66_v6 = vmul.f32 0.0078125, %v62_v4  ;;  %v123_v7 = vmul.f32 0.0078125, %v120_v5 }
  0x8e   :  { %v411_v8 = vsub.f32 %v55_v0, %v66_v6  ;;  %v413_v9 = vsub.f32 %v289_v1, %v123_v7 }
  0x8f   :  { %v64_v10 = vpop.xlane.xlu0 %63  ;;  %v122_v11 = vpop.xlane.xlu1 %121 }
  0x90   :  { %v67_v12 = vmul.f32 0.0078125, %v64_v10  ;;  %v70_v13 = vmul.f32 %v411_v8, %v411_v8  ;;  %v124_v14 = vmul.f32 0.0078125, %v122_v11  ;;  %v127_v17 = vmul.f32 %v413_v9, %v413_v9 }
  0x92   :  { %v417_v15 = vsub.f32 %v56_v2, %v67_v12  ;;  %72 = vadd.xlane.f32.xlu0 %v70_v13  ;;  %v419_v16 = vsub.f32 %v290_v3, %v124_v14  ;;  %v288_v2 = vld [vmem:[%s488_s4] ss:$0 sm:$0xff] }
  0x94   :  { %v71_v18 = vmul.f32 %v417_v15, %v417_v15  ;;  %v128_v19 = vmul.f32 %v419_v16, %v419_v16 }
  0x96   :  { %129 = vadd.xlane.f32.xlu0 %v127_v17  ;;  %74 = vadd.xlane.f32.xlu1 %v71_v18  ;;  %v291_v17 = vld [vmem:[%s489_s7] ss:$0 sm:$0xff] }
  0x9a   :  { %131 = vadd.xlane.f32.xlu1 %v128_v19 }
 0x11b   :  { %v73_v29 = vpop.xlane.xlu0 %72 }
 0x11c   :  { %v76_v30 = vmul.f32 0.0078125, %v73_v29 }
 0x11e   :  { %v78_v31 = vadd.f32 1e-06, %v76_v30 }
 0x11f   :  { %v75_v32 = vpop.xlane.xlu1 %74  ;;  %v130_v33 = vpop.xlane.xlu0 %129 }
 0x120   :  { %339 = vrsqrt.f32 %v78_v31  ;;  %v77_v34 = vmul.f32 0.0078125, %v75_v32  ;;  %v133_v35 = vmul.f32 0.0078125, %v130_v33 }
 0x122   :  { %v79_v36 = vadd.f32 1e-06, %v77_v34  ;;  %v135_v37 = vadd.f32 1e-06, %v133_v35 }
 0x123   :  { %v132_v38 = vpop.xlane.xlu1 %131 }
 0x124   :  { %341 = vrsqrt.f32 %v79_v36  ;;  %v134_v39 = vmul.f32 0.0078125, %v132_v38 }
 0x125   :  { %343 = vrsqrt.f32 %v135_v37 }
 0x126   :  { %v136_v40 = vadd.f32 1e-06, %v134_v39 }
 0x128   :  { %345 = vrsqrt.f32 %v136_v40 }
 0x12d   :  { %v340_v43 = vpop.eup %339 }
 0x12e   :  { %v82_v46 = vmul.f32 %v340_v43, %v411_v8 }
 0x130   :  { %v90_v47 = vmul.f32 %v286_v44, %v82_v46 }
 0x131   :  { %v342_v50 = vpop.eup %341 }
 0x132   :  { %v344_v52 = vpop.eup %343  ;;  %v83_v53 = vmul.f32 %v342_v50, %v417_v15  ;;  %v98_v56 = vadd.f32 %v287_v51, %v90_v47 }
 0x133   :  { %v139_v54 = vmul.f32 %v344_v52, %v413_v9 }
 0x134   :  { %v91_v55 = vmul.f32 %v286_v44, %v83_v53  ;;  %v107_v63 = vmul.f32 %v105_v57, %v98_v56 }
 0x135   :  { %v346_v58 = vpop.eup %345  ;;  %v141_v59 = vmul.f32 %v286_v44, %v139_v54 }
 0x136   :  { %v140_v60 = vmul.f32 %v346_v58, %v419_v16  ;;  %v99_v61 = vadd.f32 %v287_v51, %v91_v55  ;;  %v115_v6 = vadd.f32 %v288_v2, %v107_v63 }
 0x137   :  { %v143_v62 = vadd.f32 %v287_v51, %v141_v59 }
 0x138   :  { %v108_v0 = vmul.f32 %v105_v57, %v99_v61  ;;  %v142_v1 = vmul.f32 %v286_v44, %v140_v60  ;;  %v149_v11 = vmul.f32 1.5, %v115_v6 }
 0x139   :  { %v145_v3 = vmul.f32 %v143_v62, %v105_v57 }
 0x13a   :  { %v144_v4 = vadd.f32 %v287_v51, %v142_v1  ;;  %v116_v7 = vadd.f32 %v288_v2, %v108_v0 }
 0x13b   :  { %v147_v5 = vadd.f32 %v288_v2, %v145_v3 }
 0x13c   :  { %v146_v8 = vmul.f32 %v144_v4, %v105_v57  ;;  %v150_v12 = vmul.f32 1.5, %v116_v7 }
 0x13d   :  { %v151_v10 = vmul.f32 0.5, %v147_v5 }
 0x13e   :  { %v148_v9 = vadd.f32 %v288_v2, %v146_v8 }
 0x13f   :  { %v153_v14 = vsub.f32 %v149_v11, %v151_v10 }
 0x140   :  { %v152_v13 = vmul.f32 0.5, %v148_v9 }
 0x142   :  { %v154_v15 = vsub.f32 %v150_v12, %v152_v13 }
 0x144   :  { %v155_v16 = vpack.c.bf16 %v154_v15, %v153_v14 }
 0x146   :  { %326 = vmatmul.mubr.bf16.vlgmr.msra.gmra.mxu0 %v155_v16 }
 0x206   :  { %v261_v18 = vpop.f32.mrf.mxu0 }
 0x207   :  { %v262_v19 = vadd.f32 %v291_v17, %v261_v18 }
 0x208   :  { %v327_v21 = vpop.f32.mrf.mxu0 }
 0x209   :  { %v270_v22 = vmul.f32 0.1339746, %v262_v19 }
 0x20a   :  { %v264_v23 = vpop.f32.mrf.mxu0 }
 0x20b   :  { %v272_v24 = vadd.f32 %v270_v22, %v268_v20  ;;  %v265_v25 = vadd.f32 %v291_v17, %v264_v23 }
 0x20c   :  { %v328_v27 = vpop.f32.mrf.mxu0 }
 0x20d   :  { %274 = vst [vmem:[%s491_s9] sm:$0xff] %v272_v24  ;;  %v271_v28 = vmul.f32 0.1339746, %v265_v25 }
 0x20f   :  { %v273_v29 = vadd.f32 %v271_v28, %v269_v26 }
 0x211   :  { %275 = vst [vmem:[%s491_s9 + $0x8] sm:$0xff] %v273_v29 }

// kernel: qwen2_code2wav_forward.22
= control target key start
LH: loop header
LB: loop body
LE: loop exit
PB: predicated region body
PF: predicated region fallthrough
CT: control target
= control target key end

     0   :  { %s2780_s13 = smov 0   ;;  %s3215_s0 = inlined_call_operand.vmem [shape: f32[32,128], index: 0, kind: input, shape index: {}]   ;;  %s3216_s1 = inlined_call_operand.vmem [shape: f32[1,128], index: 1, kind: input, shape index: {}]   ;;  %s3217_s2 = inlined_call_operand.vmem [shape: f32[1,128], index: 2, kind: input, shape index: {}]   ;;  %s3218_s3 = inlined_call_operand.vmem [shape: f32[1,128], index: 3, kind: input, shape index: {}]   ;;  %s3219_s4 = inlined_call_operand.vmem [shape: f32[1,128], index: 4, kind: input, shape index: {}]   ;;  %s3220_s5 = inlined_call_operand.vmem [shape: f32[1,128], index: 5, kind: input, shape index: {}]   ;;  %s3221_s6 = inlined_call_operand.vmem [shape: bf16[128,384], index: 6, kind: input, shape index: {}]   ;;  %s3222_s7 = inlined_call_operand.vmem [shape: f32[1,384], index: 7, kind: input, shape index: {}]   ;;  %s3223_s8 = inlined_call_operand.vmem [shape: bf16[128,128], index: 8, kind: input, shape index: {}]   ;;  %s3224_s9 = inlined_call_operand.vmem [shape: f32[1,128], index: 9, kind: input, shape index: {}]   ;;  %s3225_s10 = inlined_call_operand.vmem [shape: f32[32,128], index: 10, kind: output, shape index: {}]  }
   0x1 LB: > { %s2421_s14 = sadd.s32 4294967295, %s2715_s13   ;;  %p2425_p0 = scmp.ge.s32.totalorder %s2715_s13, 1  ;;  %s2715_s13 = sphi %s2780_s13, %s20_s13  }
   0x2   : > { %p313_p1 = scmp.lt.s32.totalorder %s2715_s13, 3 }
   0x4   : > { %p314_p2 = pnand %p2425_p0, %p313_p1 }
   0x5   : > { %s2426_s15 = sshll.u32 (!%p314_p2), %s2421_s14, 1  ;;  %s2720_s30 = smov (!%p314_p2), 64  }
   0x6   : > { %317 = sbr.rel (%p314_p2) target bundleno = 1817 (0x719), region = 60  ;;  %p352_p3 = scmp.lt.s32.totalorder (!%p314_p2), %s2426_s15, 3 }
   0x7   : > { %s2721_s11 = smov (!%p314_p2), 96   ;;  %s2722_s12 = smov (!%p314_p2), 32  }
   0xb   : > { %s3227_s15 = smov (!%p352_p3, %s2426_s15), 3  ;;  %v2631_v10 = vld [vmem:[%s3221_s6 + $0xac] ss:$12 sps:$4 sm:$0xff]   ;;  %v2633_v11 = vld [vmem:[%s3221_s6 + $0xa8] ss:$12 sps:$4 sm:$0xff]   ;;  %v2717_v13 = vmov 0.0   ;;  %v411_v42 = vlaneseq }
   0xc   : > { %s2427_s16 = sshll.u32 %s3227_s15, 3  ;;  %v2634_v12 = vld [vmem:[%s3221_s6 + $0xb0] ss:$12 sps:$4 sm:$0xff]   ;;  %604 = vmatprep.subr.bf16.mxu0 %v2631_v10  ;;  %2527 = vmatprep.subr.bf16.mxu1 %v2717_v13  ;;  %v2635_v14 = vld [vmem:[%s3221_s6 + $0x94] ss:$12 sps:$4 sm:$0xff]   ;;  %v2718_v27 = vmov 0  }
   0xd   : > { %s2796_s19 = scalar_lea.vmem %s3215_s0, %s2427_s16  ;;  %605 = vmatpush1.bf16.msra.mxu0 %v2633_v11  ;;  %2528 = vmatpush3.bf16.msra.mxu1 %v2634_v12  ;;  %v2637_v15 = vld [vmem:[%s3221_s6 + $0x90] ss:$12 sps:$4 sm:$0xff]   ;;  %v2638_v16 = vld [vmem:[%s3221_s6 + $0x98] ss:$12 sps:$4 sm:$0xff]   ;;  %v2642_v19 = vld [vmem:[%s3221_s6 + $0x80] ss:$12 sps:$4 sm:$0xff]   ;;  %s361_s23 = scalar_lea.vmem %s3225_s10, %s2427_s16 }
   0xe   : > { %v364_v0 = vld [vmem:[%s2796_s19] sm:$0xff]  ;;  %v365_v1 = vld [vmem:[%s2796_s19 + $0x8] sm:$0xff]  ;;  %2529 = vmatprep.subr.bf16.mxu1 %v2717_v13  ;;  %606 = vmatprep.subr.bf16.mxu0 %v2635_v14  ;;  %v2650_v25 = vld [vmem:[%s3221_s6 + $0x50] ss:$12 sps:$4 sm:$0xff]   ;;  %vm2719_vm0 = vmmov 0   ;;  %v2893_v43 = vshrl.u32 %v411_v42, 7 }
   0xf   : > { %370 = vadd.xlane.f32.xlu0 %v364_v0  ;;  %v2639_v17 = vld [vmem:[%s3221_s6 + $0x7c] ss:$12 sps:$4 sm:$0xff]   ;;  %v2641_v18 = vld [vmem:[%s3221_s6 + $0x78] ss:$12 sps:$4 sm:$0xff]   ;;  %v2645_v21 = vld [vmem:[%s3221_s6 + $0x60] ss:$12 sps:$4 sm:$0xff]   ;;  %636 = vmatprep.mubr.bf16.mxu0 %v2718_v27 }
  0x10   : > { %v2643_v20 = vld [vmem:[%s3221_s6 + $0x64] ss:$12 sps:$4 sm:$0xff]   ;;  %v2646_v22 = vld [vmem:[%s3221_s6 + $0x68] ss:$12 sps:$4 sm:$0xff]   ;;  %v2647_v23 = vld [vmem:[%s3221_s6 + $0x4c] ss:$12 sps:$4 sm:$0xff]   ;;  %2543 = vmatprep.mubr.msk.bf16.mxu1 %vm2719_vm0, %v2717_v13 }
  0x11   : > { %607 = vmatpush1.bf16.msra.mxu0 %v2637_v15  ;;  %2530 = vmatpush3.bf16.msra.mxu1 %v2638_v16  ;;  %v2649_v24 = vld [vmem:[%s3221_s6 + $0x48] ss:$12 sps:$4 sm:$0xff]   ;;  %v2653_v28 = vld [vmem:[%s3221_s6 + $0x30] ss:$12 sps:$4 sm:$0xff]   ;;  %v2654_v29 = vld [vmem:[%s3221_s6 + $0x38] ss:$12 sps:$4 sm:$0xff]  }
  0x12   : > { %2531 = vmatprep.subr.bf16.mxu1 %v2717_v13  ;;  %608 = vmatprep.subr.bf16.mxu0 %v2639_v17  ;;  %v2651_v26 = vld [vmem:[%s3221_s6 + $0x34] ss:$12 sps:$4 sm:$0xff]   ;;  %v2655_v30 = vld [vmem:[%s3221_s6 + $0x1c] ss:$12 sps:$4 sm:$0xff]   ;;  %v2657_v31 = vld [vmem:[%s3221_s6 + $0x18] ss:$12 sps:$4 sm:$0xff]  }
  0x13   : > { %372 = vadd.xlane.f32.xlu0 %v365_v1  ;;  %v2658_v32 = vld [vmem:[%s3221_s6 + $0x20] ss:$12 sps:$4 sm:$0xff]   ;;  %v2659_v33 = vld [vmem:[%s3221_s6 + $0x4] ss:$12 sps:$4 sm:$0xff]   ;;  %v2662_v35 = vld [vmem:[%s3221_s6 + $0x8] ss:$12 sps:$4 sm:$0xff]  }
  0x14   : > { %v2661_v34 = vld [vmem:[%s3221_s6] ss:$12 sps:$4 sm:$0xff]   ;;  %v413_v49 = vsub.s32 0, %v2893_v43  ;;  %vm1502_vm1 = vcmask 261120   ;;  %vm1691_vm2 = vcmask 130048   ;;  %vm2233_vm3 = vcmask 523264  }
  0x15   : > { %609 = vmatpush1.bf16.msra.mxu0 %v2641_v18  ;;  %2532 = vmatpush3.bf16.msra.mxu1 %v2642_v19  ;;  %v369_v44 = vld [vmem:[%s3219_s4] sm:$0x1]  ;;  %vm2236_vm4 = vcmask 785408  }
  0x16   : > { %610 = vmatprep.subr.bf16.mxu0 %v2643_v20  ;;  %2533 = vmatprep.subr.bf16.mxu1 %v2717_v13  ;;  %v2430_v46 = vld [vmem:[%s3216_s1] ss:$0 sm:$0xff]  ;;  %v409_v48 = vadd.f32 1.0, %v369_v44 }
  0x17   : > { %v2431_v50 = vld [vmem:[%s3217_s2] ss:$0 sm:$0xff] }
  0x18   : > { %v414_v55 = vrot.slane %v409_v48, %v413_v49  ;;  %v2432_v59 = vld [vmem:[%s3218_s3] ss:$0 sm:$0xff] }
  0x19   : > { %611 = vmatpush1.bf16.msra.mxu0 %v2645_v21  ;;  %2534 = vmatpush3.bf16.msra.mxu1 %v2646_v22 }
  0x1a   : > { %612 = vmatprep.subr.bf16.mxu0 %v2647_v23  ;;  %2535 = vmatprep.subr.bf16.mxu1 %v2717_v13 }
  0x1d   : > { %613 = vmatpush1.bf16.msra.mxu0 %v2649_v24  ;;  %2536 = vmatpush3.bf16.msra.mxu1 %v2650_v25  ;;  %v2723_v24 = vmov 1983009808  }
  0x1e   : > { %614 = vmatprep.subr.bf16.mxu0 %v2651_v26  ;;  %2537 = vmatprep.subr.bf16.mxu1 %v2717_v13  ;;  %v720_v25 = vunpack.c.l.s4 %v2723_v24 }
  0x20   : > { %v721_v26 = vunpack.c.0.s8 %v720_v25 }
  0x21   : > { %615 = vmatpush1.bf16.msra.mxu0 %v2653_v28  ;;  %2538 = vmatpush3.bf16.msra.mxu1 %v2654_v29  ;;  %v2724_v28 = vmov 1934713408  }
  0x22   : > { %616 = vmatprep.subr.bf16.mxu0 %v2655_v30  ;;  %2539 = vmatprep.subr.bf16.mxu1 %v2717_v13  ;;  %v751_v29 = vunpack.c.l.s4 %v2724_v28  ;;  %v2929_v30 = vpack.i.b16 %v2718_v27, %v2718_v27 }
  0x25   : > { %617 = vmatpush1.bf16.msra.mxu0 %v2657_v31  ;;  %2540 = vmatpush3.bf16.msra.mxu1 %v2658_v32 }
  0x26   : > { %618 = vmatprep.subr.bf16.mxu0 %v2659_v33  ;;  %2541 = vmatprep.subr.bf16.mxu1 %v2717_v13 }
  0x29   : > { %619 = vmatpush1.bf16.msra.mxu0 %v2661_v34  ;;  %2542 = vmatpush3.bf16.msra.mxu1 %v2662_v35 }
  0x2a   : > { %2547 = vmatprep.subr.bf16.mxu1 %v2717_v13  ;;  %2571 = vmatprep.subr.bf16.mxu0 %v2717_v13 }
  0x98   : > { %v371_v2 = vpop.xlane.xlu0 %370 }
  0x99   : > { %v375_v3 = vmul.f32 0.0078125, %v371_v2  ;;  %v467_v2 = vsub.s32 1, %v2893_v43 }
  0x9b   : > { %v2800_v4 = vsub.f32 %v364_v0, %v375_v3  ;;  %v471_v0 = vsub.s32 2, %v2893_v43 }
  0x9c   : > { %v373_v5 = vpop.xlane.xlu0 %372 }
  0x9d   : > { %v376_v6 = vmul.f32 0.0078125, %v373_v5  ;;  %v379_v7 = vmul.f32 %v2800_v4, %v2800_v4 }
  0x9f   : > { %v2804_v8 = vsub.f32 %v365_v1, %v376_v6  ;;  %381 = vadd.xlane.f32.xlu1 %v379_v7  ;;  %v459_v1 = vld [vmem:[%s3222_s7] sm:$0x7] }
  0xa0   : > { %v472_v5 = vrot.slane %v459_v1, %v471_v0  ;;  %v464_v16 = vrot.slane %v459_v1, %v413_v49 }
  0xa1   : > { %v380_v9 = vmul.f32 %v2804_v8, %v2804_v8 }
  0xa3   : > { %383 = vadd.xlane.f32.xlu1 %v380_v9 }
 0x128   : > { %v382_v36 = vpop.xlane.xlu1 %381 }
 0x129   : > { %v385_v37 = vmul.f32 0.0078125, %v382_v36  ;;  %v2932_v36 = vsub.s32 %v721_v26, %v2893_v43 }
 0x12b   : > { %v387_v38 = vadd.f32 1e-06, %v385_v37  ;;  %v752_v37 = vunpack.c.0.s8 %v751_v29 }
 0x12c   : > { %v384_v39 = vpop.xlane.xlu1 %383 }
 0x12d   : > { %2671 = vrsqrt.f32 %v387_v38  ;;  %v386_v40 = vmul.f32 0.0078125, %v384_v39  ;;  %v2937_v27 = vsub.s32 %v752_v37, %v2893_v43 }
 0x12f   : > { %v388_v41 = vadd.f32 1e-06, %v386_v40 }
 0x131   : > { %2673 = vrsqrt.f32 %v388_v41 }
 0x13a   : > { %v2672_v45 = vpop.eup %2671 }
 0x13b   : > { %v391_v47 = vmul.f32 %v2672_v45, %v2800_v4 }
 0x13d   : > { %v399_v51 = vmul.f32 %v2430_v46, %v391_v47 }
 0x13e   : > { %v2674_v52 = vpop.eup %2673 }
 0x13f   : > { %v392_v53 = vmul.f32 %v2674_v52, %v2804_v8  ;;  %v407_v54 = vadd.f32 %v2431_v50, %v399_v51  ;;  %v468_v8 = vrot.slane %v459_v1, %v467_v2 }
 0x141   : > { %v400_v56 = vmul.f32 %v2430_v46, %v392_v53  ;;  %v416_v58 = vmul.f32 %v414_v55, %v407_v54 }
 0x143   : > { %v408_v57 = vadd.f32 %v2431_v50, %v400_v56  ;;  %v424_v61 = vadd.f32 %v2432_v59, %v416_v58 }
 0x145   : > { %v417_v60 = vmul.f32 %v414_v55, %v408_v57 }
 0x147   : > { %v425_v62 = vadd.f32 %v2432_v59, %v417_v60 }
 0x149   : > { %v426_v63 = vpack.c.bf16 %v425_v62, %v424_v61 }
 0x14b   : > { %637 = vmatmul.mubr.bf16.vlgmr.msra.gmra.mxu0 %v426_v63  ;;  %2544 = vmatmul.mubr.bf16.vlgmr.msra.gmra.mxu1 %v426_v63 }
 0x14c   : > { %2549 = vmatprep.mubr.msk.bf16.mxu1 %vm2719_vm0, %v2717_v13  ;;  %2573 = vmatprep.mubr.msk.bf16.mxu0 %vm2719_vm0, %v2717_v13 }
 0x20b   : > { %v638_v3 = vpop.f32.mrf.mxu0  ;;  %v681_v4 = vpop.f32.mrf.mxu1 }
 0x20c   : > { %v682_v11 = vadd.f32 %v681_v4, %v472_v5  ;;  %v639_v22 = vadd.f32 %v638_v3, %v464_v16 }
 0x20d   : > { %v640_v6 = vpop.f32.mrf.mxu0  ;;  %v2545_v7 = vpop.f32.mrf.mxu1 }
 0x20e   : > { %v641_v17 = vadd.f32 %v640_v6, %v468_v8 }
 0x20f   : > { %v642_v9 = vpop.f32.mrf.mxu0  ;;  %v684_v10 = vpop.f32.mrf.mxu1 }
 0x210   : > { %v685_v12 = vadd.f32 %v684_v10, %v472_v5  ;;  %v643_v20 = vadd.f32 %v642_v9, %v464_v16 }
 0x211   : > { %v644_v14 = vpop.f32.mrf.mxu0  ;;  %v2546_v15 = vpop.f32.mrf.mxu1 }
 0x212   : > { %v2919_v18 = vpack.c.bf16 %v685_v12, %v682_v11  ;;  %v645_v19 = vadd.f32 %v644_v14, %v468_v8  ;;  %v688_v23 = vpack.c.bf16 %v643_v20, %v639_v22 }
 0x214   : > { %v850_v21 = vpack.c.bf16 %v645_v19, %v641_v17  ;;  %v700_v53 = vshrl.u32 %v688_v23, 16 }
 0x216   : > { %854 = vrot.lane.b32.xlu1 %v850_v21, %s2720_s30  ;;  %852 = vrot.lane.b32.xlu0 %v850_v21, %s2721_s11  ;;  %v862_v34 = vshrl.u32 %v850_v21, 16 }
 0x21a   : > { %856 = vrot.lane.b32.xlu1 %v850_v21, %s2722_s12  ;;  %692 = vrot.lane.b32.xlu0 %v688_v23, %s2720_s30 }
 0x21e   : > { %690 = vrot.lane.b32.xlu1 %v688_v23, %s2721_s11 }
 0x222   : > { %694 = vrot.lane.b32.xlu1 %v688_v23, %s2722_s12 }
 0x288   : > { %v855_v31 = vpop.permute.xlu1 %854  ;;  %v853_v32 = vpop.permute.xlu0 %852 }
 0x289   : > { %v860_v33 = vpack.i.b16 %v853_v32, %v850_v21  ;;  %v863_v35 = vshrl.u32 %v853_v32, 16  ;;  %v870_v44 = vshrl.u32 %v855_v31, 16 }
 0x28b   : > { %v864_v38 = vpack.i.b16 %v863_v35, %v862_v34  ;;  %v874_v39 = vcombine.high %v860_v33, %v2929_v30  ;;  %v881_v46 = vrot.slane %v860_v33, %v2932_v36 }
 0x28c   : > { %v857_v40 = vpop.permute.xlu1 %856  ;;  %v693_v9 = vpop.permute.xlu0 %692 }
 0x28d   : > { %v940_v41 = vcombine.high %v864_v38, %v2929_v30  ;;  %v868_v42 = vpack.i.b16 %v857_v40, %v855_v31  ;;  %v871_v45 = vshrl.u32 %v857_v40, 16  ;;  %v888_v49 = vrot.slane %v874_v39, %v2932_v36 }
 0x28e   : > { %v947_v50 = vrot.slane %v864_v38, %v2932_v36  ;;  %v708_v20 = vshrl.u32 %v693_v9, 16 }
 0x28f   : > { %v889_v47 = vcombine.high %v868_v42, %v2929_v30  ;;  %v896_v48 = vrot.slane %v868_v42, %v2932_v36  ;;  %v872_v51 = vpack.i.b16 %v871_v45, %v870_v44  ;;  %v954_v54 = vrot.slane %v940_v41, %v2932_v36 }
 0x290   : > { %v691_v52 = vpop.permute.xlu1 %690 }
 0x291   : > { %v903_v55 = vrot.slane %v889_v47, %v2932_v36  ;;  %v904_v56 = vcombine.low %v881_v46, %v896_v48  ;;  %v905_v43 = vcombine.high %v881_v46, %v896_v48  ;;  %v955_v57 = vcombine.high %v872_v51, %v2929_v30 }
 0x292   : > { %v962_v58 = vrot.slane %v872_v51, %v2932_v36  ;;  %v698_v59 = vpack.i.b16 %v691_v52, %v688_v23  ;;  %v701_v60 = vshrl.u32 %v691_v52, 16 }
 0x293   : > { %v912_v61 = vrot.slane %v904_v56, %v2937_v27  ;;  %v919_v62 = vrot.slane %v905_v43, %v2937_v27  ;;  %v920_v63 = vcombine.low %v888_v49, %v903_v55  ;;  %v921_v0 = vcombine.high %v888_v49, %v903_v55 }
 0x294   : > { %v969_v1 = vrot.slane %v955_v57, %v2932_v36  ;;  %v970_v2 = vcombine.low %v947_v50, %v962_v58  ;;  %v971_v3 = vcombine.high %v947_v50, %v962_v58  ;;  %v702_v4 = vpack.i.b16 %v701_v60, %v700_v53  ;;  %v695_v17 = vpop.permute.xlu1 %694 }
 0x295   : > { %v928_v5 = vrot.slane %v920_v63, %v2937_v27  ;;  %v935_v6 = vrot.slane %v921_v0, %v2937_v27  ;;  %v1274_v7 = vcombine.low %v912_v61, %v919_v62  ;;  %v2461_v8 = vcombine.high %v912_v61, %v919_v62 }
 0x296   : > { %v978_v10 = vrot.slane %v970_v2, %v2937_v27  ;;  %v985_v11 = vrot.slane %v971_v3, %v2937_v27  ;;  %v986_v12 = vcombine.low %v954_v54, %v969_v1  ;;  %v987_v14 = vcombine.high %v954_v54, %v969_v1 }
 0x297   : > { %v1290_v15 = vcombine.low %v928_v5, %v935_v6  ;;  %v2462_v16 = vcombine.high %v928_v5, %v935_v6  ;;  %v2956_v19 = vrot.slane %v1274_v7, %v2932_v36  ;;  %v718_v23 = vcombine.high %v698_v59, %v2929_v30 }
 0x298   : > { %v994_v21 = vrot.slane %v986_v12, %v2937_v27  ;;  %v1001_v22 = vrot.slane %v987_v14, %v2937_v27  ;;  %v784_v24 = vcombine.high %v702_v4, %v2929_v30  ;;  %v1289_v25 = vrot.slane %v2461_v8, %v2932_v36 }
 0x299   : > { %v1324_v26 = vcombine.low %v978_v10, %v985_v11  ;;  %v706_v28 = vpack.i.b16 %v695_v17, %v693_v9  ;;  %v709_v29 = vshrl.u32 %v695_v17, 16  ;;  %v2463_v31 = vcombine.high %v978_v10, %v985_v11 }
 0x29a   : > { %v725_v32 = vrot.slane %v698_v59, %v2932_v36  ;;  %v1297_v33 = vrot.slane %v1290_v15, %v2932_v36  ;;  %v1305_v34 = vrot.slane %v2462_v16, %v2932_v36  ;;  %v791_v35 = vrot.slane %v702_v4, %v2932_v36 }
 0x29b   : > { %v710_v37 = vpack.i.b16 %v709_v29, %v708_v20  ;;  %v733_v38 = vcombine.high %v706_v28, %v2929_v30  ;;  %v740_v39 = vrot.slane %v706_v28, %v2932_v36  ;;  %v1340_v40 = vcombine.low %v994_v21, %v1001_v22 }
 0x29c   : > { %v2464_v41 = vcombine.high %v994_v21, %v1001_v22  ;;  %v732_v42 = vrot.slane %v718_v23, %v2932_v36  ;;  %v798_v44 = vrot.slane %v784_v24, %v2932_v36  ;;  %v1306_v50 = vcombine.low %v2956_v19, %v1289_v25 }
 0x29d   : > { %v747_v45 = vrot.slane %v733_v38, %v2932_v36  ;;  %v748_v46 = vcombine.low %v725_v32, %v740_v39  ;;  %v749_v47 = vcombine.high %v725_v32, %v740_v39  ;;  %v799_v48 = vcombine.high %v710_v37, %v2929_v30 }
 0x29e   : > { %v806_v49 = vrot.slane %v710_v37, %v2932_v36  ;;  %v1314_v51 = vcombine.low %v1297_v33, %v1305_v34  ;;  %v1331_v52 = vrot.slane %v1324_v26, %v2932_v36  ;;  %v1339_v59 = vrot.slane %v2463_v31, %v2932_v36 }
 0x29f   : > { %v756_v53 = vrot.slane %v748_v46, %v2937_v27  ;;  %v763_v54 = vrot.slane %v749_v47, %v2937_v27  ;;  %v764_v55 = vcombine.low %v732_v42, %v747_v45  ;;  %v765_v56 = vcombine.high %v732_v42, %v747_v45 }
 0x2a0   : > { %v813_v43 = vrot.slane %v799_v48, %v2932_v36  ;;  %v814_v57 = vcombine.low %v791_v35, %v806_v49  ;;  %v815_v58 = vcombine.high %v791_v35, %v806_v49  ;;  %v1347_v62 = vrot.slane %v1340_v40, %v2932_v36 }
 0x2a1   : > { %v772_v60 = vrot.slane %v764_v55, %v2937_v27  ;;  %v779_v61 = vrot.slane %v765_v56, %v2937_v27  ;;  %v1355_v63 = vrot.slane %v2464_v41, %v2932_v36  ;;  %v1162_v4 = vcombine.low %v756_v53, %v763_v54 }
 0x2a2   : > { %v822_v0 = vrot.slane %v814_v57, %v2937_v27  ;;  %v829_v1 = vrot.slane %v815_v58, %v2937_v27  ;;  %v830_v2 = vcombine.low %v798_v44, %v813_v43  ;;  %v831_v3 = vcombine.high %v798_v44, %v813_v43 }
 0x2a3   : > { %v2457_v5 = vcombine.high %v756_v53, %v763_v54  ;;  %v1178_v6 = vcombine.low %v772_v60, %v779_v61  ;;  %v2458_v7 = vcombine.high %v772_v60, %v779_v61  ;;  %v1356_v15 = vcombine.low %v1331_v52, %v1339_v59 }
 0x2a4   : > { %v838_v8 = vrot.slane %v830_v2, %v2937_v27  ;;  %v845_v9 = vrot.slane %v831_v3, %v2937_v27  ;;  %v1212_v10 = vcombine.low %v822_v0, %v829_v1  ;;  %v2459_v11 = vcombine.high %v822_v0, %v829_v1 }
 0x2a5   : > { %v1185_v12 = vrot.slane %v1178_v6, %v2932_v36  ;;  %v1193_v14 = vrot.slane %v2458_v7, %v2932_v36  ;;  %v1169_v21 = vrot.slane %v1162_v4, %v2932_v36  ;;  %v1177_v22 = vrot.slane %v2457_v5, %v2932_v36 }
 0x2a6   : > { %v1219_v16 = vrot.slane %v1212_v10, %v2932_v36  ;;  %v1227_v17 = vrot.slane %v2459_v11, %v2932_v36  ;;  %v1228_v19 = vcombine.low %v838_v8, %v845_v9  ;;  %v2460_v20 = vcombine.high %v838_v8, %v845_v9 }
 0x2a7   : > { %v1321_v23 = vrot.slane %v1314_v51, %v2937_v27  ;;  %v1364_v24 = vcombine.low %v1347_v62, %v1355_v63  ;;  %v1313_v28 = vrot.slane %v1306_v50, %v2937_v27  ;;  %v1202_v29 = vcombine.low %v1185_v12, %v1193_v14 }
 0x2a8   : > { %v1235_v25 = vrot.slane %v1228_v19, %v2932_v36  ;;  %v1243_v26 = vrot.slane %v2460_v20, %v2932_v36  ;;  %v1244_v31 = vcombine.low %v1219_v16, %v1227_v17  ;;  %v1363_v32 = vrot.slane %v1356_v15, %v2937_v27 }
 0x2a9   : > { %v1371_v33 = vrot.slane %v1364_v24, %v2937_v27  ;;  %v1194_v35 = vcombine.low %v1169_v21, %v1177_v22  ;;  %v1322_v37 = vcombine.low %v1313_v28, %v1321_v23  ;;  %v1209_v41 = vrot.slane %v1202_v29, %v2937_v27 }
 0x2aa   : > { %v1252_v34 = vcombine.low %v1235_v25, %v1243_v26  ;;  %v1251_v42 = vrot.slane %v1244_v31, %v2937_v27  ;;  %v1323_v55 = vcombine.high %v1313_v28, %v1321_v23 }
 0x2ab   : > { %v1372_v38 = vcombine.low %v1363_v32, %v1371_v33  ;;  %v1201_v44 = vrot.slane %v1194_v35, %v2937_v27  ;;  %v1377_v49 = vshrl.u32 %v1322_v37, 16  ;;  %v1373_v53 = vcombine.high %v1363_v32, %v1371_v33 }
 0x2ac   : > { %v1259_v39 = vrot.slane %v1252_v34, %v2937_v27  ;;  %v1383_v61 = vshrl.u32 %v1323_v55, 16 }
 0x2ad   : > { %v1376_v40 = vpack.i.b16 %v1372_v38, %v1322_v37  ;;  %v1378_v47 = vshrl.u32 %v1372_v38, 16  ;;  %v1210_v48 = vcombine.low %v1201_v44, %v1209_v41  ;;  %v1382_v43 = vpack.i.b16 %v1373_v53, %v1323_v55 }
 0x2ae   : > { %v1260_v46 = vcombine.low %v1251_v42, %v1259_v39  ;;  %v1384_v59 = vshrl.u32 %v1373_v53, 16  ;;  %v1261_v60 = vcombine.high %v1251_v42, %v1259_v39  ;;  %v1211_v62 = vcombine.high %v1201_v44, %v1209_v41 }
 0x2af   : > { %v1507_v45 = vsel %vm1502_vm1, %v1376_v40, 0  ;;  %v1379_v51 = vpack.i.b16 %v1378_v47, %v1377_v49  ;;  %v1265_v56 = vshrl.u32 %v1210_v48, 16  ;;  %v1601_v58 = vsel %vm1502_vm1, %v1382_v43, 0 }
 0x2b0   : > { %2548 = vmatpush3.bf16.xpose.msra.mxu1 %v1507_v45  ;;  %v1264_v50 = vpack.i.b16 %v1260_v46, %v1210_v48  ;;  %v1266_v54 = vshrl.u32 %v1260_v46, 16  ;;  %v1385_v63 = vpack.i.b16 %v1384_v59, %v1383_v61  ;;  %v1270_v0 = vpack.i.b16 %v1261_v60, %v1211_v62 }
 0x2b1   : > { %2553 = vmatprep.subr.bf16.mxu1 %v2717_v13  ;;  %v1554_v52 = vsel %vm1502_vm1, %v1379_v51, 0  ;;  %v1272_v2 = vshrl.u32 %v1261_v60, 16  ;;  %v1271_v3 = vshrl.u32 %v1211_v62, 16 }
 0x2b2   : > { %v1267_v57 = vpack.i.b16 %v1266_v54, %v1265_v56  ;;  %v1648_v1 = vsel %vm1502_vm1, %v1385_v63, 0 }
 0x2b3   : > { %v1273_v4 = vpack.i.b16 %v1272_v2, %v1271_v3 }
 0x2b7   : > { %2550 = vmatmul.mubr.msk.bf16.vlgmr.msra.gmra.mxu1 %vm1502_vm1, %v1264_v50 }
 0x2b8   : > { %2554 = vmatpush3.bf16.xpose.msra.mxu1 %v1554_v52  ;;  %2555 = vmatprep.mubr.msk.bf16.mxu1 %vm2719_vm0, %v2717_v13 }
 0x2b9   : > { %2559 = vmatprep.subr.bf16.mxu1 %v2717_v13 }
 0x2bf   : > { %2556 = vmatmul.mubr.msk.bf16.vlgmr.msra.gmra.mxu1 %vm1502_vm1, %v1267_v57 }
 0x2c0   : > { %2560 = vmatpush3.bf16.xpose.msra.mxu1 %v1601_v58  ;;  %2561 = vmatprep.mubr.msk.bf16.mxu1 %vm2719_vm0, %v2717_v13 }
 0x2c1   : > { %2565 = vmatprep.subr.bf16.mxu1 %v2717_v13 }
 0x2c7   : > { %2562 = vmatmul.mubr.msk.bf16.vlgmr.msra.gmra.mxu1 %vm1502_vm1, %v1270_v0 }
 0x2c8   : > { %2566 = vmatpush3.bf16.xpose.msra.mxu1 %v1648_v1  ;;  %2567 = vmatprep.mubr.msk.bf16.mxu1 %vm2719_vm0, %v2717_v13 }
 0x2c9   : > { %2577 = vmatprep.subr.bf16.mxu1 %v2717_v13 }
 0x2cf   : > { %2568 = vmatmul.mubr.msk.bf16.vlgmr.msra.gmra.mxu1 %vm1502_vm1, %v1273_v4 }
 0x2d0   : > { %2579 = vmatprep.mubr.msk.bf16.mxu1 %vm2719_vm0, %v2717_v13 }
 0x377   : > { %v1543_v5 = vpop.f32.mrf.mxu1 }
 0x378   : > { %v1692_v6 = vsel %vm1691_vm2, %v1543_v5, -inf }
 0x379   : > { %1693 = vmax.xlane.f32.xlu0 %v1692_v6  ;;  %v2551_v7 = vpop.f32.mrf.mxu1 }
 0x37b   : > { %v1546_v8 = vpop.f32.mrf.mxu1 }
 0x37c   : > { %v1695_v9 = vsel %vm1691_vm2, %v1546_v8, -inf }
 0x37d   : > { %1696 = vmax.xlane.f32.xlu1 %v1695_v9  ;;  %v2552_v10 = vpop.f32.mrf.mxu1 }
 0x37f   : > { %v1590_v11 = vpop.f32.mrf.mxu1 }
 0x380   : > { %v1698_v12 = vsel %vm1691_vm2, %v1590_v11, -inf }
 0x381   : > { %1699 = vmax.xlane.f32.xlu0 %v1698_v12  ;;  %v2557_v14 = vpop.f32.mrf.mxu1 }
 0x383   : > { %v1593_v15 = vpop.f32.mrf.mxu1 }
 0x384   : > { %v1701_v16 = vsel %vm1691_vm2, %v1593_v15, -inf }
 0x385   : > { %1702 = vmax.xlane.f32.xlu0 %v1701_v16  ;;  %v2558_v17 = vpop.f32.mrf.mxu1  ;;  %v1018_v16 = vshrl.u32 %v2919_v18, 16 }
 0x387   : > { %v3028_v19 = vpop.f32.mrf.mxu1 }
 0x388   : > { %v1704_v20 = vsel %vm1691_vm2, %v3028_v19, -inf }
 0x389   : > { %1705 = vmax.xlane.f32.xlu0 %v1704_v20  ;;  %v2563_v21 = vpop.f32.mrf.mxu1 }
 0x38b   : > { %v1640_v22 = vpop.f32.mrf.mxu1 }
 0x38c   : > { %v1707_v23 = vsel %vm1691_vm2, %v1640_v22, -inf }
 0x38d   : > { %1708 = vmax.xlane.f32.xlu1 %v1707_v23  ;;  %v2564_v24 = vpop.f32.mrf.mxu1 }
 0x38f   : > { %v1684_v25 = vpop.f32.mrf.mxu1 }
 0x390   : > { %v1710_v26 = vsel %vm1691_vm2, %v1684_v25, -inf }
 0x391   : > { %1711 = vmax.xlane.f32.xlu0 %v1710_v26  ;;  %v2569_v28 = vpop.f32.mrf.mxu1 }
 0x393   : > { %v1687_v29 = vpop.f32.mrf.mxu1 }
 0x394   : > { %v1713_v31 = vsel %vm1691_vm2, %v1687_v29, -inf }
 0x395   : > { %1714 = vmax.xlane.f32.xlu1 %v1713_v31  ;;  %v2570_v32 = vpop.f32.mrf.mxu1 }
 0x3a6   : > { %1010 = vrot.lane.b32.xlu1 %v2919_v18, %s2720_s30 }
 0x3a7   : > { %1008 = vrot.lane.b32.xlu0 %v2919_v18, %s2721_s11 }
 0x402   : > { %v1694_v33 = vpop.xlane.xlu0 %1693 }
 0x403   : > { %v1716_v34 = vsub.f32 %v1543_v5, %v1694_v33 }
 0x405   : > { %v1724_v35 = vmul.f32 1.442695, %v1716_v34 }
 0x406   : > { %v1697_v37 = vpop.xlane.xlu1 %1696 }
 0x407   : > { %2675 = vpow2.f32 %v1724_v35  ;;  %v1717_v38 = vsub.f32 %v1546_v8, %v1697_v37 }
 0x409   : > { %v1726_v39 = vmul.f32 1.442695, %v1717_v38 }
 0x40a   : > { %v1700_v40 = vpop.xlane.xlu0 %1699 }
 0x40b   : > { %2677 = vpow2.f32 %v1726_v39  ;;  %v1718_v41 = vsub.f32 %v1590_v11, %v1700_v40 }
 0x40d   : > { %v1728_v42 = vmul.f32 1.442695, %v1718_v41 }
 0x40e   : > { %v1703_v44 = vpop.xlane.xlu0 %1702 }
 0x40f   : > { %2679 = vpow2.f32 %v1728_v42  ;;  %v1719_v45 = vsub.f32 %v1593_v15, %v1703_v44 }
 0x411   : > { %v1730_v46 = vmul.f32 1.442695, %v1719_v45 }
 0x412   : > { %v1706_v49 = vpop.xlane.xlu0 %1705 }
 0x413   : > { %2681 = vpow2.f32 %v1730_v46  ;;  %v1720_v6 = vsub.f32 %v3028_v19, %v1706_v49 }
 0x414   : > { %v3039_v47 = vpop.eup %2675 }
 0x415   : > { %v1740_v48 = vsel %vm1691_vm2, %v3039_v47, 0.0  ;;  %v1732_v7 = vmul.f32 1.442695, %v1720_v6 }
 0x416   : > { %v1709_v50 = vpop.xlane.xlu1 %1708  ;;  %1741 = vadd.xlane.f32.xlu0 %v1740_v48 }
 0x417   : > { %v1721_v51 = vsub.f32 %v1640_v22, %v1709_v50 }
 0x418   : > { %v3043_v52 = vpop.eup %2677 }
 0x419   : > { %v1734_v53 = vmul.f32 1.442695, %v1721_v51  ;;  %v1743_v54 = vsel %vm1691_vm2, %v3043_v52, 0.0 }
 0x41a   : > { %v1712_v55 = vpop.xlane.xlu0 %1711  ;;  %1744 = vadd.xlane.f32.xlu1 %v1743_v54 }
 0x41b   : > { %2683 = vpow2.f32 %v1734_v53  ;;  %v1722_v56 = vsub.f32 %v1684_v25, %v1712_v55 }
 0x41c   : > { %v3047_v43 = vpop.eup %2679 }
 0x41d   : > { %v1736_v57 = vmul.f32 1.442695, %v1722_v56  ;;  %v1746_v58 = vsel %vm1691_vm2, %v3047_v43, 0.0 }
 0x41e   : > { %1747 = vadd.xlane.f32.xlu0 %v1746_v58  ;;  %v1715_v59 = vpop.xlane.xlu1 %1714  ;;  %v1009_v11 = vpop.permute.xlu0 %1008 }
 0x41f   : > { %2685 = vpow2.f32 %v1736_v57  ;;  %v1723_v60 = vsub.f32 %v1687_v29, %v1715_v59  ;;  %v1019_v14 = vshrl.u32 %v1009_v11, 16  ;;  %v1016_v17 = vpack.i.b16 %v1009_v11, %v2919_v18 }
 0x420   : > { %v3051_v61 = vpop.eup %2681 }
 0x421   : > { %v1738_v62 = vmul.f32 1.442695, %v1723_v60  ;;  %v1749_v63 = vsel %vm1691_vm2, %v3051_v61, 0.0  ;;  %v1020_v21 = vpack.i.b16 %v1019_v14, %v1018_v16  ;;  %v1030_v22 = vcombine.high %v1016_v17, %v2929_v30 }
 0x422   : > { %1750 = vadd.xlane.f32.xlu1 %v1749_v63  ;;  %v1011_v10 = vpop.permute.xlu1 %1010  ;;  %v1037_v28 = vrot.slane %v1016_v17, %v2932_v36 }
 0x423   : > { %2687 = vpow2.f32 %v1738_v62  ;;  %v1026_v24 = vshrl.u32 %v1011_v10, 16  ;;  %v1096_v29 = vcombine.high %v1020_v21, %v2929_v30  ;;  %v1044_v34 = vrot.slane %v1030_v22, %v2932_v36 }
 0x424   : > { %2689 = vpow2.f32 %v1732_v7  ;;  %v1103_v40 = vrot.slane %v1020_v21, %v2932_v36 }
 0x425   : > { %v1110_v41 = vrot.slane %v1096_v29, %v2932_v36 }
 0x428   : > { %v3055_v0 = vpop.eup %2683 }
 0x429   : > { %v1755_v1 = vsel %vm1691_vm2, %v3055_v0, 0.0 }
 0x42a   : > { %1756 = vadd.xlane.f32.xlu0 %v1755_v1 }
 0x42c   : > { %v3059_v2 = vpop.eup %2685 }
 0x42d   : > { %v1758_v3 = vsel %vm1691_vm2, %v3059_v2, 0.0 }
 0x42e   : > { %1759 = vadd.xlane.f32.xlu0 %v1758_v3 }
 0x430   : > { %v3063_v4 = vpop.eup %2687 }
 0x431   : > { %v1761_v5 = vsel %vm1691_vm2, %v3063_v4, 0.0  ;;  %v3070_v8 = vpop.eup %2689 }
 0x432   : > { %1762 = vadd.xlane.f32.xlu0 %v1761_v5  ;;  %v1752_v9 = vsel %vm1691_vm2, %v3070_v8, 0.0 }
 0x433   : > { %1012 = vrot.lane.b32.xlu1 %v2919_v18, %s2722_s12 }
 0x457   : > { %1753 = vadd.xlane.f32.xlu1 %v1752_v9 }
 0x49f   : > { %v1742_v15 = vpop.xlane.xlu0 %1741 }
 0x4a0   : > { %2691 = vrcp.f32 %v1742_v15 }
 0x4a3   : > { %v1745_v12 = vpop.xlane.xlu1 %1744 }
 0x4a4   : > { %2693 = vrcp.f32 %v1745_v12 }
 0x4a7   : > { %v1748_v19 = vpop.xlane.xlu0 %1747 }
 0x4a8   : > { %2695 = vrcp.f32 %v1748_v19 }
 0x4ab   : > { %v1751_v20 = vpop.xlane.xlu1 %1750 }
 0x4ac   : > { %2697 = vrcp.f32 %v1751_v20 }
 0x4ad   : > { %v2692_v22 = vpop.eup %2691 }
 0x4af   : > { %v1013_v23 = vpop.permute.xlu1 %1012 }
 0x4b0   : > { %v1024_v25 = vpack.i.b16 %v1013_v23, %v1011_v10  ;;  %v1027_v26 = vshrl.u32 %v1013_v23, 16 }
 0x4b2   : > { %v1028_v31 = vpack.i.b16 %v1027_v26, %v1026_v24  ;;  %v1045_v32 = vcombine.high %v1024_v25, %v2929_v30  ;;  %v1052_v33 = vrot.slane %v1024_v25, %v2932_v36  ;;  %v2694_v26 = vpop.eup %2693 }
 0x4b3   : > { %v3081_v18 = vpop.xlane.xlu0 %1756 }
 0x4b4   : > { %v1059_v35 = vrot.slane %v1045_v32, %v2932_v36  ;;  %v1060_v37 = vcombine.low %v1037_v28, %v1052_v33  ;;  %v1061_v38 = vcombine.high %v1037_v28, %v1052_v33  ;;  %v1111_v39 = vcombine.high %v1028_v31, %v2929_v30 }
 0x4b5   : > { %v1118_v42 = vrot.slane %v1028_v31, %v2932_v36  ;;  %v2696_v32 = vpop.eup %2695 }
 0x4b6   : > { %v1068_v44 = vrot.slane %v1060_v37, %v2937_v27  ;;  %v1075_v45 = vrot.slane %v1061_v38, %v2937_v27  ;;  %v1076_v46 = vcombine.low %v1044_v34, %v1059_v35  ;;  %v1077_v48 = vcombine.high %v1044_v34, %v1059_v35 }
 0x4b7   : > { %v1125_v49 = vrot.slane %v1111_v39, %v2932_v36  ;;  %v1126_v50 = vcombine.low %v1103_v40, %v1118_v42  ;;  %v1127_v51 = vcombine.high %v1103_v40, %v1118_v42  ;;  %v1760_v53 = vpop.xlane.xlu0 %1759  ;;  %v1773_v40 = vmul.f32 %v2694_v26, %v3043_v52 }
 0x4b8   : > { %v1084_v54 = vrot.slane %v1076_v46, %v2937_v27  ;;  %v1091_v55 = vrot.slane %v1077_v48, %v2937_v27  ;;  %v1386_v56 = vcombine.low %v1068_v44, %v1075_v45  ;;  %v2465_v57 = vcombine.high %v1068_v44, %v1075_v45 }
 0x4b9   : > { %v1134_v58 = vrot.slane %v1126_v50, %v2937_v27  ;;  %v1141_v59 = vrot.slane %v1127_v51, %v2937_v27  ;;  %v1142_v60 = vcombine.low %v1110_v41, %v1125_v49  ;;  %v1143_v62 = vcombine.high %v1110_v41, %v1125_v49  ;;  %v2698_v37 = vpop.eup %2697 }
 0x4ba   : > { %v1393_v63 = vrot.slane %v1386_v56, %v2932_v36  ;;  %v1401_v1 = vrot.slane %v2465_v57, %v2932_v36  ;;  %v1402_v3 = vcombine.low %v1084_v54, %v1091_v55  ;;  %v2466_v5 = vcombine.high %v1084_v54, %v1091_v55 }
 0x4bb   : > { %v1150_v6 = vrot.slane %v1142_v60, %v2937_v27  ;;  %v1157_v7 = vrot.slane %v1143_v62, %v2937_v27  ;;  %v1436_v9 = vcombine.low %v1134_v58, %v1141_v59  ;;  %v2467_v10 = vcombine.high %v1134_v58, %v1141_v59  ;;  %v1763_v21 = vpop.xlane.xlu0 %1762 }
 0x4bc   : > { %v1409_v11 = vrot.slane %v1402_v3, %v2932_v36  ;;  %v1417_v12 = vrot.slane %v2466_v5, %v2932_v36  ;;  %v1418_v14 = vcombine.low %v1393_v63, %v1401_v1  ;;  %2699 = vrcp.f32 %v1763_v21  ;;  %v2668_v5 = vld [vmem:[%s3223_s8 + $0x10] sm:$0xff]  }
 0x4bd   : > { %v1443_v15 = vrot.slane %v1436_v9, %v2932_v36  ;;  %v1451_v16 = vrot.slane %v2467_v10, %v2932_v36  ;;  %v1452_v17 = vcombine.low %v1150_v6, %v1157_v7  ;;  %v2468_v20 = vcombine.high %v1150_v6, %v1157_v7 }
 0x4be   : > { %v1426_v19 = vcombine.low %v1409_v11, %v1417_v12  ;;  %v1425_v29 = vrot.slane %v1418_v14, %v2937_v27  ;;  %2701 = vrcp.f32 %v1760_v53  ;;  %v1772_v46 = vmul.f32 %v2692_v22, %v3039_v47 }
 0x4bf   : > { %v1459_v23 = vrot.slane %v1452_v17, %v2932_v36  ;;  %v1467_v24 = vrot.slane %v2468_v20, %v2932_v36  ;;  %v1468_v25 = vcombine.low %v1443_v15, %v1451_v16  ;;  %v1775_v48 = vmul.f32 %v2698_v37, %v3051_v61 }
 0x4c0   : > { %v1433_v28 = vrot.slane %v1426_v19, %v2937_v27  ;;  %v1780_v51 = vpack.c.bf16 %v1773_v40, %v1772_v46  ;;  %v1774_v53 = vmul.f32 %v2696_v32, %v3047_v43  ;;  %2703 = vrcp.f32 %v3081_v18  ;;  %v2667_v18 = vld [vmem:[%s3223_s8 + $0x18] sm:$0xff]  }
 0x4c1   : > { %v1476_v31 = vcombine.low %v1459_v23, %v1467_v24  ;;  %v1475_v34 = vrot.slane %v1468_v25, %v2937_v27 }
 0x4c2   : > { %v1434_v33 = vcombine.low %v1425_v29, %v1433_v28  ;;  %v1435_v45 = vcombine.high %v1425_v29, %v1433_v28  ;;  %v1781_v52 = vpack.c.bf16 %v1775_v48, %v1774_v53 }
 0x4c3   : > { %v1483_v35 = vrot.slane %v1476_v31, %v2937_v27 }
 0x4c4   : > { %v1490_v42 = vshrl.u32 %v1434_v33, 16  ;;  %v1498_v55 = vshrl.u32 %v1435_v45, 16 }
 0x4c5   : > { %v1484_v38 = vcombine.low %v1475_v34, %v1483_v35  ;;  %v1485_v39 = vcombine.high %v1475_v34, %v1483_v35 }
 0x4c7   : > { %v1488_v41 = vpack.i.b16 %v1484_v38, %v1434_v33  ;;  %v1491_v44 = vshrl.u32 %v1484_v38, 16  ;;  %v1499_v50 = vshrl.u32 %v1485_v39, 16  ;;  %v1496_v54 = vpack.i.b16 %v1485_v39, %v1435_v45 }
 0x4c9   : > { %2572 = vmatpush3.bf16.msra.mxu0 %v1488_v41  ;;  %v1492_v49 = vpack.i.b16 %v1491_v44, %v1490_v42  ;;  %v2700_v56 = vpop.eup %2699  ;;  %v1500_v47 = vpack.i.b16 %v1499_v50, %v1498_v55 }
 0x4ca   : > { %2583 = vmatprep.subr.bf16.mxu0 %v2717_v13  ;;  %v1779_v43 = vmul.f32 %v2700_v56, %v3063_v4  ;;  %v2664_v4 = vld [vmem:[%s3223_s8 + $0x30] sm:$0xff]  }
 0x4cb   : > { %2578 = vmatpush3.bf16.msra.mxu1 %v1492_v49  ;;  %v2702_v61 = vpop.eup %2701 }
 0x4cc   : > { %2574 = vmatmul.mubr.msk.bf16.vlgmr.msra.gmra.mxu0 %vm1691_vm2, %v1780_v51  ;;  %2589 = vmatprep.subr.bf16.mxu1 %v2717_v13  ;;  %v1778_v57 = vmul.f32 %v2702_v61, %v3059_v2  ;;  %v2663_v2 = vld [vmem:[%s3223_s8 + $0x38] sm:$0xff]  }
 0x4cd   : > { %2584 = vmatpush3.bf16.msra.mxu0 %v1496_v54  ;;  %2585 = vmatprep.mubr.msk.bf16.mxu0 %vm2719_vm0, %v2717_v13  ;;  %v2704_v60 = vpop.eup %2703 }
 0x4ce   : > { %2580 = vmatmul.mubr.msk.bf16.vlgmr.msra.gmra.mxu1 %vm1691_vm2, %v1781_v52  ;;  %2595 = vmatprep.subr.bf16.mxu0 %v2717_v13  ;;  %v1783_v58 = vpack.c.bf16 %v1779_v43, %v1778_v57  ;;  %v1777_v1 = vmul.f32 %v2704_v60, %v3055_v0  ;;  %v2665_v0 = vld [vmem:[%s3223_s8 + $0x28] sm:$0xff]  }
 0x4cf   : > { %2590 = vmatpush3.bf16.msra.mxu1 %v1500_v47  ;;  %2591 = vmatprep.mubr.msk.bf16.mxu1 %vm2719_vm0, %v2717_v13 }
 0x4d6   : > { %2592 = vmatmul.mubr.msk.bf16.vlgmr.msra.gmra.mxu1 %vm1691_vm2, %v1783_v58 }
 0x4e0   : > { %v1754_v59 = vpop.xlane.xlu1 %1753 }
 0x4e1   : > { %2705 = vrcp.f32 %v1754_v59 }
 0x4ee   : > { %v2706_v62 = vpop.eup %2705 }
 0x4ef   : > { %v1776_v63 = vmul.f32 %v2706_v62, %v3070_v8  ;;  %v2666_v8 = vld [vmem:[%s3223_s8 + $0x20] sm:$0xff]  }
 0x4f1   : > { %v1782_v3 = vpack.c.bf16 %v1777_v1, %v1776_v63 }
 0x4f3   : > { %2586 = vmatmul.mubr.msk.bf16.vlgmr.msra.gmra.mxu0 %vm1691_vm2, %v1782_v3 }
 0x4f4   : > { %2611 = vmatprep.mubr.msk.bf16.mxu0 %vm2719_vm0, %v2717_v13  ;;  %2596 = vmatpush3.bf16.msra.mxu0 %v2663_v2 }
 0x4f5   : > { %2597 = vmatprep.subr.bf16.mxu0 %v2717_v13 }
 0x4f8   : > { %2598 = vmatpush3.bf16.msra.mxu0 %v2664_v4 }
 0x4f9   : > { %2599 = vmatprep.subr.bf16.mxu0 %v2717_v13 }
 0x4fc   : > { %2600 = vmatpush3.bf16.msra.mxu0 %v2665_v0 }
 0x4fd   : > { %2601 = vmatprep.subr.bf16.mxu0 %v2717_v13 }
 0x500   : > { %2602 = vmatpush3.bf16.msra.mxu0 %v2666_v8 }
 0x501   : > { %2603 = vmatprep.subr.bf16.mxu0 %v2717_v13 }
 0x504   : > { %2604 = vmatpush3.bf16.msra.mxu0 %v2667_v18 }
 0x505   : > { %2605 = vmatprep.subr.bf16.mxu0 %v2717_v13 }
 0x508   : > { %2606 = vmatpush3.bf16.msra.mxu0 %v2668_v5 }
 0x509   : > { %2607 = vmatprep.subr.bf16.mxu0 %v2717_v13 }
 0x58c   : > { %v1821_v6 = vpop.f32.mrf.mxu0 }
 0x58e   : > { %v2575_v7 = vpop.f32.mrf.mxu0  ;;  %v1865_v9 = vpop.f32.mrf.mxu1 }
 0x590   : > { %v1824_v10 = vpop.f32.mrf.mxu0  ;;  %v2581_v11 = vpop.f32.mrf.mxu1 }
 0x591   : > { %v1960_v22 = vpack.c.bf16 %v1824_v10, %v1821_v6  ;;  %v2669_v10 = vld [vmem:[%s3223_s8 + $0x8] sm:$0xff]  }
 0x592   : > { %v2576_v12 = vpop.f32.mrf.mxu0  ;;  %v1868_v14 = vpop.f32.mrf.mxu1  ;;  %2608 = vmatpush3.bf16.msra.mxu0 %v2669_v10 }
 0x593   : > { %v1961_v19 = vpack.c.bf16 %v1868_v14, %v1865_v9  ;;  %v1968_v29 = vshrl.u32 %v1960_v22, 16  ;;  %2609 = vmatprep.subr.bf16.mxu0 %v2717_v13 }
 0x594   : > { %v2582_v15 = vpop.f32.mrf.mxu1 }
 0x595   : > { %v1966_v24 = vpack.i.b16 %v1961_v19, %v1960_v22  ;;  %v1969_v25 = vshrl.u32 %v1961_v19, 16  ;;  %v2670_v19 = vld [vmem:[%s3223_s8] sm:$0xff]  }
 0x596   : > { %v1953_v16 = vpop.f32.mrf.mxu1  ;;  %2610 = vmatpush3.bf16.msra.mxu0 %v2670_v19 }
 0x597   : > { %v1970_v33 = vpack.i.b16 %v1969_v25, %v1968_v29  ;;  %v1980_v34 = vcombine.high %v1966_v24, %v2929_v30  ;;  %v1987_v40 = vrot.slane %v1966_v24, %v2932_v36 }
 0x598   : > { %v2593_v17 = vpop.f32.mrf.mxu1 }
 0x599   : > { %v1994_v45 = vrot.slane %v1980_v34, %v2932_v36  ;;  %v2046_v46 = vcombine.high %v1970_v33, %v2929_v30  ;;  %v2053_v53 = vrot.slane %v1970_v33, %v2932_v36 }
 0x59a   : > { %v1956_v20 = vpop.f32.mrf.mxu1 }
 0x59b   : > { %v1963_v28 = vpack.c.bf16 %v1956_v20, %v1953_v16  ;;  %v2060_v61 = vrot.slane %v2046_v46, %v2932_v36 }
 0x59c   : > { %v2594_v21 = vpop.f32.mrf.mxu1 }
 0x59d   : > { %v1977_v37 = vshrl.u32 %v1963_v28, 16 }
 0x5b3   : > { %v1909_v23 = vpop.f32.mrf.mxu0 }
 0x5b5   : > { %v2587_v26 = vpop.f32.mrf.mxu0 }
 0x5b7   : > { %v1912_v31 = vpop.f32.mrf.mxu0 }
 0x5b8   : > { %v1962_v32 = vpack.c.bf16 %v1912_v31, %v1909_v23 }
 0x5b9   : > { %v2588_v35 = vpop.f32.mrf.mxu0 }
 0x5ba   : > { %v1974_v38 = vpack.i.b16 %v1963_v28, %v1962_v32  ;;  %v1976_v39 = vshrl.u32 %v1962_v32, 16 }
 0x5bc   : > { %v1978_v41 = vpack.i.b16 %v1977_v37, %v1976_v39  ;;  %v1995_v42 = vcombine.high %v1974_v38, %v2929_v30  ;;  %v2002_v44 = vrot.slane %v1974_v38, %v2932_v36 }
 0x5be   : > { %v2009_v48 = vrot.slane %v1995_v42, %v2932_v36  ;;  %v2010_v49 = vcombine.low %v1987_v40, %v2002_v44  ;;  %v2011_v50 = vcombine.high %v1987_v40, %v2002_v44  ;;  %v2061_v51 = vcombine.high %v1978_v41, %v2929_v30 }
 0x5bf   : > { %v2068_v54 = vrot.slane %v1978_v41, %v2932_v36 }
 0x5c0   : > { %v2018_v55 = vrot.slane %v2010_v49, %v2937_v27  ;;  %v2025_v52 = vrot.slane %v2011_v50, %v2937_v27  ;;  %v2026_v56 = vcombine.low %v1994_v45, %v2009_v48  ;;  %v2027_v47 = vcombine.high %v1994_v45, %v2009_v48  ;;  %v2481_v50 = vld [vmem:[%s3224_s9] ss:$0 sm:$0xff] }
 0x5c1   : > { %v2075_v43 = vrot.slane %v2061_v51, %v2932_v36  ;;  %v2076_v57 = vcombine.low %v2053_v53, %v2068_v54  ;;  %v2077_v58 = vcombine.high %v2053_v53, %v2068_v54  ;;  %v2490_v53 = vld [vmem:[%s3220_s5] ss:$0 sm:$0xff] }
 0x5c2   : > { %v2034_v59 = vrot.slane %v2026_v56, %v2937_v27  ;;  %v2041_v30 = vrot.slane %v2027_v47, %v2937_v27  ;;  %v2112_v60 = vcombine.low %v2018_v55, %v2025_v52  ;;  %v2477_v62 = vcombine.high %v2018_v55, %v2025_v52  ;;  %v2707_v47 = vld [vmem:[%s2796_s19] sm:$0xff] }
 0x5c3   : > { %v2084_v63 = vrot.slane %v2076_v57, %v2937_v27  ;;  %v2091_v1 = vrot.slane %v2077_v58, %v2937_v27  ;;  %v2092_v3 = vcombine.low %v2060_v61, %v2075_v43  ;;  %v2093_v2 = vcombine.high %v2060_v61, %v2075_v43 }
 0x5c4   : > { %v2128_v4 = vcombine.low %v2034_v59, %v2041_v30  ;;  %v2478_v0 = vcombine.high %v2034_v59, %v2041_v30  ;;  %v2119_v8 = vrot.slane %v2112_v60, %v2932_v36  ;;  %v2127_v18 = vrot.slane %v2477_v62, %v2932_v36  ;;  %v2708_v59 = vld [vmem:[%s2796_s19 + $0x8] sm:$0xff] }
 0x5c5   : > { %v2100_v5 = vrot.slane %v2092_v3, %v2937_v27  ;;  %v2107_v6 = vrot.slane %v2093_v2, %v2937_v27  ;;  %v2162_v7 = vcombine.low %v2084_v63, %v2091_v1  ;;  %v2479_v9 = vcombine.high %v2084_v63, %v2091_v1 }
 0x5c6   : > { %v2135_v11 = vrot.slane %v2128_v4, %v2932_v36  ;;  %v2143_v12 = vrot.slane %v2478_v0, %v2932_v36  ;;  %v2144_v14 = vcombine.low %v2119_v8, %v2127_v18 }
 0x5c7   : > { %v2169_v15 = vrot.slane %v2162_v7, %v2932_v36  ;;  %v2177_v16 = vrot.slane %v2479_v9, %v2932_v36  ;;  %v2178_v17 = vcombine.low %v2100_v5, %v2107_v6  ;;  %v2480_v20 = vcombine.high %v2100_v5, %v2107_v6 }
 0x5c8   : > { %v2152_v21 = vcombine.low %v2135_v11, %v2143_v12  ;;  %v2151_v26 = vrot.slane %v2144_v14, %v2937_v27 }
 0x5c9   : > { %v2185_v22 = vrot.slane %v2178_v17, %v2932_v36  ;;  %v2193_v23 = vrot.slane %v2480_v20, %v2932_v36  ;;  %v2194_v24 = vcombine.low %v2169_v15, %v2177_v16 }
 0x5ca   : > { %v2159_v25 = vrot.slane %v2152_v21, %v2937_v27 }
 0x5cb   : > { %v2202_v28 = vcombine.low %v2185_v22, %v2193_v23  ;;  %v2201_v29 = vrot.slane %v2194_v24, %v2937_v27 }
 0x5cc   : > { %v2160_v13 = vcombine.low %v2151_v26, %v2159_v25  ;;  %v2161_v32 = vcombine.high %v2151_v26, %v2159_v25 }
 0x5cd   : > { %v2209_v31 = vrot.slane %v2202_v28, %v2937_v27 }
 0x5ce   : > { %v2215_v37 = vshrl.u32 %v2160_v13, 16  ;;  %v2221_v41 = vshrl.u32 %v2161_v32, 16 }
 0x5cf   : > { %v2211_v33 = vcombine.high %v2201_v29, %v2209_v31  ;;  %v2210_v34 = vcombine.low %v2201_v29, %v2209_v31 }
 0x5d1   : > { %v2220_v35 = vpack.i.b16 %v2211_v33, %v2161_v32  ;;  %v2216_v38 = vshrl.u32 %v2210_v34, 16  ;;  %v2214_v39 = vpack.i.b16 %v2210_v34, %v2160_v13  ;;  %v2222_v40 = vshrl.u32 %v2211_v33, 16 }
 0x5d3   : > { %2226 = vrot.lane.b32.xlu0 %v2220_v35, %s2720_s30  ;;  %v2217_v36 = vpack.i.b16 %v2216_v38, %v2215_v37  ;;  %v2223_v42 = vpack.i.b16 %v2222_v40, %v2221_v41 }
 0x5d5   : > { %2224 = vrot.lane.b32.xlu1 %v2217_v36, %s2722_s12 }
 0x5d9   : > { %2228 = vrot.lane.b32.xlu1 %v2223_v42, %s2721_s11 }
 0x645   : > { %v2227_v45 = vpop.permute.xlu0 %2226 }
 0x647   : > { %v2225_v27 = vpop.permute.xlu1 %2224 }
 0x648   : > { %v2232_v44 = vsel %vm1502_vm1, %v2214_v39, %v2225_v27 }
 0x649   : > { %v2235_v48 = vsel %vm2233_vm3, %v2232_v44, %v2227_v45 }
 0x64b   : > { %v2229_v46 = vpop.permute.xlu1 %2228 }
 0x64c   : > { %v2238_v49 = vsel %vm2236_vm4, %v2235_v48, %v2229_v46 }
 0x64d   : > { %2612 = vmatmul.mubr.bf16.vlgmr.msra.gmra.mxu0 %v2238_v49 }
 0x70d   : > { %v2345_v51 = vpop.f32.mrf.mxu0 }
 0x70e   : > { %v2346_v54 = vadd.f32 %v2481_v50, %v2345_v51 }
 0x70f   : > { %v2613_v55 = vpop.f32.mrf.mxu0 }
 0x710   : > { %v2359_v52 = vmul.f32 %v2490_v53, %v2346_v54 }
 0x711   : > { %v2348_v56 = vpop.f32.mrf.mxu0 }
 0x712   : > { %v2361_v61 = vadd.f32 %v2707_v47, %v2359_v52  ;;  %v2349_v43 = vadd.f32 %v2481_v50, %v2348_v56 }
 0x713   : > { %v2614_v57 = vpop.f32.mrf.mxu0 }
 0x714   : > { %2363 = vst [vmem:[%s361_s23] sm:$0xff] %v2361_v61  ;;  %v2360_v58 = vmul.f32 %v2490_v53, %v2349_v43 }
 0x716   : > { %v2362_v30 = vadd.f32 %v2708_v59, %v2360_v58 }
 0x718   : > { %2364 = vst [vmem:[%s361_s23 + $0x8] sm:$0xff] %v2362_v30 }
 0x719 PF: > { %s20_s13 = sadd.s32 1, %s2715_s13  }
 0x71a   : > { %p17_p4 = scmp.ge.s32.totalorder %s20_s13, 4  }
 0x71c   :  { %19 = sbr.rel (!%p17_p4) target bundleno = 1 (0x1), region = 90 }

// kernel: qwen2_code2wav_forward.32
= control target key start
LH: loop header
LB: loop body
LE: loop exit
PB: predicated region body
PF: predicated region fallthrough
CT: control target
= control target key end

     0   :  { %v347_v21 = vmov 0.0   ;;  %vm348_vm0 = vmmov 0   ;;  %v102_v41 = vlaneseq  ;;  %s482_s0 = inlined_call_operand.vmem [shape: f32[32,128], index: 0, kind: input, shape index: {}, may-alias: {0,1}]   ;;  %s483_s1 = inlined_call_operand.vmem [shape: f32[32,128], index: 1, kind: input, shape index: {}, may-alias: {0,1}]   ;;  %s484_s6 = inlined_call_operand.vmem [shape: bf16[128,128], index: 6, kind: input, shape index: {}]   ;;  %s485_s2 = inlined_call_operand.vmem [shape: f32[1,128], index: 2, kind: input, shape index: {}]   ;;  %s486_s5 = inlined_call_operand.vmem [shape: f32[1,128], index: 5, kind: input, shape index: {}]   ;;  %s487_s3 = inlined_call_operand.vmem [shape: f32[1,128], index: 3, kind: input, shape index: {}]   ;;  %s488_s4 = inlined_call_operand.vmem [shape: f32[1,128], index: 4, kind: input, shape index: {}]   ;;  %s489_s7 = inlined_call_operand.vmem [shape: f32[1,128], index: 7, kind: input, shape index: {}]   ;;  %s490_s8 = inlined_call_operand.vmem [shape: f32[16,128], index: 8, kind: input, shape index: {}]   ;;  %s491_s9 = inlined_call_operand.vmem [shape: f32[16,128], index: 9, kind: output, shape index: {}]  }
   0x1   :  { %v55_v0 = vld [vmem:[%s482_s0] sm:$0xff]  ;;  %v289_v1 = vld [vmem:[%s483_s1 + $0x10] sm:$0xff]  ;;  %v56_v2 = vld [vmem:[%s482_s0 + $0x8] sm:$0xff]  ;;  %309 = vmatprep.subr.bf16.mxu0 %v347_v21  ;;  %325 = vmatprep.mubr.msk.bf16.mxu0 %vm348_vm0, %v347_v21 }
   0x2   :  { %61 = vadd.xlane.f32.xlu0 %v55_v0  ;;  %119 = vadd.xlane.f32.xlu1 %v289_v1  ;;  %v290_v3 = vld [vmem:[%s483_s1 + $0x18] sm:$0xff]  ;;  %v332_v22 = vld [vmem:[%s484_s6 + $0x30] sm:$0xff]   ;;  %v333_v23 = vld [vmem:[%s484_s6 + $0x28] sm:$0xff]   ;;  %v103_v42 = vshrl.u32 %v102_v41, 7 }
   0x3   :  { %v331_v20 = vld [vmem:[%s484_s6 + $0x38] sm:$0xff]   ;;  %v334_v24 = vld [vmem:[%s484_s6 + $0x20] sm:$0xff]   ;;  %v336_v26 = vld [vmem:[%s484_s6 + $0x10] sm:$0xff]  }
   0x4   :  { %310 = vmatpush3.bf16.msra.mxu0 %v331_v20  ;;  %v335_v25 = vld [vmem:[%s484_s6 + $0x18] sm:$0xff]   ;;  %v337_v27 = vld [vmem:[%s484_s6 + $0x8] sm:$0xff]   ;;  %v338_v28 = vld [vmem:[%s484_s6] sm:$0xff]   ;;  %v104_v49 = vsub.s32 0, %v103_v42 }
   0x5   :  { %311 = vmatprep.subr.bf16.mxu0 %v347_v21  ;;  %v286_v44 = vld [vmem:[%s485_s2] ss:$0 sm:$0xff] }
   0x6   :  { %63 = vadd.xlane.f32.xlu0 %v56_v2  ;;  %121 = vadd.xlane.f32.xlu1 %v290_v3  ;;  %v60_v45 = vld [vmem:[%s486_s5] sm:$0x1] }
   0x7   :  { %v100_v48 = vadd.f32 1.0, %v60_v45  ;;  %v287_v51 = vld [vmem:[%s487_s3] ss:$0 sm:$0xff] }
   0x8   :  { %312 = vmatpush3.bf16.msra.mxu0 %v332_v22  ;;  %v268_v20 = vld [vmem:[%s490_s8] sm:$0xff] }
   0x9   :  { %313 = vmatprep.subr.bf16.mxu0 %v347_v21  ;;  %v105_v57 = vrot.slane %v100_v48, %v104_v49 }
   0xc   :  { %314 = vmatpush3.bf16.msra.mxu0 %v333_v23 }
   0xd   :  { %315 = vmatprep.subr.bf16.mxu0 %v347_v21 }
  0x10   :  { %316 = vmatpush3.bf16.msra.mxu0 %v334_v24 }
  0x11   :  { %317 = vmatprep.subr.bf16.mxu0 %v347_v21 }
  0x14   :  { %318 = vmatpush3.bf16.msra.mxu0 %v335_v25 }
  0x15   :  { %319 = vmatprep.subr.bf16.mxu0 %v347_v21 }
  0x18   :  { %320 = vmatpush3.bf16.msra.mxu0 %v336_v26  ;;  %v269_v26 = vld [vmem:[%s490_s8 + $0x8] sm:$0xff] }
  0x19   :  { %321 = vmatprep.subr.bf16.mxu0 %v347_v21 }
  0x1c   :  { %322 = vmatpush3.bf16.msra.mxu0 %v337_v27 }
  0x1d   :  { %323 = vmatprep.subr.bf16.mxu0 %v347_v21 }
  0x20   :  { %324 = vmatpush3.bf16.msra.mxu0 %v338_v28 }
  0x8b   :  { %v62_v4 = vpop.xlane.xlu0 %61  ;;  %v120_v5 = vpop.xlane.xlu1 %119 }
  0x8c   :  { %v66_v6 = vmul.f32 0.0078125, %v62_v4  ;;  %v123_v7 = vmul.f32 0.0078125, %v120_v5 }
  0x8e   :  { %v411_v8 = vsub.f32 %v55_v0, %v66_v6  ;;  %v413_v9 = vsub.f32 %v289_v1, %v123_v7 }
  0x8f   :  { %v64_v10 = vpop.xlane.xlu0 %63  ;;  %v122_v11 = vpop.xlane.xlu1 %121 }
  0x90   :  { %v67_v12 = vmul.f32 0.0078125, %v64_v10  ;;  %v70_v13 = vmul.f32 %v411_v8, %v411_v8  ;;  %v124_v14 = vmul.f32 0.0078125, %v122_v11  ;;  %v127_v17 = vmul.f32 %v413_v9, %v413_v9 }
  0x92   :  { %v417_v15 = vsub.f32 %v56_v2, %v67_v12  ;;  %72 = vadd.xlane.f32.xlu0 %v70_v13  ;;  %v419_v16 = vsub.f32 %v290_v3, %v124_v14  ;;  %v288_v2 = vld [vmem:[%s488_s4] ss:$0 sm:$0xff] }
  0x94   :  { %v71_v18 = vmul.f32 %v417_v15, %v417_v15  ;;  %v128_v19 = vmul.f32 %v419_v16, %v419_v16 }
  0x96   :  { %129 = vadd.xlane.f32.xlu0 %v127_v17  ;;  %74 = vadd.xlane.f32.xlu1 %v71_v18  ;;  %v291_v17 = vld [vmem:[%s489_s7] ss:$0 sm:$0xff] }
  0x9a   :  { %131 = vadd.xlane.f32.xlu1 %v128_v19 }
 0x11b   :  { %v73_v29 = vpop.xlane.xlu0 %72 }
 0x11c   :  { %v76_v30 = vmul.f32 0.0078125, %v73_v29 }
 0x11e   :  { %v78_v31 = vadd.f32 1e-06, %v76_v30 }
 0x11f   :  { %v75_v32 = vpop.xlane.xlu1 %74  ;;  %v130_v33 = vpop.xlane.xlu0 %129 }
 0x120   :  { %339 = vrsqrt.f32 %v78_v31  ;;  %v77_v34 = vmul.f32 0.0078125, %v75_v32  ;;  %v133_v35 = vmul.f32 0.0078125, %v130_v33 }
 0x122   :  { %v79_v36 = vadd.f32 1e-06, %v77_v34  ;;  %v135_v37 = vadd.f32 1e-06, %v133_v35 }
 0x123   :  { %v132_v38 = vpop.xlane.xlu1 %131 }
 0x124   :  { %341 = vrsqrt.f32 %v79_v36  ;;  %v134_v39 = vmul.f32 0.0078125, %v132_v38 }
 0x125   :  { %343 = vrsqrt.f32 %v135_v37 }
 0x126   :  { %v136_v40 = vadd.f32 1e-06, %v134_v39 }
 0x128   :  { %345 = vrsqrt.f32 %v136_v40 }
 0x12d   :  { %v340_v43 = vpop.eup %339 }
 0x12e   :  { %v82_v46 = vmul.f32 %v340_v43, %v411_v8 }
 0x130   :  { %v90_v47 = vmul.f32 %v286_v44, %v82_v46 }
 0x131   :  { %v342_v50 = vpop.eup %341 }
 0x132   :  { %v344_v52 = vpop.eup %343  ;;  %v83_v53 = vmul.f32 %v342_v50, %v417_v15  ;;  %v98_v56 = vadd.f32 %v287_v51, %v90_v47 }
 0x133   :  { %v139_v54 = vmul.f32 %v344_v52, %v413_v9 }
 0x134   :  { %v91_v55 = vmul.f32 %v286_v44, %v83_v53  ;;  %v107_v63 = vmul.f32 %v105_v57, %v98_v56 }
 0x135   :  { %v346_v58 = vpop.eup %345  ;;  %v141_v59 = vmul.f32 %v286_v44, %v139_v54 }
 0x136   :  { %v140_v60 = vmul.f32 %v346_v58, %v419_v16  ;;  %v99_v61 = vadd.f32 %v287_v51, %v91_v55  ;;  %v115_v6 = vadd.f32 %v288_v2, %v107_v63 }
 0x137   :  { %v143_v62 = vadd.f32 %v287_v51, %v141_v59 }
 0x138   :  { %v108_v0 = vmul.f32 %v105_v57, %v99_v61  ;;  %v142_v1 = vmul.f32 %v286_v44, %v140_v60  ;;  %v149_v11 = vmul.f32 1.5, %v115_v6 }
 0x139   :  { %v145_v3 = vmul.f32 %v143_v62, %v105_v57 }
 0x13a   :  { %v144_v4 = vadd.f32 %v287_v51, %v142_v1  ;;  %v116_v7 = vadd.f32 %v288_v2, %v108_v0 }
 0x13b   :  { %v147_v5 = vadd.f32 %v288_v2, %v145_v3 }
 0x13c   :  { %v146_v8 = vmul.f32 %v144_v4, %v105_v57  ;;  %v150_v12 = vmul.f32 1.5, %v116_v7 }
 0x13d   :  { %v151_v10 = vmul.f32 0.5, %v147_v5 }
 0x13e   :  { %v148_v9 = vadd.f32 %v288_v2, %v146_v8 }
 0x13f   :  { %v153_v14 = vsub.f32 %v149_v11, %v151_v10 }
 0x140   :  { %v152_v13 = vmul.f32 0.5, %v148_v9 }
 0x142   :  { %v154_v15 = vsub.f32 %v150_v12, %v152_v13 }
 0x144   :  { %v155_v16 = vpack.c.bf16 %v154_v15, %v153_v14 }
 0x146   :  { %326 = vmatmul.mubr.bf16.vlgmr.msra.gmra.mxu0 %v155_v16 }
 0x206   :  { %v261_v18 = vpop.f32.mrf.mxu0 }
 0x207   :  { %v262_v19 = vadd.f32 %v291_v17, %v261_v18 }
 0x208   :  { %v327_v21 = vpop.f32.mrf.mxu0 }
 0x209   :  { %v270_v22 = vmul.f32 0.36602542, %v262_v19 }
 0x20a   :  { %v264_v23 = vpop.f32.mrf.mxu0 }
 0x20b   :  { %v272_v24 = vadd.f32 %v270_v22, %v268_v20  ;;  %v265_v25 = vadd.f32 %v291_v17, %v264_v23 }
 0x20c   :  { %v328_v27 = vpop.f32.mrf.mxu0 }
 0x20d   :  { %274 = vst [vmem:[%s491_s9] sm:$0xff] %v272_v24  ;;  %v271_v28 = vmul.f32 0.36602542, %v265_v25 }
 0x20f   :  { %v273_v29 = vadd.f32 %v271_v28, %v269_v26 }
 0x211   :  { %275 = vst [vmem:[%s491_s9 + $0x8] sm:$0xff] %v273_v29 }

// kernel: qwen2_code2wav_forward.38
= control target key start
LH: loop header
LB: loop body
LE: loop exit
PB: predicated region body
PF: predicated region fallthrough
CT: control target
= control target key end

     0   :  { %v347_v21 = vmov 0.0   ;;  %vm348_vm0 = vmmov 0   ;;  %v102_v41 = vlaneseq  ;;  %s482_s0 = inlined_call_operand.vmem [shape: f32[32,128], index: 0, kind: input, shape index: {}, may-alias: {0,1}]   ;;  %s483_s1 = inlined_call_operand.vmem [shape: f32[32,128], index: 1, kind: input, shape index: {}, may-alias: {0,1}]   ;;  %s484_s6 = inlined_call_operand.vmem [shape: bf16[128,128], index: 6, kind: input, shape index: {}]   ;;  %s485_s2 = inlined_call_operand.vmem [shape: f32[1,128], index: 2, kind: input, shape index: {}]   ;;  %s486_s5 = inlined_call_operand.vmem [shape: f32[1,128], index: 5, kind: input, shape index: {}]   ;;  %s487_s3 = inlined_call_operand.vmem [shape: f32[1,128], index: 3, kind: input, shape index: {}]   ;;  %s488_s4 = inlined_call_operand.vmem [shape: f32[1,128], index: 4, kind: input, shape index: {}]   ;;  %s489_s7 = inlined_call_operand.vmem [shape: f32[1,128], index: 7, kind: input, shape index: {}]   ;;  %s490_s8 = inlined_call_operand.vmem [shape: f32[16,128], index: 8, kind: input, shape index: {}]   ;;  %s491_s9 = inlined_call_operand.vmem [shape: f32[16,128], index: 9, kind: output, shape index: {}]  }
   0x1   :  { %v55_v0 = vld [vmem:[%s482_s0] sm:$0xff]  ;;  %v289_v1 = vld [vmem:[%s483_s1 + $0x10] sm:$0xff]  ;;  %v56_v2 = vld [vmem:[%s482_s0 + $0x8] sm:$0xff]  ;;  %309 = vmatprep.subr.bf16.mxu0 %v347_v21  ;;  %325 = vmatprep.mubr.msk.bf16.mxu0 %vm348_vm0, %v347_v21 }
   0x2   :  { %61 = vadd.xlane.f32.xlu0 %v55_v0  ;;  %119 = vadd.xlane.f32.xlu1 %v289_v1  ;;  %v290_v3 = vld [vmem:[%s483_s1 + $0x18] sm:$0xff]  ;;  %v332_v22 = vld [vmem:[%s484_s6 + $0x30] sm:$0xff]   ;;  %v333_v23 = vld [vmem:[%s484_s6 + $0x28] sm:$0xff]   ;;  %v103_v42 = vshrl.u32 %v102_v41, 7 }
   0x3   :  { %v331_v20 = vld [vmem:[%s484_s6 + $0x38] sm:$0xff]   ;;  %v334_v24 = vld [vmem:[%s484_s6 + $0x20] sm:$0xff]   ;;  %v336_v26 = vld [vmem:[%s484_s6 + $0x10] sm:$0xff]  }
   0x4   :  { %310 = vmatpush3.bf16.msra.mxu0 %v331_v20  ;;  %v335_v25 = vld [vmem:[%s484_s6 + $0x18] sm:$0xff]   ;;  %v337_v27 = vld [vmem:[%s484_s6 + $0x8] sm:$0xff]   ;;  %v338_v28 = vld [vmem:[%s484_s6] sm:$0xff]   ;;  %v104_v49 = vsub.s32 0, %v103_v42 }
   0x5   :  { %311 = vmatprep.subr.bf16.mxu0 %v347_v21  ;;  %v286_v44 = vld [vmem:[%s485_s2] ss:$0 sm:$0xff] }
   0x6   :  { %63 = vadd.xlane.f32.xlu0 %v56_v2  ;;  %121 = vadd.xlane.f32.xlu1 %v290_v3  ;;  %v60_v45 = vld [vmem:[%s486_s5] sm:$0x1] }
   0x7   :  { %v100_v48 = vadd.f32 1.0, %v60_v45  ;;  %v287_v51 = vld [vmem:[%s487_s3] ss:$0 sm:$0xff] }
   0x8   :  { %312 = vmatpush3.bf16.msra.mxu0 %v332_v22  ;;  %v268_v20 = vld [vmem:[%s490_s8] sm:$0xff] }
   0x9   :  { %313 = vmatprep.subr.bf16.mxu0 %v347_v21  ;;  %v105_v57 = vrot.slane %v100_v48, %v104_v49 }
   0xc   :  { %314 = vmatpush3.bf16.msra.mxu0 %v333_v23 }
   0xd   :  { %315 = vmatprep.subr.bf16.mxu0 %v347_v21 }
  0x10   :  { %316 = vmatpush3.bf16.msra.mxu0 %v334_v24 }
  0x11   :  { %317 = vmatprep.subr.bf16.mxu0 %v347_v21 }
  0x14   :  { %318 = vmatpush3.bf16.msra.mxu0 %v335_v25 }
  0x15   :  { %319 = vmatprep.subr.bf16.mxu0 %v347_v21 }
  0x18   :  { %320 = vmatpush3.bf16.msra.mxu0 %v336_v26  ;;  %v269_v26 = vld [vmem:[%s490_s8 + $0x8] sm:$0xff] }
  0x19   :  { %321 = vmatprep.subr.bf16.mxu0 %v347_v21 }
  0x1c   :  { %322 = vmatpush3.bf16.msra.mxu0 %v337_v27 }
  0x1d   :  { %323 = vmatprep.subr.bf16.mxu0 %v347_v21 }
  0x20   :  { %324 = vmatpush3.bf16.msra.mxu0 %v338_v28 }
  0x8b   :  { %v62_v4 = vpop.xlane.xlu0 %61  ;;  %v120_v5 = vpop.xlane.xlu1 %119 }
  0x8c   :  { %v66_v6 = vmul.f32 0.0078125, %v62_v4  ;;  %v123_v7 = vmul.f32 0.0078125, %v120_v5 }
  0x8e   :  { %v411_v8 = vsub.f32 %v55_v0, %v66_v6  ;;  %v413_v9 = vsub.f32 %v289_v1, %v123_v7 }
  0x8f   :  { %v64_v10 = vpop.xlane.xlu0 %63  ;;  %v122_v11 = vpop.xlane.xlu1 %121 }
  0x90   :  { %v67_v12 = vmul.f32 0.0078125, %v64_v10  ;;  %v70_v13 = vmul.f32 %v411_v8, %v411_v8  ;;  %v124_v14 = vmul.f32 0.0078125, %v122_v11  ;;  %v127_v17 = vmul.f32 %v413_v9, %v413_v9 }
  0x92   :  { %v417_v15 = vsub.f32 %v56_v2, %v67_v12  ;;  %72 = vadd.xlane.f32.xlu0 %v70_v13  ;;  %v419_v16 = vsub.f32 %v290_v3, %v124_v14  ;;  %v288_v2 = vld [vmem:[%s488_s4] ss:$0 sm:$0xff] }
  0x94   :  { %v71_v18 = vmul.f32 %v417_v15, %v417_v15  ;;  %v128_v19 = vmul.f32 %v419_v16, %v419_v16 }
  0x96   :  { %129 = vadd.xlane.f32.xlu0 %v127_v17  ;;  %74 = vadd.xlane.f32.xlu1 %v71_v18  ;;  %v291_v17 = vld [vmem:[%s489_s7] ss:$0 sm:$0xff] }
  0x9a   :  { %131 = vadd.xlane.f32.xlu1 %v128_v19 }
 0x11b   :  { %v73_v29 = vpop.xlane.xlu0 %72 }
 0x11c   :  { %v76_v30 = vmul.f32 0.0078125, %v73_v29 }
 0x11e   :  { %v78_v31 = vadd.f32 1e-06, %v76_v30 }
 0x11f   :  { %v75_v32 = vpop.xlane.xlu1 %74  ;;  %v130_v33 = vpop.xlane.xlu0 %129 }
 0x120   :  { %339 = vrsqrt.f32 %v78_v31  ;;  %v77_v34 = vmul.f32 0.0078125, %v75_v32  ;;  %v133_v35 = vmul.f32 0.0078125, %v130_v33 }
 0x122   :  { %v79_v36 = vadd.f32 1e-06, %v77_v34  ;;  %v135_v37 = vadd.f32 1e-06, %v133_v35 }
 0x123   :  { %v132_v38 = vpop.xlane.xlu1 %131 }
 0x124   :  { %341 = vrsqrt.f32 %v79_v36  ;;  %v134_v39 = vmul.f32 0.0078125, %v132_v38 }
 0x125   :  { %343 = vrsqrt.f32 %v135_v37 }
 0x126   :  { %v136_v40 = vadd.f32 1e-06, %v134_v39 }
 0x128   :  { %345 = vrsqrt.f32 %v136_v40 }
 0x12d   :  { %v340_v43 = vpop.eup %339 }
 0x12e   :  { %v82_v46 = vmul.f32 %v340_v43, %v411_v8 }
 0x130   :  { %v90_v47 = vmul.f32 %v286_v44, %v82_v46 }
 0x131   :  { %v342_v50 = vpop.eup %341 }
 0x132   :  { %v344_v52 = vpop.eup %343  ;;  %v83_v53 = vmul.f32 %v342_v50, %v417_v15  ;;  %v98_v56 = vadd.f32 %v287_v51, %v90_v47 }
 0x133   :  { %v139_v54 = vmul.f32 %v344_v52, %v413_v9 }
 0x134   :  { %v91_v55 = vmul.f32 %v286_v44, %v83_v53  ;;  %v107_v63 = vmul.f32 %v105_v57, %v98_v56 }
 0x135   :  { %v346_v58 = vpop.eup %345  ;;  %v141_v59 = vmul.f32 %v286_v44, %v139_v54 }
 0x136   :  { %v140_v60 = vmul.f32 %v346_v58, %v419_v16  ;;  %v99_v61 = vadd.f32 %v287_v51, %v91_v55  ;;  %v115_v6 = vadd.f32 %v288_v2, %v107_v63 }
 0x137   :  { %v143_v62 = vadd.f32 %v287_v51, %v141_v59 }
 0x138   :  { %v108_v0 = vmul.f32 %v105_v57, %v99_v61  ;;  %v142_v1 = vmul.f32 %v286_v44, %v140_v60  ;;  %v149_v11 = vmul.f32 1.5, %v115_v6 }
 0x139   :  { %v145_v3 = vmul.f32 %v143_v62, %v105_v57 }
 0x13a   :  { %v144_v4 = vadd.f32 %v287_v51, %v142_v1  ;;  %v116_v7 = vadd.f32 %v288_v2, %v108_v0 }
 0x13b   :  { %v147_v5 = vadd.f32 %v288_v2, %v145_v3 }
 0x13c   :  { %v146_v8 = vmul.f32 %v144_v4, %v105_v57  ;;  %v150_v12 = vmul.f32 1.5, %v116_v7 }
 0x13d   :  { %v151_v10 = vmul.f32 0.5, %v147_v5 }
 0x13e   :  { %v148_v9 = vadd.f32 %v288_v2, %v146_v8 }
 0x13f   :  { %v153_v14 = vsub.f32 %v149_v11, %v151_v10 }
 0x140   :  { %v152_v13 = vmul.f32 0.5, %v148_v9 }
 0x142   :  { %v154_v15 = vsub.f32 %v150_v12, %v152_v13 }
 0x144   :  { %v155_v16 = vpack.c.bf16 %v154_v15, %v153_v14 }
 0x146   :  { %326 = vmatmul.mubr.bf16.vlgmr.msra.gmra.mxu0 %v155_v16 }
 0x206   :  { %v261_v18 = vpop.f32.mrf.mxu0 }
 0x207   :  { %v262_v19 = vadd.f32 %v291_v17, %v261_v18 }
 0x208   :  { %v327_v21 = vpop.f32.mrf.mxu0 }
 0x209   :  { %v270_v22 = vmul.f32 0.5, %v262_v19 }
 0x20a   :  { %v264_v23 = vpop.f32.mrf.mxu0 }
 0x20b   :  { %v272_v24 = vadd.f32 %v270_v22, %v268_v20  ;;  %v265_v25 = vadd.f32 %v291_v17, %v264_v23 }
 0x20c   :  { %v328_v27 = vpop.f32.mrf.mxu0 }
 0x20d   :  { %274 = vst [vmem:[%s491_s9] sm:$0xff] %v272_v24  ;;  %v271_v28 = vmul.f32 0.5, %v265_v25 }
 0x20f   :  { %v273_v29 = vadd.f32 %v271_v28, %v269_v26 }
 0x211   :  { %275 = vst [vmem:[%s491_s9 + $0x8] sm:$0xff] %v273_v29 }

// kernel: qwen2_code2wav_forward.39
= control target key start
LH: loop header
LB: loop body
LE: loop exit
PB: predicated region body
PF: predicated region fallthrough
CT: control target
= control target key end

     0   :  { %v268_v1 = vmov 0   ;;  %v191_v18 = vlaneseq  ;;  %s355_s1 = inlined_call_operand.vmem [shape: bf16[128,256], index: 1, kind: input, shape index: {}]   ;;  %s356_s0 = inlined_call_operand.vmem [shape: bf16[16,128], index: 0, kind: input, shape index: {}]   ;;  %s357_s2 = inlined_call_operand.vmem [shape: f32[1,256], index: 2, kind: input, shape index: {}]   ;;  %s358_s3 = inlined_call_operand.vmem [shape: f32[16,256], index: 3, kind: output, shape index: {}]  }
   0x1   :  { %v235_v0 = vld [vmem:[%s355_s1 + $0x74] ss:$8 sps:$4 sm:$0xff]   ;;  %163 = vmatprep.mubr.bf16.mxu0 %v268_v1  ;;  %v237_v2 = vld [vmem:[%s355_s1 + $0x70] ss:$8 sps:$4 sm:$0xff]   ;;  %v238_v3 = vld [vmem:[%s355_s1 + $0x64] ss:$8 sps:$4 sm:$0xff]  }
   0x2   :  { %131 = vmatprep.subr.bf16.mxu0 %v235_v0  ;;  %v240_v4 = vld [vmem:[%s355_s1 + $0x60] ss:$8 sps:$4 sm:$0xff]   ;;  %v241_v5 = vld [vmem:[%s355_s1 + $0x54] ss:$8 sps:$4 sm:$0xff]   ;;  %v243_v6 = vld [vmem:[%s355_s1 + $0x50] ss:$8 sps:$4 sm:$0xff]  }
   0x3   :  { %132 = vmatpush1.bf16.msra.mxu0 %v237_v2  ;;  %v244_v7 = vld [vmem:[%s355_s1 + $0x44] ss:$8 sps:$4 sm:$0xff]   ;;  %v246_v8 = vld [vmem:[%s355_s1 + $0x40] ss:$8 sps:$4 sm:$0xff]   ;;  %v247_v9 = vld [vmem:[%s355_s1 + $0x34] ss:$8 sps:$4 sm:$0xff]  }
   0x4   :  { %133 = vmatprep.subr.bf16.mxu0 %v238_v3  ;;  %v249_v10 = vld [vmem:[%s355_s1 + $0x30] ss:$8 sps:$4 sm:$0xff]   ;;  %v250_v11 = vld [vmem:[%s355_s1 + $0x24] ss:$8 sps:$4 sm:$0xff]   ;;  %v252_v12 = vld [vmem:[%s355_s1 + $0x20] ss:$8 sps:$4 sm:$0xff]  }
   0x5   :  { %v253_v13 = vld [vmem:[%s355_s1 + $0x14] ss:$8 sps:$4 sm:$0xff]   ;;  %v255_v14 = vld [vmem:[%s355_s1 + $0x10] ss:$8 sps:$4 sm:$0xff]   ;;  %v256_v15 = vld [vmem:[%s355_s1 + $0x4] ss:$8 sps:$4 sm:$0xff]  }
   0x6   :  { %v258_v16 = vld [vmem:[%s355_s1] ss:$8 sps:$4 sm:$0xff]   ;;  %v192_v19 = vshrl.u32 %v191_v18, 7 }
   0x7   :  { %134 = vmatpush1.bf16.msra.mxu0 %v240_v4  ;;  %v259_v17 = vld [vmem:[%s356_s0] sm:$0xff]  }
   0x8   :  { %135 = vmatprep.subr.bf16.mxu0 %v241_v5  ;;  %v193_v20 = vsub.s32 0, %v192_v19  ;;  %v189_v21 = vld [vmem:[%s357_s2] sm:$0x3]  ;;  %v197_v22 = vsub.s32 1, %v192_v19 }
   0xa   :  { %v194_v23 = vrot.slane %v189_v21, %v193_v20  ;;  %v198_v24 = vrot.slane %v189_v21, %v197_v22 }
   0xb   :  { %136 = vmatpush1.bf16.msra.mxu0 %v243_v6 }
   0xc   :  { %137 = vmatprep.subr.bf16.mxu0 %v244_v7 }
   0xf   :  { %138 = vmatpush1.bf16.msra.mxu0 %v246_v8 }
  0x10   :  { %139 = vmatprep.subr.bf16.mxu0 %v247_v9 }
  0x13   :  { %140 = vmatpush1.bf16.msra.mxu0 %v249_v10 }
  0x14   :  { %141 = vmatprep.subr.bf16.mxu0 %v250_v11 }
  0x17   :  { %142 = vmatpush1.bf16.msra.mxu0 %v252_v12 }
  0x18   :  { %143 = vmatprep.subr.bf16.mxu0 %v253_v13 }
  0x1b   :  { %144 = vmatpush1.bf16.msra.mxu0 %v255_v14 }
  0x1c   :  { %145 = vmatprep.subr.bf16.mxu0 %v256_v15 }
  0x1f   :  { %146 = vmatpush1.bf16.msra.mxu0 %v258_v16 }
  0x22   :  { %164 = vmatmul.mubr.bf16.vlgmr.msra.gmra.mxu0 %v259_v17 }
  0xe2   :  { %v165_v25 = vpop.f32.mrf.mxu0 }
  0xe3   :  { %v201_v26 = vadd.f32 %v194_v23, %v165_v25 }
  0xe4   :  { %v167_v27 = vpop.f32.mrf.mxu0 }
  0xe5   :  { %260 = vtanh.f32 %v201_v26  ;;  %v202_v28 = vadd.f32 %v198_v24, %v167_v27 }
  0xe6   :  { %v169_v29 = vpop.f32.mrf.mxu0 }
  0xe7   :  { %262 = vtanh.f32 %v202_v28  ;;  %v203_v30 = vadd.f32 %v194_v23, %v169_v29 }
  0xe8   :  { %v171_v31 = vpop.f32.mrf.mxu0 }
  0xe9   :  { %264 = vtanh.f32 %v203_v30  ;;  %v204_v32 = vadd.f32 %v198_v24, %v171_v31 }
  0xeb   :  { %266 = vtanh.f32 %v204_v32 }
  0xf2   :  { %v261_v33 = vpop.eup %260 }
  0xf3   :  { %209 = vst [vmem:[%s358_s3] sm:$0xff] %v261_v33 }
  0xf4   :  { %v263_v34 = vpop.eup %262 }
  0xf5   :  { %210 = vst [vmem:[%s358_s3 + $0x8] sm:$0xff] %v263_v34 }
  0xf6   :  { %v265_v35 = vpop.eup %264 }
  0xf7   :  { %211 = vst [vmem:[%s358_s3 + $0x10] sm:$0xff] %v265_v35 }
  0xf8   :  { %v267_v36 = vpop.eup %266 }
  0xf9   :  { %212 = vst [vmem:[%s358_s3 + $0x18] sm:$0xff] %v267_v36 }

</bundles_post_ra>
